<compile_context>
chip_gen: v6e
topology: v6e:2x2x1
jax: 0.10.0
libtpu: 0.0.40
codegen_flags: <defaults>
</compile_context>

<pallas_src>
import math

import numpy as np
import jax
import jax.numpy as jnp
from jax.experimental import pallas as pl
from jax.experimental.pallas import tpu as pltpu

# ----------------------- model hyper-parameters (small) -----------------------
INPUT_DIM   = 4
D_MODEL     = 32
N_HEADS     = 4
HEAD_DIM    = D_MODEL // N_HEADS
FF_DIM      = 64
NUM_LAYERS  = 2
KERNEL_SIZE = 5          # odd -> AvgPool1d(stride=1, padding=(k-1)//2) preserves length
SRC_LEN     = 8
TGT_LEN     = 8
BATCH       = 2
LN_EPS      = 1e-5
NEG_INF     = -1e30
ATTN_SCALE  = 1.0 / math.sqrt(HEAD_DIM)

LANES = 128
BS = BATCH * SRC_LEN
BT = BATCH * TGT_LEN


# =========================== host-side static helpers ===========================

def positional_encoding_np(seq_len, d_model):
    pos = np.arange(seq_len, dtype=np.float32)[:, None]
    div = np.exp(np.arange(0, d_model, 2, dtype=np.float32)
                 * (-math.log(10000.0) / d_model))
    pe = np.zeros((seq_len, d_model), np.float32)
    pe[:, 0::2] = np.sin(pos * div)
    pe[:, 1::2] = np.cos(pos * div)
    return pe                                        # (S, D)


def init_params(key):
    """Flat name -> numpy array dict with all model parameters."""
    params = {}
    all_keys = jax.random.split(key, 64)
    kidx = [0]

    def nrm(shape):
        k = all_keys[kidx[0]]
        kidx[0] += 1
        return np.asarray(jax.random.normal(k, shape, jnp.float32)) * 0.1

    def zeros(shape):
        return np.zeros(shape, np.float32)

    def ones(shape):
        return np.ones(shape, np.float32)

    def add_attn(prefix):
        for w in ("wq", "wk", "wv", "wo"):
            params[f"{prefix}.{w}"] = nrm((D_MODEL, D_MODEL))
        for b in ("bq", "bk", "bv", "bo"):
            params[f"{prefix}.{b}"] = zeros((1, D_MODEL))

    params["in_w"] = nrm((INPUT_DIM, D_MODEL))
    params["in_b"] = zeros((1, D_MODEL))
    params["out_w"] = nrm((D_MODEL, 1))
    params["out_b"] = zeros((1, 1))

    for l in range(NUM_LAYERS):
        add_attn(f"enc{l}.attn")
        params[f"enc{l}.w1"] = nrm((D_MODEL, FF_DIM))
        params[f"enc{l}.b1"] = zeros((1, FF_DIM))
        params[f"enc{l}.w2"] = nrm((FF_DIM, D_MODEL))
        params[f"enc{l}.b2"] = zeros((1, D_MODEL))
        for n in ("ln1", "ln2"):
            params[f"enc{l}.{n}g"] = ones((1, D_MODEL))
            params[f"enc{l}.{n}b"] = zeros((1, D_MODEL))

    for l in range(NUM_LAYERS):
        add_attn(f"dec{l}.self")
        add_attn(f"dec{l}.cross")
        params[f"dec{l}.w1"] = nrm((D_MODEL, FF_DIM))
        params[f"dec{l}.b1"] = zeros((1, FF_DIM))
        params[f"dec{l}.w2"] = nrm((FF_DIM, D_MODEL))
        params[f"dec{l}.b2"] = zeros((1, D_MODEL))
        for n in ("ln1", "ln2", "ln3"):
            params[f"dec{l}.{n}g"] = ones((1, D_MODEL))
            params[f"dec{l}.{n}b"] = zeros((1, D_MODEL))
    return params


def build_constants():
    """Host-precomputed constant matrices (were iota-built inside the kernel before)."""
    c = {}
    c["pe_src"] = np.tile(positional_encoding_np(SRC_LEN, D_MODEL), (BATCH, 1))  # (B*S, D)
    c["pe_tgt"] = np.tile(positional_encoding_np(TGT_LEN, D_MODEL), (BATCH, 1))  # (B*T, D)

    # Moving-average matrix: AvgPool1d(stride=1, pad=(k-1)//2, count_include_pad=True).
    pad = (KERNEL_SIZE - 1) // 2
    r = np.arange(BS)[:, None]
    col = np.arange(BS)[None, :]
    same_batch = (r // SRC_LEN) == (col // SRC_LEN)
    in_window = np.abs((r % SRC_LEN) - (col % SRC_LEN)) <= pad
    c["avg_mat"] = np.where(same_batch & in_window, 1.0 / KERNEL_SIZE, 0.0).astype(np.float32)

    # Decoder-input right shift (zero row at t=0 inside each batch).
    r = np.arange(BT)[:, None]
    col = np.arange(BT)[None, :]
    c["shift_mat"] = np.where((col == r - 1) & ((r % TGT_LEN) != 0), 1.0, 0.0).astype(np.float32)

    # Additive attention biases: 0 inside the same batch block, -1e30 across batches.
    def block_bias(mq, lq, mk, lk):
        qi = np.arange(mq)[:, None]
        ki = np.arange(mk)[None, :]
        return np.where((qi // lq) == (ki // lk), 0.0, NEG_INF).astype(np.float32)

    c["bias_ss"] = block_bias(BS, SRC_LEN, BS, SRC_LEN)
    c["bias_tt"] = block_bias(BT, TGT_LEN, BT, TGT_LEN)
    c["bias_ts"] = block_bias(BT, TGT_LEN, BS, SRC_LEN)

    # Per-head lane masks (replace head split/merge transposes), one row per head.
    ch = np.arange(D_MODEL)[None, :]
    c["head_masks"] = np.concatenate(
        [((ch >= h * HEAD_DIM) & (ch < (h + 1) * HEAD_DIM)).astype(np.float32)
         for h in range(N_HEADS)], axis=0)                                         # (H, D)
    return c


class Slab:
    """Packs many small f32 arrays into a single lane-dense (rows, 128) slab."""

    def __init__(self, width=LANES):
        self.width = width
        self._blocks = []
        self._cursor = 0
        self.index = {}          # name -> (row0, nrows, ncols)

    def add(self, name, arr, align=8):
        arr = np.asarray(arr, np.float32)
        if arr.ndim == 1:
            arr = arr[None, :]
        rows, cols = arr.shape
        assert cols <= self.width, (name, arr.shape)
        pad = (-self._cursor) % align
        if pad:
            self._blocks.append(np.zeros((pad, self.width), np.float32))
            self._cursor += pad
        blk = np.zeros((rows, self.width), np.float32)
        blk[:, :cols] = arr
        self._blocks.append(blk)
        self.index[name] = (self._cursor, rows, cols)
        self._cursor += rows

    def finalize(self):
        pad = (-self._cursor) % 8
        if pad:
            self._blocks.append(np.zeros((pad, self.width), np.float32))
            self._cursor += pad
        return np.concatenate(self._blocks, axis=0)


# ================================ fused forward ================================

def build_forward(params):
    consts = build_constants()
    items = list(consts.items()) + list(params.items())

    packer = Slab()
    # Multi-row blocks first (8-aligned), then the single-row vectors packed densely.
    for name, arr in items:
        if np.asarray(arr).shape[0] > 1:
            packer.add(name, arr, align=8)
    for name, arr in items:
        if np.asarray(arr).shape[0] == 1:
            packer.add(name, arr, align=1)
    slab_host = packer.finalize()
    idx = packer.index
    slab = jnp.asarray(slab_host)                    # single lane-dense constant operand

    def kernel(x_ref, tgt_ref, slab_ref, out_ref):
        def rd(name, full_width=False):
            r0, rows, cols = idx[name]
            c = LANES if full_width else cols
            return slab_ref[r0:r0 + rows, :c]        # static slice of VMEM ref -> free

        def layer_norm(z, prefix):
            g = rd(prefix + "g")
            b = rd(prefix + "b")
            mean = jnp.mean(z, axis=-1, keepdims=True)
            var = jnp.mean((z - mean) ** 2, axis=-1, keepdims=True)
            return (z - mean) * jax.lax.rsqrt(var + LN_EPS) * g + b

        def mha(xq, xkv, prefix, bias, head_masks):
            # Per-head lane masks keep every matmul full-width:
            # (q*mask_h) @ k^T == q_h @ k_h^T, and p @ (v*mask_h) writes only head-h
            # channels, so summing over heads is the concat of heads.
            q = jnp.dot(xq, rd(prefix + ".wq"),
                        preferred_element_type=jnp.float32) + rd(prefix + ".bq")
            k = jnp.dot(xkv, rd(prefix + ".wk"),
                        preferred_element_type=jnp.float32) + rd(prefix + ".bk")
            v = jnp.dot(xkv, rd(prefix + ".wv"),
                        preferred_element_type=jnp.float32) + rd(prefix + ".bv")
            ctx = jnp.zeros_like(q)
            for hm in head_masks:
                s = jax.lax.dot_general(q * hm, k, (((1,), (1,)), ((), ())),
                                        preferred_element_type=jnp.float32)
                s = s * ATTN_SCALE + bias            # additive block-diag mask
                s = s - jnp.max(s, axis=-1, keepdims=True)
                p = jnp.exp(s)
                p = p * pl.reciprocal(jnp.sum(p, axis=-1, keepdims=True), approx=True)
                ctx = ctx + jnp.dot(p, v * hm, preferred_element_type=jnp.float32)
            return (jnp.dot(ctx, rd(prefix + ".wo"),
                            preferred_element_type=jnp.float32) + rd(prefix + ".bo"))

        def ffn(x, prefix):
            h = jnp.dot(x, rd(prefix + ".w1"),
                        preferred_element_type=jnp.float32) + rd(prefix + ".b1")
            h = jnp.maximum(h, 0.0)
            return (jnp.dot(h, rd(prefix + ".w2"),
                            preferred_element_type=jnp.float32) + rd(prefix + ".b2"))

        x = x_ref[...]        # (B*S, C)   batch-major token rows
        tgt = tgt_ref[...]    # (B*T, D)

        hr0, _, hcols = idx["head_masks"]
        head_masks = [slab_ref[hr0 + h:hr0 + h + 1, :hcols] for h in range(N_HEADS)]

        # --- series decomposition (trend = block-diag moving-average matmul) ---
        trend = jnp.dot(rd("avg_mat"), x, preferred_element_type=jnp.float32)
        seasonal = x - trend

        # --- encoder ---
        bias_ss = rd("bias_ss")
        enc_x = (jnp.dot(seasonal, rd("in_w"), preferred_element_type=jnp.float32)
                 + rd("in_b") + rd("pe_src"))
        for l in range(NUM_LAYERS):
            a = mha(enc_x, enc_x, f"enc{l}.attn", bias_ss, head_masks)
            enc_x = layer_norm(enc_x + a, f"enc{l}.ln1")
            f = ffn(enc_x, f"enc{l}")
            enc_x = layer_norm(enc_x + f, f"enc{l}.ln2")

        # --- decoder input: right-shift target within each batch, add PE ---
        dec_x = (jnp.dot(rd("shift_mat"), tgt, preferred_element_type=jnp.float32)
                 + rd("pe_tgt"))

        # --- decoder ---
        bias_tt = rd("bias_tt")
        bias_ts = rd("bias_ts")
        for l in range(NUM_LAYERS):
            sa = mha(dec_x, dec_x, f"dec{l}.self", bias_tt, head_masks)
            dec_x = layer_norm(dec_x + sa, f"dec{l}.ln1")
            ca = mha(dec_x, enc_x, f"dec{l}.cross", bias_ts, head_masks)
            dec_x = layer_norm(dec_x + ca, f"dec{l}.ln2")
            f = ffn(dec_x, f"dec{l}")
            dec_x = layer_norm(dec_x + f, f"dec{l}.ln3")

        # --- output projection, lane-dense store: only column 0 is meaningful ---
        out = (jnp.dot(dec_x, rd("out_w", full_width=True),
                       preferred_element_type=jnp.float32)
               + rd("out_b", full_width=True))
        out_ref[...] = out        # (B*T, 128)

    fused = pl.pallas_call(
        kernel,
        out_shape=jax.ShapeDtypeStruct((BT, LANES), jnp.float32),
        compiler_params=pltpu.CompilerParams(vmem_limit_bytes=8 * 1024 * 1024),
    )

    @jax.jit
    def forward(x, target):
        # x: (B, S, input_dim), target: (B, T, d_model) -> (B, T)
        x2 = x.reshape(BS, INPUT_DIM).astype(jnp.float32)
        t2 = target.reshape(BT, D_MODEL).astype(jnp.float32)
        out = fused(x2, t2, slab)
        return out[:, 0].reshape(BATCH, TGT_LEN)

    return forward


# =================================== main =====================================

if __name__ == "__main__":
    key = jax.random.PRNGKey(0)
    k_params, k_x, k_t = jax.random.split(key, 3)

    params = init_params(k_params)
    forward = build_forward(params)

    x = jax.random.normal(k_x, (BATCH, SRC_LEN, INPUT_DIM), jnp.float32)
    target = jax.random.normal(k_t, (BATCH, TGT_LEN, D_MODEL), jnp.float32)

    out = jax.block_until_ready(forward(x, target))
    assert out.shape == (BATCH, TGT_LEN), out.shape
    assert bool(jnp.all(jnp.isfinite(out)))
    print("KERNEL_OK")
</pallas_src>

<mosaic_0001>
module attributes {stable_mosaic.version = 11 : i64} {
  func.func @kernel(%arg0: memref<16x4xf32, #tpu.memory_space<vmem>>, %arg1: memref<16x32xf32, #tpu.memory_space<vmem>>, %arg2: memref<1368x128xf32, #tpu.memory_space<vmem>>, %arg3: memref<16x128xf32, #tpu.memory_space<vmem>>) attributes {dimension_semantics = [], scalar_prefetch = 0 : i64, scratch_operands = 0 : i64, tpu.core_type = #tpu.core_type<tc>} {
    %c0 = arith.constant 0 : index
    %c0_0 = arith.constant 0 : index
    %0 = vector.load %arg0[%c0, %c0_0] : memref<16x4xf32, #tpu.memory_space<vmem>>, vector<16x4xf32>
    %c0_1 = arith.constant 0 : index
    %c0_2 = arith.constant 0 : index
    %1 = vector.load %arg1[%c0_1, %c0_2] : memref<16x32xf32, #tpu.memory_space<vmem>>, vector<16x32xf32>
    %c112 = arith.constant 112 : index
    %c0_3 = arith.constant 0 : index
    %2 = vector.load %arg2[%c112, %c0_3] : memref<1368x128xf32, #tpu.memory_space<vmem>>, vector<1x32xf32>
    %c113 = arith.constant 113 : index
    %c0_4 = arith.constant 0 : index
    %3 = vector.load %arg2[%c113, %c0_4] : memref<1368x128xf32, #tpu.memory_space<vmem>>, vector<1x32xf32>
    %c114 = arith.constant 114 : index
    %c0_5 = arith.constant 0 : index
    %4 = vector.load %arg2[%c114, %c0_5] : memref<1368x128xf32, #tpu.memory_space<vmem>>, vector<1x32xf32>
    %c115 = arith.constant 115 : index
    %c0_6 = arith.constant 0 : index
    %5 = vector.load %arg2[%c115, %c0_6] : memref<1368x128xf32, #tpu.memory_space<vmem>>, vector<1x32xf32>
    %c32 = arith.constant 32 : index
    %c0_7 = arith.constant 0 : index
    %6 = vector.load %arg2[%c32, %c0_7] : memref<1368x128xf32, #tpu.memory_space<vmem>>, vector<16x16xf32>
    %cst = arith.constant dense<0.000000e+00> : vector<16x4xf32>
    %7 = tpu.matmul %6, %0, %cst {dimension_numbers = #tpu.dot_dimension_numbers<[1], [0], [0], [1], [0, 0, 1, 1], [], []>} : vector<16x16xf32>, vector<16x4xf32>, vector<16x4xf32> -> vector<16x4xf32>
    %8 = arith.subf %0, %7 : vector<16x4xf32>
    %c64 = arith.constant 64 : index
    %c0_8 = arith.constant 0 : index
    %9 = vector.load %arg2[%c64, %c0_8] : memref<1368x128xf32, #tpu.memory_space<vmem>>, vector<16x16xf32>
    %c120 = arith.constant 120 : index
    %c0_9 = arith.constant 0 : index
    %10 = vector.load %arg2[%c120, %c0_9] : memref<1368x128xf32, #tpu.memory_space<vmem>>, vector<4x32xf32>
    %cst_10 = arith.constant dense<0.000000e+00> : vector<16x32xf32>
    %11 = tpu.matmul %8, %10, %cst_10 {dimension_numbers = #tpu.dot_dimension_numbers<[1], [0], [0], [1], [0, 0, 1, 1], [], []>} : vector<16x4xf32>, vector<4x32xf32>, vector<16x32xf32> -> vector<16x32xf32>
    %c1312 = arith.constant 1312 : index
    %c0_11 = arith.constant 0 : index
    %12 = vector.load %arg2[%c1312, %c0_11] : memref<1368x128xf32, #tpu.memory_space<vmem>>, vector<1x32xf32>
    %13 = vector.broadcast %12 : vector<1x32xf32> to vector<16x32xf32>
    %14 = arith.addf %11, %13 : vector<16x32xf32>
    %c0_12 = arith.constant 0 : index
    %c0_13 = arith.constant 0 : index
    %15 = vector.load %arg2[%c0_12, %c0_13] : memref<1368x128xf32, #tpu.memory_space<vmem>>, vector<16x32xf32>
    %16 = arith.addf %14, %15 : vector<16x32xf32>
    %c160 = arith.constant 160 : index
    %c0_14 = arith.constant 0 : index
    %17 = vector.load %arg2[%c160, %c0_14] : memref<1368x128xf32, #tpu.memory_space<vmem>>, vector<32x32xf32>
    %cst_15 = arith.constant dense<0.000000e+00> : vector<16x32xf32>
    %18 = tpu.matmul %16, %17, %cst_15 {dimension_numbers = #tpu.dot_dimension_numbers<[1], [0], [0], [1], [0, 0, 1, 1], [], []>} : vector<16x32xf32>, vector<32x32xf32>, vector<16x32xf32> -> vector<16x32xf32>
    %c1314 = arith.constant 1314 : index
    %c0_16 = arith.constant 0 : index
    %19 = vector.load %arg2[%c1314, %c0_16] : memref<1368x128xf32, #tpu.memory_space<vmem>>, vector<1x32xf32>
    %20 = vector.broadcast %19 : vector<1x32xf32> to vector<16x32xf32>
    %21 = arith.addf %18, %20 : vector<16x32xf32>
    %c192 = arith.constant 192 : index
    %c0_17 = arith.constant 0 : index
    %22 = vector.load %arg2[%c192, %c0_17] : memref<1368x128xf32, #tpu.memory_space<vmem>>, vector<32x32xf32>
    %cst_18 = arith.constant dense<0.000000e+00> : vector<16x32xf32>
    %23 = tpu.matmul %16, %22, %cst_18 {dimension_numbers = #tpu.dot_dimension_numbers<[1], [0], [0], [1], [0, 0, 1, 1], [], []>} : vector<16x32xf32>, vector<32x32xf32>, vector<16x32xf32> -> vector<16x32xf32>
    %c1315 = arith.constant 1315 : index
    %c0_19 = arith.constant 0 : index
    %24 = vector.load %arg2[%c1315, %c0_19] : memref<1368x128xf32, #tpu.memory_space<vmem>>, vector<1x32xf32>
    %25 = vector.broadcast %24 : vector<1x32xf32> to vector<16x32xf32>
    %26 = arith.addf %23, %25 : vector<16x32xf32>
    %c224 = arith.constant 224 : index
    %c0_20 = arith.constant 0 : index
    %27 = vector.load %arg2[%c224, %c0_20] : memref<1368x128xf32, #tpu.memory_space<vmem>>, vector<32x32xf32>
    %cst_21 = arith.constant dense<0.000000e+00> : vector<16x32xf32>
    %28 = tpu.matmul %16, %27, %cst_21 {dimension_numbers = #tpu.dot_dimension_numbers<[1], [0], [0], [1], [0, 0, 1, 1], [], []>} : vector<16x32xf32>, vector<32x32xf32>, vector<16x32xf32> -> vector<16x32xf32>
    %c1316 = arith.constant 1316 : index
    %c0_22 = arith.constant 0 : index
    %29 = vector.load %arg2[%c1316, %c0_22] : memref<1368x128xf32, #tpu.memory_space<vmem>>, vector<1x32xf32>
    %30 = vector.broadcast %29 : vector<1x32xf32> to vector<16x32xf32>
    %31 = arith.addf %28, %30 : vector<16x32xf32>
    %cst_23 = arith.constant 0.000000e+00 : f32
    %32 = vector.broadcast %cst_23 : f32 to vector<16x32xf32>
    %33 = vector.broadcast %2 : vector<1x32xf32> to vector<16x32xf32>
    %34 = arith.mulf %21, %33 : vector<16x32xf32>
    %cst_24 = arith.constant dense<0.000000e+00> : vector<16x16xf32>
    %35 = tpu.matmul %34, %26, %cst_24 {dimension_numbers = #tpu.dot_dimension_numbers<[1], [1], [0], [0], [0, 0, 1, 0], [], []>} : vector<16x32xf32>, vector<16x32xf32>, vector<16x16xf32> -> vector<16x16xf32>
    %cst_25 = arith.constant 0.353553385 : f32
    %36 = vector.broadcast %cst_25 : f32 to vector<16x16xf32>
    %37 = arith.mulf %35, %36 : vector<16x16xf32>
    %38 = arith.addf %37, %9 : vector<16x16xf32>
    %cst_26 = arith.constant dense<0xFF800000> : vector<16xf32>
    %39 = vector.multi_reduction <maximumf>, %38, %cst_26 [1] : vector<16x16xf32> to vector<16xf32>
    %40 = vector.shape_cast %39 : vector<16xf32> to vector<16x1xf32>
    %41 = vector.broadcast %40 : vector<16x1xf32> to vector<16x16xf32>
    %42 = arith.subf %38, %41 : vector<16x16xf32>
    %43 = math.exp %42 : vector<16x16xf32>
    %cst_27 = arith.constant dense<0.000000e+00> : vector<16xf32>
    %44 = vector.multi_reduction <add>, %43, %cst_27 [1] : vector<16x16xf32> to vector<16xf32>
    %45 = vector.shape_cast %44 : vector<16xf32> to vector<16x1xf32>
    %46 = tpu.reciprocal %45 {approx = true} : vector<16x1xf32> -> vector<16x1xf32>
    %47 = vector.broadcast %46 : vector<16x1xf32> to vector<16x16xf32>
    %48 = arith.mulf %43, %47 : vector<16x16xf32>
    %49 = vector.broadcast %2 : vector<1x32xf32> to vector<16x32xf32>
    %50 = arith.mulf %31, %49 : vector<16x32xf32>
    %cst_28 = arith.constant dense<0.000000e+00> : vector<16x32xf32>
    %51 = tpu.matmul %48, %50, %cst_28 {dimension_numbers = #tpu.dot_dimension_numbers<[1], [0], [0], [1], [0, 0, 1, 1], [], []>} : vector<16x16xf32>, vector<16x32xf32>, vector<16x32xf32> -> vector<16x32xf32>
    %52 = arith.addf %32, %51 : vector<16x32xf32>
    %53 = vector.broadcast %3 : vector<1x32xf32> to vector<16x32xf32>
    %54 = arith.mulf %21, %53 : vector<16x32xf32>
    %cst_29 = arith.constant dense<0.000000e+00> : vector<16x16xf32>
    %55 = tpu.matmul %54, %26, %cst_29 {dimension_numbers = #tpu.dot_dimension_numbers<[1], [1], [0], [0], [0, 0, 1, 0], [], []>} : vector<16x32xf32>, vector<16x32xf32>, vector<16x16xf32> -> vector<16x16xf32>
    %cst_30 = arith.constant 0.353553385 : f32
    %56 = vector.broadcast %cst_30 : f32 to vector<16x16xf32>
    %57 = arith.mulf %55, %56 : vector<16x16xf32>
    %58 = arith.addf %57, %9 : vector<16x16xf32>
    %cst_31 = arith.constant dense<0xFF800000> : vector<16xf32>
    %59 = vector.multi_reduction <maximumf>, %58, %cst_31 [1] : vector<16x16xf32> to vector<16xf32>
    %60 = vector.shape_cast %59 : vector<16xf32> to vector<16x1xf32>
    %61 = vector.broadcast %60 : vector<16x1xf32> to vector<16x16xf32>
    %62 = arith.subf %58, %61 : vector<16x16xf32>
    %63 = math.exp %62 : vector<16x16xf32>
    %cst_32 = arith.constant dense<0.000000e+00> : vector<16xf32>
    %64 = vector.multi_reduction <add>, %63, %cst_32 [1] : vector<16x16xf32> to vector<16xf32>
    %65 = vector.shape_cast %64 : vector<16xf32> to vector<16x1xf32>
    %66 = tpu.reciprocal %65 {approx = true} : vector<16x1xf32> -> vector<16x1xf32>
    %67 = vector.broadcast %66 : vector<16x1xf32> to vector<16x16xf32>
    %68 = arith.mulf %63, %67 : vector<16x16xf32>
    %69 = vector.broadcast %3 : vector<1x32xf32> to vector<16x32xf32>
    %70 = arith.mulf %31, %69 : vector<16x32xf32>
    %cst_33 = arith.constant dense<0.000000e+00> : vector<16x32xf32>
    %71 = tpu.matmul %68, %70, %cst_33 {dimension_numbers = #tpu.dot_dimension_numbers<[1], [0], [0], [1], [0, 0, 1, 1], [], []>} : vector<16x16xf32>, vector<16x32xf32>, vector<16x32xf32> -> vector<16x32xf32>
    %72 = arith.addf %52, %71 : vector<16x32xf32>
    %73 = vector.broadcast %4 : vector<1x32xf32> to vector<16x32xf32>
    %74 = arith.mulf %21, %73 : vector<16x32xf32>
    %cst_34 = arith.constant dense<0.000000e+00> : vector<16x16xf32>
    %75 = tpu.matmul %74, %26, %cst_34 {dimension_numbers = #tpu.dot_dimension_numbers<[1], [1], [0], [0], [0, 0, 1, 0], [], []>} : vector<16x32xf32>, vector<16x32xf32>, vector<16x16xf32> -> vector<16x16xf32>
    %cst_35 = arith.constant 0.353553385 : f32
    %76 = vector.broadcast %cst_35 : f32 to vector<16x16xf32>
    %77 = arith.mulf %75, %76 : vector<16x16xf32>
    %78 = arith.addf %77, %9 : vector<16x16xf32>
    %cst_36 = arith.constant dense<0xFF800000> : vector<16xf32>
    %79 = vector.multi_reduction <maximumf>, %78, %cst_36 [1] : vector<16x16xf32> to vector<16xf32>
    %80 = vector.shape_cast %79 : vector<16xf32> to vector<16x1xf32>
    %81 = vector.broadcast %80 : vector<16x1xf32> to vector<16x16xf32>
    %82 = arith.subf %78, %81 : vector<16x16xf32>
    %83 = math.exp %82 : vector<16x16xf32>
    %cst_37 = arith.constant dense<0.000000e+00> : vector<16xf32>
    %84 = vector.multi_reduction <add>, %83, %cst_37 [1] : vector<16x16xf32> to vector<16xf32>
    %85 = vector.shape_cast %84 : vector<16xf32> to vector<16x1xf32>
    %86 = tpu.reciprocal %85 {approx = true} : vector<16x1xf32> -> vector<16x1xf32>
    %87 = vector.broadcast %86 : vector<16x1xf32> to vector<16x16xf32>
    %88 = arith.mulf %83, %87 : vector<16x16xf32>
    %89 = vector.broadcast %4 : vector<1x32xf32> to vector<16x32xf32>
    %90 = arith.mulf %31, %89 : vector<16x32xf32>
    %cst_38 = arith.constant dense<0.000000e+00> : vector<16x32xf32>
    %91 = tpu.matmul %88, %90, %cst_38 {dimension_numbers = #tpu.dot_dimension_numbers<[1], [0], [0], [1], [0, 0, 1, 1], [], []>} : vector<16x16xf32>, vector<16x32xf32>, vector<16x32xf32> -> vector<16x32xf32>
    %92 = arith.addf %72, %91 : vector<16x32xf32>
    %93 = vector.broadcast %5 : vector<1x32xf32> to vector<16x32xf32>
    %94 = arith.mulf %21, %93 : vector<16x32xf32>
    %cst_39 = arith.constant dense<0.000000e+00> : vector<16x16xf32>
    %95 = tpu.matmul %94, %26, %cst_39 {dimension_numbers = #tpu.dot_dimension_numbers<[1], [1], [0], [0], [0, 0, 1, 0], [], []>} : vector<16x32xf32>, vector<16x32xf32>, vector<16x16xf32> -> vector<16x16xf32>
    %cst_40 = arith.constant 0.353553385 : f32
    %96 = vector.broadcast %cst_40 : f32 to vector<16x16xf32>
    %97 = arith.mulf %95, %96 : vector<16x16xf32>
    %98 = arith.addf %97, %9 : vector<16x16xf32>
    %cst_41 = arith.constant dense<0xFF800000> : vector<16xf32>
    %99 = vector.multi_reduction <maximumf>, %98, %cst_41 [1] : vector<16x16xf32> to vector<16xf32>
    %100 = vector.shape_cast %99 : vector<16xf32> to vector<16x1xf32>
    %101 = vector.broadcast %100 : vector<16x1xf32> to vector<16x16xf32>
    %102 = arith.subf %98, %101 : vector<16x16xf32>
    %103 = math.exp %102 : vector<16x16xf32>
    %cst_42 = arith.constant dense<0.000000e+00> : vector<16xf32>
    %104 = vector.multi_reduction <add>, %103, %cst_42 [1] : vector<16x16xf32> to vector<16xf32>
    %105 = vector.shape_cast %104 : vector<16xf32> to vector<16x1xf32>
    %106 = tpu.reciprocal %105 {approx = true} : vector<16x1xf32> -> vector<16x1xf32>
    %107 = vector.broadcast %106 : vector<16x1xf32> to vector<16x16xf32>
    %108 = arith.mulf %103, %107 : vector<16x16xf32>
    %109 = vector.broadcast %5 : vector<1x32xf32> to vector<16x32xf32>
    %110 = arith.mulf %31, %109 : vector<16x32xf32>
    %cst_43 = arith.constant dense<0.000000e+00> : vector<16x32xf32>
    %111 = tpu.matmul %108, %110, %cst_43 {dimension_numbers = #tpu.dot_dimension_numbers<[1], [0], [0], [1], [0, 0, 1, 1], [], []>} : vector<16x16xf32>, vector<16x32xf32>, vector<16x32xf32> -> vector<16x32xf32>
    %112 = arith.addf %92, %111 : vector<16x32xf32>
    %c256 = arith.constant 256 : index
    %c0_44 = arith.constant 0 : index
    %113 = vector.load %arg2[%c256, %c0_44] : memref<1368x128xf32, #tpu.memory_space<vmem>>, vector<32x32xf32>
    %cst_45 = arith.constant dense<0.000000e+00> : vector<16x32xf32>
    %114 = tpu.matmul %112, %113, %cst_45 {dimension_numbers = #tpu.dot_dimension_numbers<[1], [0], [0], [1], [0, 0, 1, 1], [], []>} : vector<16x32xf32>, vector<32x32xf32>, vector<16x32xf32> -> vector<16x32xf32>
    %c1317 = arith.constant 1317 : index
    %c0_46 = arith.constant 0 : index
    %115 = vector.load %arg2[%c1317, %c0_46] : memref<1368x128xf32, #tpu.memory_space<vmem>>, vector<1x32xf32>
    %116 = vector.broadcast %115 : vector<1x32xf32> to vector<16x32xf32>
    %117 = arith.addf %114, %116 : vector<16x32xf32>
    %118 = arith.addf %16, %117 : vector<16x32xf32>
    %c1320 = arith.constant 1320 : index
    %c0_47 = arith.constant 0 : index
    %119 = vector.load %arg2[%c1320, %c0_47] : memref<1368x128xf32, #tpu.memory_space<vmem>>, vector<1x32xf32>
    %c1321 = arith.constant 1321 : index
    %c0_48 = arith.constant 0 : index
    %120 = vector.load %arg2[%c1321, %c0_48] : memref<1368x128xf32, #tpu.memory_space<vmem>>, vector<1x32xf32>
    %cst_49 = arith.constant dense<0.000000e+00> : vector<16xf32>
    %121 = vector.multi_reduction <add>, %118, %cst_49 [1] : vector<16x32xf32> to vector<16xf32>
    %122 = vector.shape_cast %121 : vector<16xf32> to vector<16x1xf32>
    %cst_50 = arith.constant 3.200000e+01 : f32
    %123 = vector.broadcast %cst_50 : f32 to vector<16x1xf32>
    %124 = arith.divf %122, %123 : vector<16x1xf32>
    %125 = vector.broadcast %124 : vector<16x1xf32> to vector<16x32xf32>
    %126 = arith.subf %118, %125 : vector<16x32xf32>
    %127 = arith.mulf %126, %126 : vector<16x32xf32>
    %cst_51 = arith.constant dense<0.000000e+00> : vector<16xf32>
    %128 = vector.multi_reduction <add>, %127, %cst_51 [1] : vector<16x32xf32> to vector<16xf32>
    %129 = vector.shape_cast %128 : vector<16xf32> to vector<16x1xf32>
    %cst_52 = arith.constant 3.200000e+01 : f32
    %130 = vector.broadcast %cst_52 : f32 to vector<16x1xf32>
    %131 = arith.divf %129, %130 : vector<16x1xf32>
    %132 = vector.broadcast %124 : vector<16x1xf32> to vector<16x32xf32>
    %133 = arith.subf %118, %132 : vector<16x32xf32>
    %cst_53 = arith.constant 9.99999974E-6 : f32
    %134 = vector.broadcast %cst_53 : f32 to vector<16x1xf32>
    %135 = arith.addf %131, %134 : vector<16x1xf32>
    %136 = math.rsqrt %135 : vector<16x1xf32>
    %137 = vector.broadcast %136 : vector<16x1xf32> to vector<16x32xf32>
    %138 = arith.mulf %133, %137 : vector<16x32xf32>
    %139 = vector.broadcast %119 : vector<1x32xf32> to vector<16x32xf32>
    %140 = arith.mulf %138, %139 : vector<16x32xf32>
    %141 = vector.broadcast %120 : vector<1x32xf32> to vector<16x32xf32>
    %142 = arith.addf %140, %141 : vector<16x32xf32>
    %c288 = arith.constant 288 : index
    %c0_54 = arith.constant 0 : index
    %143 = vector.load %arg2[%c288, %c0_54] : memref<1368x128xf32, #tpu.memory_space<vmem>>, vector<32x64xf32>
    %cst_55 = arith.constant dense<0.000000e+00> : vector<16x64xf32>
    %144 = tpu.matmul %142, %143, %cst_55 {dimension_numbers = #tpu.dot_dimension_numbers<[1], [0], [0], [1], [0, 0, 1, 1], [], []>} : vector<16x32xf32>, vector<32x64xf32>, vector<16x64xf32> -> vector<16x64xf32>
    %c1318 = arith.constant 1318 : index
    %c0_56 = arith.constant 0 : index
    %145 = vector.load %arg2[%c1318, %c0_56] : memref<1368x128xf32, #tpu.memory_space<vmem>>, vector<1x64xf32>
    %146 = vector.broadcast %145 : vector<1x64xf32> to vector<16x64xf32>
    %147 = arith.addf %144, %146 : vector<16x64xf32>
    %cst_57 = arith.constant 0.000000e+00 : f32
    %148 = vector.broadcast %cst_57 : f32 to vector<16x64xf32>
    %149 = arith.maximumf %147, %148 : vector<16x64xf32>
    %c320 = arith.constant 320 : index
    %c0_58 = arith.constant 0 : index
    %150 = vector.load %arg2[%c320, %c0_58] : memref<1368x128xf32, #tpu.memory_space<vmem>>, vector<64x32xf32>
    %cst_59 = arith.constant dense<0.000000e+00> : vector<16x32xf32>
    %151 = tpu.matmul %149, %150, %cst_59 {dimension_numbers = #tpu.dot_dimension_numbers<[1], [0], [0], [1], [0, 0, 1, 1], [], []>} : vector<16x64xf32>, vector<64x32xf32>, vector<16x32xf32> -> vector<16x32xf32>
    %c1319 = arith.constant 1319 : index
    %c0_60 = arith.constant 0 : index
    %152 = vector.load %arg2[%c1319, %c0_60] : memref<1368x128xf32, #tpu.memory_space<vmem>>, vector<1x32xf32>
    %153 = vector.broadcast %152 : vector<1x32xf32> to vector<16x32xf32>
    %154 = arith.addf %151, %153 : vector<16x32xf32>
    %155 = arith.addf %142, %154 : vector<16x32xf32>
    %c1322 = arith.constant 1322 : index
    %c0_61 = arith.constant 0 : index
    %156 = vector.load %arg2[%c1322, %c0_61] : memref<1368x128xf32, #tpu.memory_space<vmem>>, vector<1x32xf32>
    %c1323 = arith.constant 1323 : index
    %c0_62 = arith.constant 0 : index
    %157 = vector.load %arg2[%c1323, %c0_62] : memref<1368x128xf32, #tpu.memory_space<vmem>>, vector<1x32xf32>
    %cst_63 = arith.constant dense<0.000000e+00> : vector<16xf32>
    %158 = vector.multi_reduction <add>, %155, %cst_63 [1] : vector<16x32xf32> to vector<16xf32>
    %159 = vector.shape_cast %158 : vector<16xf32> to vector<16x1xf32>
    %cst_64 = arith.constant 3.200000e+01 : f32
    %160 = vector.broadcast %cst_64 : f32 to vector<16x1xf32>
    %161 = arith.divf %159, %160 : vector<16x1xf32>
    %162 = vector.broadcast %161 : vector<16x1xf32> to vector<16x32xf32>
    %163 = arith.subf %155, %162 : vector<16x32xf32>
    %164 = arith.mulf %163, %163 : vector<16x32xf32>
    %cst_65 = arith.constant dense<0.000000e+00> : vector<16xf32>
    %165 = vector.multi_reduction <add>, %164, %cst_65 [1] : vector<16x32xf32> to vector<16xf32>
    %166 = vector.shape_cast %165 : vector<16xf32> to vector<16x1xf32>
    %cst_66 = arith.constant 3.200000e+01 : f32
    %167 = vector.broadcast %cst_66 : f32 to vector<16x1xf32>
    %168 = arith.divf %166, %167 : vector<16x1xf32>
    %169 = vector.broadcast %161 : vector<16x1xf32> to vector<16x32xf32>
    %170 = arith.subf %155, %169 : vector<16x32xf32>
    %cst_67 = arith.constant 9.99999974E-6 : f32
    %171 = vector.broadcast %cst_67 : f32 to vector<16x1xf32>
    %172 = arith.addf %168, %171 : vector<16x1xf32>
    %173 = math.rsqrt %172 : vector<16x1xf32>
    %174 = vector.broadcast %173 : vector<16x1xf32> to vector<16x32xf32>
    %175 = arith.mulf %170, %174 : vector<16x32xf32>
    %176 = vector.broadcast %156 : vector<1x32xf32> to vector<16x32xf32>
    %177 = arith.mulf %175, %176 : vector<16x32xf32>
    %178 = vector.broadcast %157 : vector<1x32xf32> to vector<16x32xf32>
    %179 = arith.addf %177, %178 : vector<16x32xf32>
    %c384 = arith.constant 384 : index
    %c0_68 = arith.constant 0 : index
    %180 = vector.load %arg2[%c384, %c0_68] : memref<1368x128xf32, #tpu.memory_space<vmem>>, vector<32x32xf32>
    %cst_69 = arith.constant dense<0.000000e+00> : vector<16x32xf32>
    %181 = tpu.matmul %179, %180, %cst_69 {dimension_numbers = #tpu.dot_dimension_numbers<[1], [0], [0], [1], [0, 0, 1, 1], [], []>} : vector<16x32xf32>, vector<32x32xf32>, vector<16x32xf32> -> vector<16x32xf32>
    %c1324 = arith.constant 1324 : index
    %c0_70 = arith.constant 0 : index
    %182 = vector.load %arg2[%c1324, %c0_70] : memref<1368x128xf32, #tpu.memory_space<vmem>>, vector<1x32xf32>
    %183 = vector.broadcast %182 : vector<1x32xf32> to vector<16x32xf32>
    %184 = arith.addf %181, %183 : vector<16x32xf32>
    %c416 = arith.constant 416 : index
    %c0_71 = arith.constant 0 : index
    %185 = vector.load %arg2[%c416, %c0_71] : memref<1368x128xf32, #tpu.memory_space<vmem>>, vector<32x32xf32>
    %cst_72 = arith.constant dense<0.000000e+00> : vector<16x32xf32>
    %186 = tpu.matmul %179, %185, %cst_72 {dimension_numbers = #tpu.dot_dimension_numbers<[1], [0], [0], [1], [0, 0, 1, 1], [], []>} : vector<16x32xf32>, vector<32x32xf32>, vector<16x32xf32> -> vector<16x32xf32>
    %c1325 = arith.constant 1325 : index
    %c0_73 = arith.constant 0 : index
    %187 = vector.load %arg2[%c1325, %c0_73] : memref<1368x128xf32, #tpu.memory_space<vmem>>, vector<1x32xf32>
    %188 = vector.broadcast %187 : vector<1x32xf32> to vector<16x32xf32>
    %189 = arith.addf %186, %188 : vector<16x32xf32>
    %c448 = arith.constant 448 : index
    %c0_74 = arith.constant 0 : index
    %190 = vector.load %arg2[%c448, %c0_74] : memref<1368x128xf32, #tpu.memory_space<vmem>>, vector<32x32xf32>
    %cst_75 = arith.constant dense<0.000000e+00> : vector<16x32xf32>
    %191 = tpu.matmul %179, %190, %cst_75 {dimension_numbers = #tpu.dot_dimension_numbers<[1], [0], [0], [1], [0, 0, 1, 1], [], []>} : vector<16x32xf32>, vector<32x32xf32>, vector<16x32xf32> -> vector<16x32xf32>
    %c1326 = arith.constant 1326 : index
    %c0_76 = arith.constant 0 : index
    %192 = vector.load %arg2[%c1326, %c0_76] : memref<1368x128xf32, #tpu.memory_space<vmem>>, vector<1x32xf32>
    %193 = vector.broadcast %192 : vector<1x32xf32> to vector<16x32xf32>
    %194 = arith.addf %191, %193 : vector<16x32xf32>
    %cst_77 = arith.constant 0.000000e+00 : f32
    %195 = vector.broadcast %cst_77 : f32 to vector<16x32xf32>
    %196 = vector.broadcast %2 : vector<1x32xf32> to vector<16x32xf32>
    %197 = arith.mulf %184, %196 : vector<16x32xf32>
    %cst_78 = arith.constant dense<0.000000e+00> : vector<16x16xf32>
    %198 = tpu.matmul %197, %189, %cst_78 {dimension_numbers = #tpu.dot_dimension_numbers<[1], [1], [0], [0], [0, 0, 1, 0], [], []>} : vector<16x32xf32>, vector<16x32xf32>, vector<16x16xf32> -> vector<16x16xf32>
    %cst_79 = arith.constant 0.353553385 : f32
    %199 = vector.broadcast %cst_79 : f32 to vector<16x16xf32>
    %200 = arith.mulf %198, %199 : vector<16x16xf32>
    %201 = arith.addf %200, %9 : vector<16x16xf32>
    %cst_80 = arith.constant dense<0xFF800000> : vector<16xf32>
    %202 = vector.multi_reduction <maximumf>, %201, %cst_80 [1] : vector<16x16xf32> to vector<16xf32>
    %203 = vector.shape_cast %202 : vector<16xf32> to vector<16x1xf32>
    %204 = vector.broadcast %203 : vector<16x1xf32> to vector<16x16xf32>
    %205 = arith.subf %201, %204 : vector<16x16xf32>
    %206 = math.exp %205 : vector<16x16xf32>
    %cst_81 = arith.constant dense<0.000000e+00> : vector<16xf32>
    %207 = vector.multi_reduction <add>, %206, %cst_81 [1] : vector<16x16xf32> to vector<16xf32>
    %208 = vector.shape_cast %207 : vector<16xf32> to vector<16x1xf32>
    %209 = tpu.reciprocal %208 {approx = true} : vector<16x1xf32> -> vector<16x1xf32>
    %210 = vector.broadcast %209 : vector<16x1xf32> to vector<16x16xf32>
    %211 = arith.mulf %206, %210 : vector<16x16xf32>
    %212 = vector.broadcast %2 : vector<1x32xf32> to vector<16x32xf32>
    %213 = arith.mulf %194, %212 : vector<16x32xf32>
    %cst_82 = arith.constant dense<0.000000e+00> : vector<16x32xf32>
    %214 = tpu.matmul %211, %213, %cst_82 {dimension_numbers = #tpu.dot_dimension_numbers<[1], [0], [0], [1], [0, 0, 1, 1], [], []>} : vector<16x16xf32>, vector<16x32xf32>, vector<16x32xf32> -> vector<16x32xf32>
    %215 = arith.addf %195, %214 : vector<16x32xf32>
    %216 = vector.broadcast %3 : vector<1x32xf32> to vector<16x32xf32>
    %217 = arith.mulf %184, %216 : vector<16x32xf32>
    %cst_83 = arith.constant dense<0.000000e+00> : vector<16x16xf32>
    %218 = tpu.matmul %217, %189, %cst_83 {dimension_numbers = #tpu.dot_dimension_numbers<[1], [1], [0], [0], [0, 0, 1, 0], [], []>} : vector<16x32xf32>, vector<16x32xf32>, vector<16x16xf32> -> vector<16x16xf32>
    %cst_84 = arith.constant 0.353553385 : f32
    %219 = vector.broadcast %cst_84 : f32 to vector<16x16xf32>
    %220 = arith.mulf %218, %219 : vector<16x16xf32>
    %221 = arith.addf %220, %9 : vector<16x16xf32>
    %cst_85 = arith.constant dense<0xFF800000> : vector<16xf32>
    %222 = vector.multi_reduction <maximumf>, %221, %cst_85 [1] : vector<16x16xf32> to vector<16xf32>
    %223 = vector.shape_cast %222 : vector<16xf32> to vector<16x1xf32>
    %224 = vector.broadcast %223 : vector<16x1xf32> to vector<16x16xf32>
    %225 = arith.subf %221, %224 : vector<16x16xf32>
    %226 = math.exp %225 : vector<16x16xf32>
    %cst_86 = arith.constant dense<0.000000e+00> : vector<16xf32>
    %227 = vector.multi_reduction <add>, %226, %cst_86 [1] : vector<16x16xf32> to vector<16xf32>
    %228 = vector.shape_cast %227 : vector<16xf32> to vector<16x1xf32>
    %229 = tpu.reciprocal %228 {approx = true} : vector<16x1xf32> -> vector<16x1xf32>
    %230 = vector.broadcast %229 : vector<16x1xf32> to vector<16x16xf32>
    %231 = arith.mulf %226, %230 : vector<16x16xf32>
    %232 = vector.broadcast %3 : vector<1x32xf32> to vector<16x32xf32>
    %233 = arith.mulf %194, %232 : vector<16x32xf32>
    %cst_87 = arith.constant dense<0.000000e+00> : vector<16x32xf32>
    %234 = tpu.matmul %231, %233, %cst_87 {dimension_numbers = #tpu.dot_dimension_numbers<[1], [0], [0], [1], [0, 0, 1, 1], [], []>} : vector<16x16xf32>, vector<16x32xf32>, vector<16x32xf32> -> vector<16x32xf32>
    %235 = arith.addf %215, %234 : vector<16x32xf32>
    %236 = vector.broadcast %4 : vector<1x32xf32> to vector<16x32xf32>
    %237 = arith.mulf %184, %236 : vector<16x32xf32>
    %cst_88 = arith.constant dense<0.000000e+00> : vector<16x16xf32>
    %238 = tpu.matmul %237, %189, %cst_88 {dimension_numbers = #tpu.dot_dimension_numbers<[1], [1], [0], [0], [0, 0, 1, 0], [], []>} : vector<16x32xf32>, vector<16x32xf32>, vector<16x16xf32> -> vector<16x16xf32>
    %cst_89 = arith.constant 0.353553385 : f32
    %239 = vector.broadcast %cst_89 : f32 to vector<16x16xf32>
    %240 = arith.mulf %238, %239 : vector<16x16xf32>
    %241 = arith.addf %240, %9 : vector<16x16xf32>
    %cst_90 = arith.constant dense<0xFF800000> : vector<16xf32>
    %242 = vector.multi_reduction <maximumf>, %241, %cst_90 [1] : vector<16x16xf32> to vector<16xf32>
    %243 = vector.shape_cast %242 : vector<16xf32> to vector<16x1xf32>
    %244 = vector.broadcast %243 : vector<16x1xf32> to vector<16x16xf32>
    %245 = arith.subf %241, %244 : vector<16x16xf32>
    %246 = math.exp %245 : vector<16x16xf32>
    %cst_91 = arith.constant dense<0.000000e+00> : vector<16xf32>
    %247 = vector.multi_reduction <add>, %246, %cst_91 [1] : vector<16x16xf32> to vector<16xf32>
    %248 = vector.shape_cast %247 : vector<16xf32> to vector<16x1xf32>
    %249 = tpu.reciprocal %248 {approx = true} : vector<16x1xf32> -> vector<16x1xf32>
    %250 = vector.broadcast %249 : vector<16x1xf32> to vector<16x16xf32>
    %251 = arith.mulf %246, %250 : vector<16x16xf32>
    %252 = vector.broadcast %4 : vector<1x32xf32> to vector<16x32xf32>
    %253 = arith.mulf %194, %252 : vector<16x32xf32>
    %cst_92 = arith.constant dense<0.000000e+00> : vector<16x32xf32>
    %254 = tpu.matmul %251, %253, %cst_92 {dimension_numbers = #tpu.dot_dimension_numbers<[1], [0], [0], [1], [0, 0, 1, 1], [], []>} : vector<16x16xf32>, vector<16x32xf32>, vector<16x32xf32> -> vector<16x32xf32>
    %255 = arith.addf %235, %254 : vector<16x32xf32>
    %256 = vector.broadcast %5 : vector<1x32xf32> to vector<16x32xf32>
    %257 = arith.mulf %184, %256 : vector<16x32xf32>
    %cst_93 = arith.constant dense<0.000000e+00> : vector<16x16xf32>
    %258 = tpu.matmul %257, %189, %cst_93 {dimension_numbers = #tpu.dot_dimension_numbers<[1], [1], [0], [0], [0, 0, 1, 0], [], []>} : vector<16x32xf32>, vector<16x32xf32>, vector<16x16xf32> -> vector<16x16xf32>
    %cst_94 = arith.constant 0.353553385 : f32
    %259 = vector.broadcast %cst_94 : f32 to vector<16x16xf32>
    %260 = arith.mulf %258, %259 : vector<16x16xf32>
    %261 = arith.addf %260, %9 : vector<16x16xf32>
    %cst_95 = arith.constant dense<0xFF800000> : vector<16xf32>
    %262 = vector.multi_reduction <maximumf>, %261, %cst_95 [1] : vector<16x16xf32> to vector<16xf32>
    %263 = vector.shape_cast %262 : vector<16xf32> to vector<16x1xf32>
    %264 = vector.broadcast %263 : vector<16x1xf32> to vector<16x16xf32>
    %265 = arith.subf %261, %264 : vector<16x16xf32>
    %266 = math.exp %265 : vector<16x16xf32>
    %cst_96 = arith.constant dense<0.000000e+00> : vector<16xf32>
    %267 = vector.multi_reduction <add>, %266, %cst_96 [1] : vector<16x16xf32> to vector<16xf32>
    %268 = vector.shape_cast %267 : vector<16xf32> to vector<16x1xf32>
    %269 = tpu.reciprocal %268 {approx = true} : vector<16x1xf32> -> vector<16x1xf32>
    %270 = vector.broadcast %269 : vector<16x1xf32> to vector<16x16xf32>
    %271 = arith.mulf %266, %270 : vector<16x16xf32>
    %272 = vector.broadcast %5 : vector<1x32xf32> to vector<16x32xf32>
    %273 = arith.mulf %194, %272 : vector<16x32xf32>
    %cst_97 = arith.constant dense<0.000000e+00> : vector<16x32xf32>
    %274 = tpu.matmul %271, %273, %cst_97 {dimension_numbers = #tpu.dot_dimension_numbers<[1], [0], [0], [1], [0, 0, 1, 1], [], []>} : vector<16x16xf32>, vector<16x32xf32>, vector<16x32xf32> -> vector<16x32xf32>
    %275 = arith.addf %255, %274 : vector<16x32xf32>
    %c480 = arith.constant 480 : index
    %c0_98 = arith.constant 0 : index
    %276 = vector.load %arg2[%c480, %c0_98] : memref<1368x128xf32, #tpu.memory_space<vmem>>, vector<32x32xf32>
    %cst_99 = arith.constant dense<0.000000e+00> : vector<16x32xf32>
    %277 = tpu.matmul %275, %276, %cst_99 {dimension_numbers = #tpu.dot_dimension_numbers<[1], [0], [0], [1], [0, 0, 1, 1], [], []>} : vector<16x32xf32>, vector<32x32xf32>, vector<16x32xf32> -> vector<16x32xf32>
    %c1327 = arith.constant 1327 : index
    %c0_100 = arith.constant 0 : index
    %278 = vector.load %arg2[%c1327, %c0_100] : memref<1368x128xf32, #tpu.memory_space<vmem>>, vector<1x32xf32>
    %279 = vector.broadcast %278 : vector<1x32xf32> to vector<16x32xf32>
    %280 = arith.addf %277, %279 : vector<16x32xf32>
    %281 = arith.addf %179, %280 : vector<16x32xf32>
    %c1330 = arith.constant 1330 : index
    %c0_101 = arith.constant 0 : index
    %282 = vector.load %arg2[%c1330, %c0_101] : memref<1368x128xf32, #tpu.memory_space<vmem>>, vector<1x32xf32>
    %c1331 = arith.constant 1331 : index
    %c0_102 = arith.constant 0 : index
    %283 = vector.load %arg2[%c1331, %c0_102] : memref<1368x128xf32, #tpu.memory_space<vmem>>, vector<1x32xf32>
    %cst_103 = arith.constant dense<0.000000e+00> : vector<16xf32>
    %284 = vector.multi_reduction <add>, %281, %cst_103 [1] : vector<16x32xf32> to vector<16xf32>
    %285 = vector.shape_cast %284 : vector<16xf32> to vector<16x1xf32>
    %cst_104 = arith.constant 3.200000e+01 : f32
    %286 = vector.broadcast %cst_104 : f32 to vector<16x1xf32>
    %287 = arith.divf %285, %286 : vector<16x1xf32>
    %288 = vector.broadcast %287 : vector<16x1xf32> to vector<16x32xf32>
    %289 = arith.subf %281, %288 : vector<16x32xf32>
    %290 = arith.mulf %289, %289 : vector<16x32xf32>
    %cst_105 = arith.constant dense<0.000000e+00> : vector<16xf32>
    %291 = vector.multi_reduction <add>, %290, %cst_105 [1] : vector<16x32xf32> to vector<16xf32>
    %292 = vector.shape_cast %291 : vector<16xf32> to vector<16x1xf32>
    %cst_106 = arith.constant 3.200000e+01 : f32
    %293 = vector.broadcast %cst_106 : f32 to vector<16x1xf32>
    %294 = arith.divf %292, %293 : vector<16x1xf32>
    %295 = vector.broadcast %287 : vector<16x1xf32> to vector<16x32xf32>
    %296 = arith.subf %281, %295 : vector<16x32xf32>
    %cst_107 = arith.constant 9.99999974E-6 : f32
    %297 = vector.broadcast %cst_107 : f32 to vector<16x1xf32>
    %298 = arith.addf %294, %297 : vector<16x1xf32>
    %299 = math.rsqrt %298 : vector<16x1xf32>
    %300 = vector.broadcast %299 : vector<16x1xf32> to vector<16x32xf32>
    %301 = arith.mulf %296, %300 : vector<16x32xf32>
    %302 = vector.broadcast %282 : vector<1x32xf32> to vector<16x32xf32>
    %303 = arith.mulf %301, %302 : vector<16x32xf32>
    %304 = vector.broadcast %283 : vector<1x32xf32> to vector<16x32xf32>
    %305 = arith.addf %303, %304 : vector<16x32xf32>
    %c512 = arith.constant 512 : index
    %c0_108 = arith.constant 0 : index
    %306 = vector.load %arg2[%c512, %c0_108] : memref<1368x128xf32, #tpu.memory_space<vmem>>, vector<32x64xf32>
    %cst_109 = arith.constant dense<0.000000e+00> : vector<16x64xf32>
    %307 = tpu.matmul %305, %306, %cst_109 {dimension_numbers = #tpu.dot_dimension_numbers<[1], [0], [0], [1], [0, 0, 1, 1], [], []>} : vector<16x32xf32>, vector<32x64xf32>, vector<16x64xf32> -> vector<16x64xf32>
    %c1328 = arith.constant 1328 : index
    %c0_110 = arith.constant 0 : index
    %308 = vector.load %arg2[%c1328, %c0_110] : memref<1368x128xf32, #tpu.memory_space<vmem>>, vector<1x64xf32>
    %309 = vector.broadcast %308 : vector<1x64xf32> to vector<16x64xf32>
    %310 = arith.addf %307, %309 : vector<16x64xf32>
    %cst_111 = arith.constant 0.000000e+00 : f32
    %311 = vector.broadcast %cst_111 : f32 to vector<16x64xf32>
    %312 = arith.maximumf %310, %311 : vector<16x64xf32>
    %c544 = arith.constant 544 : index
    %c0_112 = arith.constant 0 : index
    %313 = vector.load %arg2[%c544, %c0_112] : memref<1368x128xf32, #tpu.memory_space<vmem>>, vector<64x32xf32>
    %cst_113 = arith.constant dense<0.000000e+00> : vector<16x32xf32>
    %314 = tpu.matmul %312, %313, %cst_113 {dimension_numbers = #tpu.dot_dimension_numbers<[1], [0], [0], [1], [0, 0, 1, 1], [], []>} : vector<16x64xf32>, vector<64x32xf32>, vector<16x32xf32> -> vector<16x32xf32>
    %c1329 = arith.constant 1329 : index
    %c0_114 = arith.constant 0 : index
    %315 = vector.load %arg2[%c1329, %c0_114] : memref<1368x128xf32, #tpu.memory_space<vmem>>, vector<1x32xf32>
    %316 = vector.broadcast %315 : vector<1x32xf32> to vector<16x32xf32>
    %317 = arith.addf %314, %316 : vector<16x32xf32>
    %318 = arith.addf %305, %317 : vector<16x32xf32>
    %c1332 = arith.constant 1332 : index
    %c0_115 = arith.constant 0 : index
    %319 = vector.load %arg2[%c1332, %c0_115] : memref<1368x128xf32, #tpu.memory_space<vmem>>, vector<1x32xf32>
    %c1333 = arith.constant 1333 : index
    %c0_116 = arith.constant 0 : index
    %320 = vector.load %arg2[%c1333, %c0_116] : memref<1368x128xf32, #tpu.memory_space<vmem>>, vector<1x32xf32>
    %cst_117 = arith.constant dense<0.000000e+00> : vector<16xf32>
    %321 = vector.multi_reduction <add>, %318, %cst_117 [1] : vector<16x32xf32> to vector<16xf32>
    %322 = vector.shape_cast %321 : vector<16xf32> to vector<16x1xf32>
    %cst_118 = arith.constant 3.200000e+01 : f32
    %323 = vector.broadcast %cst_118 : f32 to vector<16x1xf32>
    %324 = arith.divf %322, %323 : vector<16x1xf32>
    %325 = vector.broadcast %324 : vector<16x1xf32> to vector<16x32xf32>
    %326 = arith.subf %318, %325 : vector<16x32xf32>
    %327 = arith.mulf %326, %326 : vector<16x32xf32>
    %cst_119 = arith.constant dense<0.000000e+00> : vector<16xf32>
    %328 = vector.multi_reduction <add>, %327, %cst_119 [1] : vector<16x32xf32> to vector<16xf32>
    %329 = vector.shape_cast %328 : vector<16xf32> to vector<16x1xf32>
    %cst_120 = arith.constant 3.200000e+01 : f32
    %330 = vector.broadcast %cst_120 : f32 to vector<16x1xf32>
    %331 = arith.divf %329, %330 : vector<16x1xf32>
    %332 = vector.broadcast %324 : vector<16x1xf32> to vector<16x32xf32>
    %333 = arith.subf %318, %332 : vector<16x32xf32>
    %cst_121 = arith.constant 9.99999974E-6 : f32
    %334 = vector.broadcast %cst_121 : f32 to vector<16x1xf32>
    %335 = arith.addf %331, %334 : vector<16x1xf32>
    %336 = math.rsqrt %335 : vector<16x1xf32>
    %337 = vector.broadcast %336 : vector<16x1xf32> to vector<16x32xf32>
    %338 = arith.mulf %333, %337 : vector<16x32xf32>
    %339 = vector.broadcast %319 : vector<1x32xf32> to vector<16x32xf32>
    %340 = arith.mulf %338, %339 : vector<16x32xf32>
    %341 = vector.broadcast %320 : vector<1x32xf32> to vector<16x32xf32>
    %342 = arith.addf %340, %341 : vector<16x32xf32>
    %c48 = arith.constant 48 : index
    %c0_122 = arith.constant 0 : index
    %343 = vector.load %arg2[%c48, %c0_122] : memref<1368x128xf32, #tpu.memory_space<vmem>>, vector<16x16xf32>
    %cst_123 = arith.constant dense<0.000000e+00> : vector<16x32xf32>
    %344 = tpu.matmul %343, %1, %cst_123 {dimension_numbers = #tpu.dot_dimension_numbers<[1], [0], [0], [1], [0, 0, 1, 1], [], []>} : vector<16x16xf32>, vector<16x32xf32>, vector<16x32xf32> -> vector<16x32xf32>
    %c16 = arith.constant 16 : index
    %c0_124 = arith.constant 0 : index
    %345 = vector.load %arg2[%c16, %c0_124] : memref<1368x128xf32, #tpu.memory_space<vmem>>, vector<16x32xf32>
    %346 = arith.addf %344, %345 : vector<16x32xf32>
    %c80 = arith.constant 80 : index
    %c0_125 = arith.constant 0 : index
    %347 = vector.load %arg2[%c80, %c0_125] : memref<1368x128xf32, #tpu.memory_space<vmem>>, vector<16x16xf32>
    %c96 = arith.constant 96 : index
    %c0_126 = arith.constant 0 : index
    %348 = vector.load %arg2[%c96, %c0_126] : memref<1368x128xf32, #tpu.memory_space<vmem>>, vector<16x16xf32>
    %c608 = arith.constant 608 : index
    %c0_127 = arith.constant 0 : index
    %349 = vector.load %arg2[%c608, %c0_127] : memref<1368x128xf32, #tpu.memory_space<vmem>>, vector<32x32xf32>
    %cst_128 = arith.constant dense<0.000000e+00> : vector<16x32xf32>
    %350 = tpu.matmul %346, %349, %cst_128 {dimension_numbers = #tpu.dot_dimension_numbers<[1], [0], [0], [1], [0, 0, 1, 1], [], []>} : vector<16x32xf32>, vector<32x32xf32>, vector<16x32xf32> -> vector<16x32xf32>
    %c1334 = arith.constant 1334 : index
    %c0_129 = arith.constant 0 : index
    %351 = vector.load %arg2[%c1334, %c0_129] : memref<1368x128xf32, #tpu.memory_space<vmem>>, vector<1x32xf32>
    %352 = vector.broadcast %351 : vector<1x32xf32> to vector<16x32xf32>
    %353 = arith.addf %350, %352 : vector<16x32xf32>
    %c640 = arith.constant 640 : index
    %c0_130 = arith.constant 0 : index
    %354 = vector.load %arg2[%c640, %c0_130] : memref<1368x128xf32, #tpu.memory_space<vmem>>, vector<32x32xf32>
    %cst_131 = arith.constant dense<0.000000e+00> : vector<16x32xf32>
    %355 = tpu.matmul %346, %354, %cst_131 {dimension_numbers = #tpu.dot_dimension_numbers<[1], [0], [0], [1], [0, 0, 1, 1], [], []>} : vector<16x32xf32>, vector<32x32xf32>, vector<16x32xf32> -> vector<16x32xf32>
    %c1335 = arith.constant 1335 : index
    %c0_132 = arith.constant 0 : index
    %356 = vector.load %arg2[%c1335, %c0_132] : memref<1368x128xf32, #tpu.memory_space<vmem>>, vector<1x32xf32>
    %357 = vector.broadcast %356 : vector<1x32xf32> to vector<16x32xf32>
    %358 = arith.addf %355, %357 : vector<16x32xf32>
    %c672 = arith.constant 672 : index
    %c0_133 = arith.constant 0 : index
    %359 = vector.load %arg2[%c672, %c0_133] : memref<1368x128xf32, #tpu.memory_space<vmem>>, vector<32x32xf32>
    %cst_134 = arith.constant dense<0.000000e+00> : vector<16x32xf32>
    %360 = tpu.matmul %346, %359, %cst_134 {dimension_numbers = #tpu.dot_dimension_numbers<[1], [0], [0], [1], [0, 0, 1, 1], [], []>} : vector<16x32xf32>, vector<32x32xf32>, vector<16x32xf32> -> vector<16x32xf32>
    %c1336 = arith.constant 1336 : index
    %c0_135 = arith.constant 0 : index
    %361 = vector.load %arg2[%c1336, %c0_135] : memref<1368x128xf32, #tpu.memory_space<vmem>>, vector<1x32xf32>
    %362 = vector.broadcast %361 : vector<1x32xf32> to vector<16x32xf32>
    %363 = arith.addf %360, %362 : vector<16x32xf32>
    %cst_136 = arith.constant 0.000000e+00 : f32
    %364 = vector.broadcast %cst_136 : f32 to vector<16x32xf32>
    %365 = vector.broadcast %2 : vector<1x32xf32> to vector<16x32xf32>
    %366 = arith.mulf %353, %365 : vector<16x32xf32>
    %cst_137 = arith.constant dense<0.000000e+00> : vector<16x16xf32>
    %367 = tpu.matmul %366, %358, %cst_137 {dimension_numbers = #tpu.dot_dimension_numbers<[1], [1], [0], [0], [0, 0, 1, 0], [], []>} : vector<16x32xf32>, vector<16x32xf32>, vector<16x16xf32> -> vector<16x16xf32>
    %cst_138 = arith.constant 0.353553385 : f32
    %368 = vector.broadcast %cst_138 : f32 to vector<16x16xf32>
    %369 = arith.mulf %367, %368 : vector<16x16xf32>
    %370 = arith.addf %369, %347 : vector<16x16xf32>
    %cst_139 = arith.constant dense<0xFF800000> : vector<16xf32>
    %371 = vector.multi_reduction <maximumf>, %370, %cst_139 [1] : vector<16x16xf32> to vector<16xf32>
    %372 = vector.shape_cast %371 : vector<16xf32> to vector<16x1xf32>
    %373 = vector.broadcast %372 : vector<16x1xf32> to vector<16x16xf32>
    %374 = arith.subf %370, %373 : vector<16x16xf32>
    %375 = math.exp %374 : vector<16x16xf32>
    %cst_140 = arith.constant dense<0.000000e+00> : vector<16xf32>
    %376 = vector.multi_reduction <add>, %375, %cst_140 [1] : vector<16x16xf32> to vector<16xf32>
    %377 = vector.shape_cast %376 : vector<16xf32> to vector<16x1xf32>
    %378 = tpu.reciprocal %377 {approx = true} : vector<16x1xf32> -> vector<16x1xf32>
    %379 = vector.broadcast %378 : vector<16x1xf32> to vector<16x16xf32>
    %380 = arith.mulf %375, %379 : vector<16x16xf32>
    %381 = vector.broadcast %2 : vector<1x32xf32> to vector<16x32xf32>
    %382 = arith.mulf %363, %381 : vector<16x32xf32>
    %cst_141 = arith.constant dense<0.000000e+00> : vector<16x32xf32>
    %383 = tpu.matmul %380, %382, %cst_141 {dimension_numbers = #tpu.dot_dimension_numbers<[1], [0], [0], [1], [0, 0, 1, 1], [], []>} : vector<16x16xf32>, vector<16x32xf32>, vector<16x32xf32> -> vector<16x32xf32>
    %384 = arith.addf %364, %383 : vector<16x32xf32>
    %385 = vector.broadcast %3 : vector<1x32xf32> to vector<16x32xf32>
    %386 = arith.mulf %353, %385 : vector<16x32xf32>
    %cst_142 = arith.constant dense<0.000000e+00> : vector<16x16xf32>
    %387 = tpu.matmul %386, %358, %cst_142 {dimension_numbers = #tpu.dot_dimension_numbers<[1], [1], [0], [0], [0, 0, 1, 0], [], []>} : vector<16x32xf32>, vector<16x32xf32>, vector<16x16xf32> -> vector<16x16xf32>
    %cst_143 = arith.constant 0.353553385 : f32
    %388 = vector.broadcast %cst_143 : f32 to vector<16x16xf32>
    %389 = arith.mulf %387, %388 : vector<16x16xf32>
    %390 = arith.addf %389, %347 : vector<16x16xf32>
    %cst_144 = arith.constant dense<0xFF800000> : vector<16xf32>
    %391 = vector.multi_reduction <maximumf>, %390, %cst_144 [1] : vector<16x16xf32> to vector<16xf32>
    %392 = vector.shape_cast %391 : vector<16xf32> to vector<16x1xf32>
    %393 = vector.broadcast %392 : vector<16x1xf32> to vector<16x16xf32>
    %394 = arith.subf %390, %393 : vector<16x16xf32>
    %395 = math.exp %394 : vector<16x16xf32>
    %cst_145 = arith.constant dense<0.000000e+00> : vector<16xf32>
    %396 = vector.multi_reduction <add>, %395, %cst_145 [1] : vector<16x16xf32> to vector<16xf32>
    %397 = vector.shape_cast %396 : vector<16xf32> to vector<16x1xf32>
    %398 = tpu.reciprocal %397 {approx = true} : vector<16x1xf32> -> vector<16x1xf32>
    %399 = vector.broadcast %398 : vector<16x1xf32> to vector<16x16xf32>
    %400 = arith.mulf %395, %399 : vector<16x16xf32>
    %401 = vector.broadcast %3 : vector<1x32xf32> to vector<16x32xf32>
    %402 = arith.mulf %363, %401 : vector<16x32xf32>
    %cst_146 = arith.constant dense<0.000000e+00> : vector<16x32xf32>
    %403 = tpu.matmul %400, %402, %cst_146 {dimension_numbers = #tpu.dot_dimension_numbers<[1], [0], [0], [1], [0, 0, 1, 1], [], []>} : vector<16x16xf32>, vector<16x32xf32>, vector<16x32xf32> -> vector<16x32xf32>
    %404 = arith.addf %384, %403 : vector<16x32xf32>
    %405 = vector.broadcast %4 : vector<1x32xf32> to vector<16x32xf32>
    %406 = arith.mulf %353, %405 : vector<16x32xf32>
    %cst_147 = arith.constant dense<0.000000e+00> : vector<16x16xf32>
    %407 = tpu.matmul %406, %358, %cst_147 {dimension_numbers = #tpu.dot_dimension_numbers<[1], [1], [0], [0], [0, 0, 1, 0], [], []>} : vector<16x32xf32>, vector<16x32xf32>, vector<16x16xf32> -> vector<16x16xf32>
    %cst_148 = arith.constant 0.353553385 : f32
    %408 = vector.broadcast %cst_148 : f32 to vector<16x16xf32>
    %409 = arith.mulf %407, %408 : vector<16x16xf32>
    %410 = arith.addf %409, %347 : vector<16x16xf32>
    %cst_149 = arith.constant dense<0xFF800000> : vector<16xf32>
    %411 = vector.multi_reduction <maximumf>, %410, %cst_149 [1] : vector<16x16xf32> to vector<16xf32>
    %412 = vector.shape_cast %411 : vector<16xf32> to vector<16x1xf32>
    %413 = vector.broadcast %412 : vector<16x1xf32> to vector<16x16xf32>
    %414 = arith.subf %410, %413 : vector<16x16xf32>
    %415 = math.exp %414 : vector<16x16xf32>
    %cst_150 = arith.constant dense<0.000000e+00> : vector<16xf32>
    %416 = vector.multi_reduction <add>, %415, %cst_150 [1] : vector<16x16xf32> to vector<16xf32>
    %417 = vector.shape_cast %416 : vector<16xf32> to vector<16x1xf32>
    %418 = tpu.reciprocal %417 {approx = true} : vector<16x1xf32> -> vector<16x1xf32>
    %419 = vector.broadcast %418 : vector<16x1xf32> to vector<16x16xf32>
    %420 = arith.mulf %415, %419 : vector<16x16xf32>
    %421 = vector.broadcast %4 : vector<1x32xf32> to vector<16x32xf32>
    %422 = arith.mulf %363, %421 : vector<16x32xf32>
    %cst_151 = arith.constant dense<0.000000e+00> : vector<16x32xf32>
    %423 = tpu.matmul %420, %422, %cst_151 {dimension_numbers = #tpu.dot_dimension_numbers<[1], [0], [0], [1], [0, 0, 1, 1], [], []>} : vector<16x16xf32>, vector<16x32xf32>, vector<16x32xf32> -> vector<16x32xf32>
    %424 = arith.addf %404, %423 : vector<16x32xf32>
    %425 = vector.broadcast %5 : vector<1x32xf32> to vector<16x32xf32>
    %426 = arith.mulf %353, %425 : vector<16x32xf32>
    %cst_152 = arith.constant dense<0.000000e+00> : vector<16x16xf32>
    %427 = tpu.matmul %426, %358, %cst_152 {dimension_numbers = #tpu.dot_dimension_numbers<[1], [1], [0], [0], [0, 0, 1, 0], [], []>} : vector<16x32xf32>, vector<16x32xf32>, vector<16x16xf32> -> vector<16x16xf32>
    %cst_153 = arith.constant 0.353553385 : f32
    %428 = vector.broadcast %cst_153 : f32 to vector<16x16xf32>
    %429 = arith.mulf %427, %428 : vector<16x16xf32>
    %430 = arith.addf %429, %347 : vector<16x16xf32>
    %cst_154 = arith.constant dense<0xFF800000> : vector<16xf32>
    %431 = vector.multi_reduction <maximumf>, %430, %cst_154 [1] : vector<16x16xf32> to vector<16xf32>
    %432 = vector.shape_cast %431 : vector<16xf32> to vector<16x1xf32>
    %433 = vector.broadcast %432 : vector<16x1xf32> to vector<16x16xf32>
    %434 = arith.subf %430, %433 : vector<16x16xf32>
    %435 = math.exp %434 : vector<16x16xf32>
    %cst_155 = arith.constant dense<0.000000e+00> : vector<16xf32>
    %436 = vector.multi_reduction <add>, %435, %cst_155 [1] : vector<16x16xf32> to vector<16xf32>
    %437 = vector.shape_cast %436 : vector<16xf32> to vector<16x1xf32>
    %438 = tpu.reciprocal %437 {approx = true} : vector<16x1xf32> -> vector<16x1xf32>
    %439 = vector.broadcast %438 : vector<16x1xf32> to vector<16x16xf32>
    %440 = arith.mulf %435, %439 : vector<16x16xf32>
    %441 = vector.broadcast %5 : vector<1x32xf32> to vector<16x32xf32>
    %442 = arith.mulf %363, %441 : vector<16x32xf32>
    %cst_156 = arith.constant dense<0.000000e+00> : vector<16x32xf32>
    %443 = tpu.matmul %440, %442, %cst_156 {dimension_numbers = #tpu.dot_dimension_numbers<[1], [0], [0], [1], [0, 0, 1, 1], [], []>} : vector<16x16xf32>, vector<16x32xf32>, vector<16x32xf32> -> vector<16x32xf32>
    %444 = arith.addf %424, %443 : vector<16x32xf32>
    %c704 = arith.constant 704 : index
    %c0_157 = arith.constant 0 : index
    %445 = vector.load %arg2[%c704, %c0_157] : memref<1368x128xf32, #tpu.memory_space<vmem>>, vector<32x32xf32>
    %cst_158 = arith.constant dense<0.000000e+00> : vector<16x32xf32>
    %446 = tpu.matmul %444, %445, %cst_158 {dimension_numbers = #tpu.dot_dimension_numbers<[1], [0], [0], [1], [0, 0, 1, 1], [], []>} : vector<16x32xf32>, vector<32x32xf32>, vector<16x32xf32> -> vector<16x32xf32>
    %c1337 = arith.constant 1337 : index
    %c0_159 = arith.constant 0 : index
    %447 = vector.load %arg2[%c1337, %c0_159] : memref<1368x128xf32, #tpu.memory_space<vmem>>, vector<1x32xf32>
    %448 = vector.broadcast %447 : vector<1x32xf32> to vector<16x32xf32>
    %449 = arith.addf %446, %448 : vector<16x32xf32>
    %450 = arith.addf %346, %449 : vector<16x32xf32>
    %c1344 = arith.constant 1344 : index
    %c0_160 = arith.constant 0 : index
    %451 = vector.load %arg2[%c1344, %c0_160] : memref<1368x128xf32, #tpu.memory_space<vmem>>, vector<1x32xf32>
    %c1345 = arith.constant 1345 : index
    %c0_161 = arith.constant 0 : index
    %452 = vector.load %arg2[%c1345, %c0_161] : memref<1368x128xf32, #tpu.memory_space<vmem>>, vector<1x32xf32>
    %cst_162 = arith.constant dense<0.000000e+00> : vector<16xf32>
    %453 = vector.multi_reduction <add>, %450, %cst_162 [1] : vector<16x32xf32> to vector<16xf32>
    %454 = vector.shape_cast %453 : vector<16xf32> to vector<16x1xf32>
    %cst_163 = arith.constant 3.200000e+01 : f32
    %455 = vector.broadcast %cst_163 : f32 to vector<16x1xf32>
    %456 = arith.divf %454, %455 : vector<16x1xf32>
    %457 = vector.broadcast %456 : vector<16x1xf32> to vector<16x32xf32>
    %458 = arith.subf %450, %457 : vector<16x32xf32>
    %459 = arith.mulf %458, %458 : vector<16x32xf32>
    %cst_164 = arith.constant dense<0.000000e+00> : vector<16xf32>
    %460 = vector.multi_reduction <add>, %459, %cst_164 [1] : vector<16x32xf32> to vector<16xf32>
    %461 = vector.shape_cast %460 : vector<16xf32> to vector<16x1xf32>
    %cst_165 = arith.constant 3.200000e+01 : f32
    %462 = vector.broadcast %cst_165 : f32 to vector<16x1xf32>
    %463 = arith.divf %461, %462 : vector<16x1xf32>
    %464 = vector.broadcast %456 : vector<16x1xf32> to vector<16x32xf32>
    %465 = arith.subf %450, %464 : vector<16x32xf32>
    %cst_166 = arith.constant 9.99999974E-6 : f32
    %466 = vector.broadcast %cst_166 : f32 to vector<16x1xf32>
    %467 = arith.addf %463, %466 : vector<16x1xf32>
    %468 = math.rsqrt %467 : vector<16x1xf32>
    %469 = vector.broadcast %468 : vector<16x1xf32> to vector<16x32xf32>
    %470 = arith.mulf %465, %469 : vector<16x32xf32>
    %471 = vector.broadcast %451 : vector<1x32xf32> to vector<16x32xf32>
    %472 = arith.mulf %470, %471 : vector<16x32xf32>
    %473 = vector.broadcast %452 : vector<1x32xf32> to vector<16x32xf32>
    %474 = arith.addf %472, %473 : vector<16x32xf32>
    %c736 = arith.constant 736 : index
    %c0_167 = arith.constant 0 : index
    %475 = vector.load %arg2[%c736, %c0_167] : memref<1368x128xf32, #tpu.memory_space<vmem>>, vector<32x32xf32>
    %cst_168 = arith.constant dense<0.000000e+00> : vector<16x32xf32>
    %476 = tpu.matmul %474, %475, %cst_168 {dimension_numbers = #tpu.dot_dimension_numbers<[1], [0], [0], [1], [0, 0, 1, 1], [], []>} : vector<16x32xf32>, vector<32x32xf32>, vector<16x32xf32> -> vector<16x32xf32>
    %c1338 = arith.constant 1338 : index
    %c0_169 = arith.constant 0 : index
    %477 = vector.load %arg2[%c1338, %c0_169] : memref<1368x128xf32, #tpu.memory_space<vmem>>, vector<1x32xf32>
    %478 = vector.broadcast %477 : vector<1x32xf32> to vector<16x32xf32>
    %479 = arith.addf %476, %478 : vector<16x32xf32>
    %c768 = arith.constant 768 : index
    %c0_170 = arith.constant 0 : index
    %480 = vector.load %arg2[%c768, %c0_170] : memref<1368x128xf32, #tpu.memory_space<vmem>>, vector<32x32xf32>
    %cst_171 = arith.constant dense<0.000000e+00> : vector<16x32xf32>
    %481 = tpu.matmul %342, %480, %cst_171 {dimension_numbers = #tpu.dot_dimension_numbers<[1], [0], [0], [1], [0, 0, 1, 1], [], []>} : vector<16x32xf32>, vector<32x32xf32>, vector<16x32xf32> -> vector<16x32xf32>
    %c1339 = arith.constant 1339 : index
    %c0_172 = arith.constant 0 : index
    %482 = vector.load %arg2[%c1339, %c0_172] : memref<1368x128xf32, #tpu.memory_space<vmem>>, vector<1x32xf32>
    %483 = vector.broadcast %482 : vector<1x32xf32> to vector<16x32xf32>
    %484 = arith.addf %481, %483 : vector<16x32xf32>
    %c800 = arith.constant 800 : index
    %c0_173 = arith.constant 0 : index
    %485 = vector.load %arg2[%c800, %c0_173] : memref<1368x128xf32, #tpu.memory_space<vmem>>, vector<32x32xf32>
    %cst_174 = arith.constant dense<0.000000e+00> : vector<16x32xf32>
    %486 = tpu.matmul %342, %485, %cst_174 {dimension_numbers = #tpu.dot_dimension_numbers<[1], [0], [0], [1], [0, 0, 1, 1], [], []>} : vector<16x32xf32>, vector<32x32xf32>, vector<16x32xf32> -> vector<16x32xf32>
    %c1340 = arith.constant 1340 : index
    %c0_175 = arith.constant 0 : index
    %487 = vector.load %arg2[%c1340, %c0_175] : memref<1368x128xf32, #tpu.memory_space<vmem>>, vector<1x32xf32>
    %488 = vector.broadcast %487 : vector<1x32xf32> to vector<16x32xf32>
    %489 = arith.addf %486, %488 : vector<16x32xf32>
    %cst_176 = arith.constant 0.000000e+00 : f32
    %490 = vector.broadcast %cst_176 : f32 to vector<16x32xf32>
    %491 = vector.broadcast %2 : vector<1x32xf32> to vector<16x32xf32>
    %492 = arith.mulf %479, %491 : vector<16x32xf32>
    %cst_177 = arith.constant dense<0.000000e+00> : vector<16x16xf32>
    %493 = tpu.matmul %492, %484, %cst_177 {dimension_numbers = #tpu.dot_dimension_numbers<[1], [1], [0], [0], [0, 0, 1, 0], [], []>} : vector<16x32xf32>, vector<16x32xf32>, vector<16x16xf32> -> vector<16x16xf32>
    %cst_178 = arith.constant 0.353553385 : f32
    %494 = vector.broadcast %cst_178 : f32 to vector<16x16xf32>
    %495 = arith.mulf %493, %494 : vector<16x16xf32>
    %496 = arith.addf %495, %348 : vector<16x16xf32>
    %cst_179 = arith.constant dense<0xFF800000> : vector<16xf32>
    %497 = vector.multi_reduction <maximumf>, %496, %cst_179 [1] : vector<16x16xf32> to vector<16xf32>
    %498 = vector.shape_cast %497 : vector<16xf32> to vector<16x1xf32>
    %499 = vector.broadcast %498 : vector<16x1xf32> to vector<16x16xf32>
    %500 = arith.subf %496, %499 : vector<16x16xf32>
    %501 = math.exp %500 : vector<16x16xf32>
    %cst_180 = arith.constant dense<0.000000e+00> : vector<16xf32>
    %502 = vector.multi_reduction <add>, %501, %cst_180 [1] : vector<16x16xf32> to vector<16xf32>
    %503 = vector.shape_cast %502 : vector<16xf32> to vector<16x1xf32>
    %504 = tpu.reciprocal %503 {approx = true} : vector<16x1xf32> -> vector<16x1xf32>
    %505 = vector.broadcast %504 : vector<16x1xf32> to vector<16x16xf32>
    %506 = arith.mulf %501, %505 : vector<16x16xf32>
    %507 = vector.broadcast %2 : vector<1x32xf32> to vector<16x32xf32>
    %508 = arith.mulf %489, %507 : vector<16x32xf32>
    %cst_181 = arith.constant dense<0.000000e+00> : vector<16x32xf32>
    %509 = tpu.matmul %506, %508, %cst_181 {dimension_numbers = #tpu.dot_dimension_numbers<[1], [0], [0], [1], [0, 0, 1, 1], [], []>} : vector<16x16xf32>, vector<16x32xf32>, vector<16x32xf32> -> vector<16x32xf32>
    %510 = arith.addf %490, %509 : vector<16x32xf32>
    %511 = vector.broadcast %3 : vector<1x32xf32> to vector<16x32xf32>
    %512 = arith.mulf %479, %511 : vector<16x32xf32>
    %cst_182 = arith.constant dense<0.000000e+00> : vector<16x16xf32>
    %513 = tpu.matmul %512, %484, %cst_182 {dimension_numbers = #tpu.dot_dimension_numbers<[1], [1], [0], [0], [0, 0, 1, 0], [], []>} : vector<16x32xf32>, vector<16x32xf32>, vector<16x16xf32> -> vector<16x16xf32>
    %cst_183 = arith.constant 0.353553385 : f32
    %514 = vector.broadcast %cst_183 : f32 to vector<16x16xf32>
    %515 = arith.mulf %513, %514 : vector<16x16xf32>
    %516 = arith.addf %515, %348 : vector<16x16xf32>
    %cst_184 = arith.constant dense<0xFF800000> : vector<16xf32>
    %517 = vector.multi_reduction <maximumf>, %516, %cst_184 [1] : vector<16x16xf32> to vector<16xf32>
    %518 = vector.shape_cast %517 : vector<16xf32> to vector<16x1xf32>
    %519 = vector.broadcast %518 : vector<16x1xf32> to vector<16x16xf32>
    %520 = arith.subf %516, %519 : vector<16x16xf32>
    %521 = math.exp %520 : vector<16x16xf32>
    %cst_185 = arith.constant dense<0.000000e+00> : vector<16xf32>
    %522 = vector.multi_reduction <add>, %521, %cst_185 [1] : vector<16x16xf32> to vector<16xf32>
    %523 = vector.shape_cast %522 : vector<16xf32> to vector<16x1xf32>
    %524 = tpu.reciprocal %523 {approx = true} : vector<16x1xf32> -> vector<16x1xf32>
    %525 = vector.broadcast %524 : vector<16x1xf32> to vector<16x16xf32>
    %526 = arith.mulf %521, %525 : vector<16x16xf32>
    %527 = vector.broadcast %3 : vector<1x32xf32> to vector<16x32xf32>
    %528 = arith.mulf %489, %527 : vector<16x32xf32>
    %cst_186 = arith.constant dense<0.000000e+00> : vector<16x32xf32>
    %529 = tpu.matmul %526, %528, %cst_186 {dimension_numbers = #tpu.dot_dimension_numbers<[1], [0], [0], [1], [0, 0, 1, 1], [], []>} : vector<16x16xf32>, vector<16x32xf32>, vector<16x32xf32> -> vector<16x32xf32>
    %530 = arith.addf %510, %529 : vector<16x32xf32>
    %531 = vector.broadcast %4 : vector<1x32xf32> to vector<16x32xf32>
    %532 = arith.mulf %479, %531 : vector<16x32xf32>
    %cst_187 = arith.constant dense<0.000000e+00> : vector<16x16xf32>
    %533 = tpu.matmul %532, %484, %cst_187 {dimension_numbers = #tpu.dot_dimension_numbers<[1], [1], [0], [0], [0, 0, 1, 0], [], []>} : vector<16x32xf32>, vector<16x32xf32>, vector<16x16xf32> -> vector<16x16xf32>
    %cst_188 = arith.constant 0.353553385 : f32
    %534 = vector.broadcast %cst_188 : f32 to vector<16x16xf32>
    %535 = arith.mulf %533, %534 : vector<16x16xf32>
    %536 = arith.addf %535, %348 : vector<16x16xf32>
    %cst_189 = arith.constant dense<0xFF800000> : vector<16xf32>
    %537 = vector.multi_reduction <maximumf>, %536, %cst_189 [1] : vector<16x16xf32> to vector<16xf32>
    %538 = vector.shape_cast %537 : vector<16xf32> to vector<16x1xf32>
    %539 = vector.broadcast %538 : vector<16x1xf32> to vector<16x16xf32>
    %540 = arith.subf %536, %539 : vector<16x16xf32>
    %541 = math.exp %540 : vector<16x16xf32>
    %cst_190 = arith.constant dense<0.000000e+00> : vector<16xf32>
    %542 = vector.multi_reduction <add>, %541, %cst_190 [1] : vector<16x16xf32> to vector<16xf32>
    %543 = vector.shape_cast %542 : vector<16xf32> to vector<16x1xf32>
    %544 = tpu.reciprocal %543 {approx = true} : vector<16x1xf32> -> vector<16x1xf32>
    %545 = vector.broadcast %544 : vector<16x1xf32> to vector<16x16xf32>
    %546 = arith.mulf %541, %545 : vector<16x16xf32>
    %547 = vector.broadcast %4 : vector<1x32xf32> to vector<16x32xf32>
    %548 = arith.mulf %489, %547 : vector<16x32xf32>
    %cst_191 = arith.constant dense<0.000000e+00> : vector<16x32xf32>
    %549 = tpu.matmul %546, %548, %cst_191 {dimension_numbers = #tpu.dot_dimension_numbers<[1], [0], [0], [1], [0, 0, 1, 1], [], []>} : vector<16x16xf32>, vector<16x32xf32>, vector<16x32xf32> -> vector<16x32xf32>
    %550 = arith.addf %530, %549 : vector<16x32xf32>
    %551 = vector.broadcast %5 : vector<1x32xf32> to vector<16x32xf32>
    %552 = arith.mulf %479, %551 : vector<16x32xf32>
    %cst_192 = arith.constant dense<0.000000e+00> : vector<16x16xf32>
    %553 = tpu.matmul %552, %484, %cst_192 {dimension_numbers = #tpu.dot_dimension_numbers<[1], [1], [0], [0], [0, 0, 1, 0], [], []>} : vector<16x32xf32>, vector<16x32xf32>, vector<16x16xf32> -> vector<16x16xf32>
    %cst_193 = arith.constant 0.353553385 : f32
    %554 = vector.broadcast %cst_193 : f32 to vector<16x16xf32>
    %555 = arith.mulf %553, %554 : vector<16x16xf32>
    %556 = arith.addf %555, %348 : vector<16x16xf32>
    %cst_194 = arith.constant dense<0xFF800000> : vector<16xf32>
    %557 = vector.multi_reduction <maximumf>, %556, %cst_194 [1] : vector<16x16xf32> to vector<16xf32>
    %558 = vector.shape_cast %557 : vector<16xf32> to vector<16x1xf32>
    %559 = vector.broadcast %558 : vector<16x1xf32> to vector<16x16xf32>
    %560 = arith.subf %556, %559 : vector<16x16xf32>
    %561 = math.exp %560 : vector<16x16xf32>
    %cst_195 = arith.constant dense<0.000000e+00> : vector<16xf32>
    %562 = vector.multi_reduction <add>, %561, %cst_195 [1] : vector<16x16xf32> to vector<16xf32>
    %563 = vector.shape_cast %562 : vector<16xf32> to vector<16x1xf32>
    %564 = tpu.reciprocal %563 {approx = true} : vector<16x1xf32> -> vector<16x1xf32>
    %565 = vector.broadcast %564 : vector<16x1xf32> to vector<16x16xf32>
    %566 = arith.mulf %561, %565 : vector<16x16xf32>
    %567 = vector.broadcast %5 : vector<1x32xf32> to vector<16x32xf32>
    %568 = arith.mulf %489, %567 : vector<16x32xf32>
    %cst_196 = arith.constant dense<0.000000e+00> : vector<16x32xf32>
    %569 = tpu.matmul %566, %568, %cst_196 {dimension_numbers = #tpu.dot_dimension_numbers<[1], [0], [0], [1], [0, 0, 1, 1], [], []>} : vector<16x16xf32>, vector<16x32xf32>, vector<16x32xf32> -> vector<16x32xf32>
    %570 = arith.addf %550, %569 : vector<16x32xf32>
    %c832 = arith.constant 832 : index
    %c0_197 = arith.constant 0 : index
    %571 = vector.load %arg2[%c832, %c0_197] : memref<1368x128xf32, #tpu.memory_space<vmem>>, vector<32x32xf32>
    %cst_198 = arith.constant dense<0.000000e+00> : vector<16x32xf32>
    %572 = tpu.matmul %570, %571, %cst_198 {dimension_numbers = #tpu.dot_dimension_numbers<[1], [0], [0], [1], [0, 0, 1, 1], [], []>} : vector<16x32xf32>, vector<32x32xf32>, vector<16x32xf32> -> vector<16x32xf32>
    %c1341 = arith.constant 1341 : index
    %c0_199 = arith.constant 0 : index
    %573 = vector.load %arg2[%c1341, %c0_199] : memref<1368x128xf32, #tpu.memory_space<vmem>>, vector<1x32xf32>
    %574 = vector.broadcast %573 : vector<1x32xf32> to vector<16x32xf32>
    %575 = arith.addf %572, %574 : vector<16x32xf32>
    %576 = arith.addf %474, %575 : vector<16x32xf32>
    %c1346 = arith.constant 1346 : index
    %c0_200 = arith.constant 0 : index
    %577 = vector.load %arg2[%c1346, %c0_200] : memref<1368x128xf32, #tpu.memory_space<vmem>>, vector<1x32xf32>
    %c1347 = arith.constant 1347 : index
    %c0_201 = arith.constant 0 : index
    %578 = vector.load %arg2[%c1347, %c0_201] : memref<1368x128xf32, #tpu.memory_space<vmem>>, vector<1x32xf32>
    %cst_202 = arith.constant dense<0.000000e+00> : vector<16xf32>
    %579 = vector.multi_reduction <add>, %576, %cst_202 [1] : vector<16x32xf32> to vector<16xf32>
    %580 = vector.shape_cast %579 : vector<16xf32> to vector<16x1xf32>
    %cst_203 = arith.constant 3.200000e+01 : f32
    %581 = vector.broadcast %cst_203 : f32 to vector<16x1xf32>
    %582 = arith.divf %580, %581 : vector<16x1xf32>
    %583 = vector.broadcast %582 : vector<16x1xf32> to vector<16x32xf32>
    %584 = arith.subf %576, %583 : vector<16x32xf32>
    %585 = arith.mulf %584, %584 : vector<16x32xf32>
    %cst_204 = arith.constant dense<0.000000e+00> : vector<16xf32>
    %586 = vector.multi_reduction <add>, %585, %cst_204 [1] : vector<16x32xf32> to vector<16xf32>
    %587 = vector.shape_cast %586 : vector<16xf32> to vector<16x1xf32>
    %cst_205 = arith.constant 3.200000e+01 : f32
    %588 = vector.broadcast %cst_205 : f32 to vector<16x1xf32>
    %589 = arith.divf %587, %588 : vector<16x1xf32>
    %590 = vector.broadcast %582 : vector<16x1xf32> to vector<16x32xf32>
    %591 = arith.subf %576, %590 : vector<16x32xf32>
    %cst_206 = arith.constant 9.99999974E-6 : f32
    %592 = vector.broadcast %cst_206 : f32 to vector<16x1xf32>
    %593 = arith.addf %589, %592 : vector<16x1xf32>
    %594 = math.rsqrt %593 : vector<16x1xf32>
    %595 = vector.broadcast %594 : vector<16x1xf32> to vector<16x32xf32>
    %596 = arith.mulf %591, %595 : vector<16x32xf32>
    %597 = vector.broadcast %577 : vector<1x32xf32> to vector<16x32xf32>
    %598 = arith.mulf %596, %597 : vector<16x32xf32>
    %599 = vector.broadcast %578 : vector<1x32xf32> to vector<16x32xf32>
    %600 = arith.addf %598, %599 : vector<16x32xf32>
    %c864 = arith.constant 864 : index
    %c0_207 = arith.constant 0 : index
    %601 = vector.load %arg2[%c864, %c0_207] : memref<1368x128xf32, #tpu.memory_space<vmem>>, vector<32x64xf32>
    %cst_208 = arith.constant dense<0.000000e+00> : vector<16x64xf32>
    %602 = tpu.matmul %600, %601, %cst_208 {dimension_numbers = #tpu.dot_dimension_numbers<[1], [0], [0], [1], [0, 0, 1, 1], [], []>} : vector<16x32xf32>, vector<32x64xf32>, vector<16x64xf32> -> vector<16x64xf32>
    %c1342 = arith.constant 1342 : index
    %c0_209 = arith.constant 0 : index
    %603 = vector.load %arg2[%c1342, %c0_209] : memref<1368x128xf32, #tpu.memory_space<vmem>>, vector<1x64xf32>
    %604 = vector.broadcast %603 : vector<1x64xf32> to vector<16x64xf32>
    %605 = arith.addf %602, %604 : vector<16x64xf32>
    %cst_210 = arith.constant 0.000000e+00 : f32
    %606 = vector.broadcast %cst_210 : f32 to vector<16x64xf32>
    %607 = arith.maximumf %605, %606 : vector<16x64xf32>
    %c896 = arith.constant 896 : index
    %c0_211 = arith.constant 0 : index
    %608 = vector.load %arg2[%c896, %c0_211] : memref<1368x128xf32, #tpu.memory_space<vmem>>, vector<64x32xf32>
    %cst_212 = arith.constant dense<0.000000e+00> : vector<16x32xf32>
    %609 = tpu.matmul %607, %608, %cst_212 {dimension_numbers = #tpu.dot_dimension_numbers<[1], [0], [0], [1], [0, 0, 1, 1], [], []>} : vector<16x64xf32>, vector<64x32xf32>, vector<16x32xf32> -> vector<16x32xf32>
    %c1343 = arith.constant 1343 : index
    %c0_213 = arith.constant 0 : index
    %610 = vector.load %arg2[%c1343, %c0_213] : memref<1368x128xf32, #tpu.memory_space<vmem>>, vector<1x32xf32>
    %611 = vector.broadcast %610 : vector<1x32xf32> to vector<16x32xf32>
    %612 = arith.addf %609, %611 : vector<16x32xf32>
    %613 = arith.addf %600, %612 : vector<16x32xf32>
    %c1348 = arith.constant 1348 : index
    %c0_214 = arith.constant 0 : index
    %614 = vector.load %arg2[%c1348, %c0_214] : memref<1368x128xf32, #tpu.memory_space<vmem>>, vector<1x32xf32>
    %c1349 = arith.constant 1349 : index
    %c0_215 = arith.constant 0 : index
    %615 = vector.load %arg2[%c1349, %c0_215] : memref<1368x128xf32, #tpu.memory_space<vmem>>, vector<1x32xf32>
    %cst_216 = arith.constant dense<0.000000e+00> : vector<16xf32>
    %616 = vector.multi_reduction <add>, %613, %cst_216 [1] : vector<16x32xf32> to vector<16xf32>
    %617 = vector.shape_cast %616 : vector<16xf32> to vector<16x1xf32>
    %cst_217 = arith.constant 3.200000e+01 : f32
    %618 = vector.broadcast %cst_217 : f32 to vector<16x1xf32>
    %619 = arith.divf %617, %618 : vector<16x1xf32>
    %620 = vector.broadcast %619 : vector<16x1xf32> to vector<16x32xf32>
    %621 = arith.subf %613, %620 : vector<16x32xf32>
    %622 = arith.mulf %621, %621 : vector<16x32xf32>
    %cst_218 = arith.constant dense<0.000000e+00> : vector<16xf32>
    %623 = vector.multi_reduction <add>, %622, %cst_218 [1] : vector<16x32xf32> to vector<16xf32>
    %624 = vector.shape_cast %623 : vector<16xf32> to vector<16x1xf32>
    %cst_219 = arith.constant 3.200000e+01 : f32
    %625 = vector.broadcast %cst_219 : f32 to vector<16x1xf32>
    %626 = arith.divf %624, %625 : vector<16x1xf32>
    %627 = vector.broadcast %619 : vector<16x1xf32> to vector<16x32xf32>
    %628 = arith.subf %613, %627 : vector<16x32xf32>
    %cst_220 = arith.constant 9.99999974E-6 : f32
    %629 = vector.broadcast %cst_220 : f32 to vector<16x1xf32>
    %630 = arith.addf %626, %629 : vector<16x1xf32>
    %631 = math.rsqrt %630 : vector<16x1xf32>
    %632 = vector.broadcast %631 : vector<16x1xf32> to vector<16x32xf32>
    %633 = arith.mulf %628, %632 : vector<16x32xf32>
    %634 = vector.broadcast %614 : vector<1x32xf32> to vector<16x32xf32>
    %635 = arith.mulf %633, %634 : vector<16x32xf32>
    %636 = vector.broadcast %615 : vector<1x32xf32> to vector<16x32xf32>
    %637 = arith.addf %635, %636 : vector<16x32xf32>
    %c960 = arith.constant 960 : index
    %c0_221 = arith.constant 0 : index
    %638 = vector.load %arg2[%c960, %c0_221] : memref<1368x128xf32, #tpu.memory_space<vmem>>, vector<32x32xf32>
    %cst_222 = arith.constant dense<0.000000e+00> : vector<16x32xf32>
    %639 = tpu.matmul %637, %638, %cst_222 {dimension_numbers = #tpu.dot_dimension_numbers<[1], [0], [0], [1], [0, 0, 1, 1], [], []>} : vector<16x32xf32>, vector<32x32xf32>, vector<16x32xf32> -> vector<16x32xf32>
    %c1350 = arith.constant 1350 : index
    %c0_223 = arith.constant 0 : index
    %640 = vector.load %arg2[%c1350, %c0_223] : memref<1368x128xf32, #tpu.memory_space<vmem>>, vector<1x32xf32>
    %641 = vector.broadcast %640 : vector<1x32xf32> to vector<16x32xf32>
    %642 = arith.addf %639, %641 : vector<16x32xf32>
    %c992 = arith.constant 992 : index
    %c0_224 = arith.constant 0 : index
    %643 = vector.load %arg2[%c992, %c0_224] : memref<1368x128xf32, #tpu.memory_space<vmem>>, vector<32x32xf32>
    %cst_225 = arith.constant dense<0.000000e+00> : vector<16x32xf32>
    %644 = tpu.matmul %637, %643, %cst_225 {dimension_numbers = #tpu.dot_dimension_numbers<[1], [0], [0], [1], [0, 0, 1, 1], [], []>} : vector<16x32xf32>, vector<32x32xf32>, vector<16x32xf32> -> vector<16x32xf32>
    %c1351 = arith.constant 1351 : index
    %c0_226 = arith.constant 0 : index
    %645 = vector.load %arg2[%c1351, %c0_226] : memref<1368x128xf32, #tpu.memory_space<vmem>>, vector<1x32xf32>
    %646 = vector.broadcast %645 : vector<1x32xf32> to vector<16x32xf32>
    %647 = arith.addf %644, %646 : vector<16x32xf32>
    %c1024 = arith.constant 1024 : index
    %c0_227 = arith.constant 0 : index
    %648 = vector.load %arg2[%c1024, %c0_227] : memref<1368x128xf32, #tpu.memory_space<vmem>>, vector<32x32xf32>
    %cst_228 = arith.constant dense<0.000000e+00> : vector<16x32xf32>
    %649 = tpu.matmul %637, %648, %cst_228 {dimension_numbers = #tpu.dot_dimension_numbers<[1], [0], [0], [1], [0, 0, 1, 1], [], []>} : vector<16x32xf32>, vector<32x32xf32>, vector<16x32xf32> -> vector<16x32xf32>
    %c1352 = arith.constant 1352 : index
    %c0_229 = arith.constant 0 : index
    %650 = vector.load %arg2[%c1352, %c0_229] : memref<1368x128xf32, #tpu.memory_space<vmem>>, vector<1x32xf32>
    %651 = vector.broadcast %650 : vector<1x32xf32> to vector<16x32xf32>
    %652 = arith.addf %649, %651 : vector<16x32xf32>
    %cst_230 = arith.constant 0.000000e+00 : f32
    %653 = vector.broadcast %cst_230 : f32 to vector<16x32xf32>
    %654 = vector.broadcast %2 : vector<1x32xf32> to vector<16x32xf32>
    %655 = arith.mulf %642, %654 : vector<16x32xf32>
    %cst_231 = arith.constant dense<0.000000e+00> : vector<16x16xf32>
    %656 = tpu.matmul %655, %647, %cst_231 {dimension_numbers = #tpu.dot_dimension_numbers<[1], [1], [0], [0], [0, 0, 1, 0], [], []>} : vector<16x32xf32>, vector<16x32xf32>, vector<16x16xf32> -> vector<16x16xf32>
    %cst_232 = arith.constant 0.353553385 : f32
    %657 = vector.broadcast %cst_232 : f32 to vector<16x16xf32>
    %658 = arith.mulf %656, %657 : vector<16x16xf32>
    %659 = arith.addf %658, %347 : vector<16x16xf32>
    %cst_233 = arith.constant dense<0xFF800000> : vector<16xf32>
    %660 = vector.multi_reduction <maximumf>, %659, %cst_233 [1] : vector<16x16xf32> to vector<16xf32>
    %661 = vector.shape_cast %660 : vector<16xf32> to vector<16x1xf32>
    %662 = vector.broadcast %661 : vector<16x1xf32> to vector<16x16xf32>
    %663 = arith.subf %659, %662 : vector<16x16xf32>
    %664 = math.exp %663 : vector<16x16xf32>
    %cst_234 = arith.constant dense<0.000000e+00> : vector<16xf32>
    %665 = vector.multi_reduction <add>, %664, %cst_234 [1] : vector<16x16xf32> to vector<16xf32>
    %666 = vector.shape_cast %665 : vector<16xf32> to vector<16x1xf32>
    %667 = tpu.reciprocal %666 {approx = true} : vector<16x1xf32> -> vector<16x1xf32>
    %668 = vector.broadcast %667 : vector<16x1xf32> to vector<16x16xf32>
    %669 = arith.mulf %664, %668 : vector<16x16xf32>
    %670 = vector.broadcast %2 : vector<1x32xf32> to vector<16x32xf32>
    %671 = arith.mulf %652, %670 : vector<16x32xf32>
    %cst_235 = arith.constant dense<0.000000e+00> : vector<16x32xf32>
    %672 = tpu.matmul %669, %671, %cst_235 {dimension_numbers = #tpu.dot_dimension_numbers<[1], [0], [0], [1], [0, 0, 1, 1], [], []>} : vector<16x16xf32>, vector<16x32xf32>, vector<16x32xf32> -> vector<16x32xf32>
    %673 = arith.addf %653, %672 : vector<16x32xf32>
    %674 = vector.broadcast %3 : vector<1x32xf32> to vector<16x32xf32>
    %675 = arith.mulf %642, %674 : vector<16x32xf32>
    %cst_236 = arith.constant dense<0.000000e+00> : vector<16x16xf32>
    %676 = tpu.matmul %675, %647, %cst_236 {dimension_numbers = #tpu.dot_dimension_numbers<[1], [1], [0], [0], [0, 0, 1, 0], [], []>} : vector<16x32xf32>, vector<16x32xf32>, vector<16x16xf32> -> vector<16x16xf32>
    %cst_237 = arith.constant 0.353553385 : f32
    %677 = vector.broadcast %cst_237 : f32 to vector<16x16xf32>
    %678 = arith.mulf %676, %677 : vector<16x16xf32>
    %679 = arith.addf %678, %347 : vector<16x16xf32>
    %cst_238 = arith.constant dense<0xFF800000> : vector<16xf32>
    %680 = vector.multi_reduction <maximumf>, %679, %cst_238 [1] : vector<16x16xf32> to vector<16xf32>
    %681 = vector.shape_cast %680 : vector<16xf32> to vector<16x1xf32>
    %682 = vector.broadcast %681 : vector<16x1xf32> to vector<16x16xf32>
    %683 = arith.subf %679, %682 : vector<16x16xf32>
    %684 = math.exp %683 : vector<16x16xf32>
    %cst_239 = arith.constant dense<0.000000e+00> : vector<16xf32>
    %685 = vector.multi_reduction <add>, %684, %cst_239 [1] : vector<16x16xf32> to vector<16xf32>
    %686 = vector.shape_cast %685 : vector<16xf32> to vector<16x1xf32>
    %687 = tpu.reciprocal %686 {approx = true} : vector<16x1xf32> -> vector<16x1xf32>
    %688 = vector.broadcast %687 : vector<16x1xf32> to vector<16x16xf32>
    %689 = arith.mulf %684, %688 : vector<16x16xf32>
    %690 = vector.broadcast %3 : vector<1x32xf32> to vector<16x32xf32>
    %691 = arith.mulf %652, %690 : vector<16x32xf32>
    %cst_240 = arith.constant dense<0.000000e+00> : vector<16x32xf32>
    %692 = tpu.matmul %689, %691, %cst_240 {dimension_numbers = #tpu.dot_dimension_numbers<[1], [0], [0], [1], [0, 0, 1, 1], [], []>} : vector<16x16xf32>, vector<16x32xf32>, vector<16x32xf32> -> vector<16x32xf32>
    %693 = arith.addf %673, %692 : vector<16x32xf32>
    %694 = vector.broadcast %4 : vector<1x32xf32> to vector<16x32xf32>
    %695 = arith.mulf %642, %694 : vector<16x32xf32>
    %cst_241 = arith.constant dense<0.000000e+00> : vector<16x16xf32>
    %696 = tpu.matmul %695, %647, %cst_241 {dimension_numbers = #tpu.dot_dimension_numbers<[1], [1], [0], [0], [0, 0, 1, 0], [], []>} : vector<16x32xf32>, vector<16x32xf32>, vector<16x16xf32> -> vector<16x16xf32>
    %cst_242 = arith.constant 0.353553385 : f32
    %697 = vector.broadcast %cst_242 : f32 to vector<16x16xf32>
    %698 = arith.mulf %696, %697 : vector<16x16xf32>
    %699 = arith.addf %698, %347 : vector<16x16xf32>
    %cst_243 = arith.constant dense<0xFF800000> : vector<16xf32>
    %700 = vector.multi_reduction <maximumf>, %699, %cst_243 [1] : vector<16x16xf32> to vector<16xf32>
    %701 = vector.shape_cast %700 : vector<16xf32> to vector<16x1xf32>
    %702 = vector.broadcast %701 : vector<16x1xf32> to vector<16x16xf32>
    %703 = arith.subf %699, %702 : vector<16x16xf32>
    %704 = math.exp %703 : vector<16x16xf32>
    %cst_244 = arith.constant dense<0.000000e+00> : vector<16xf32>
    %705 = vector.multi_reduction <add>, %704, %cst_244 [1] : vector<16x16xf32> to vector<16xf32>
    %706 = vector.shape_cast %705 : vector<16xf32> to vector<16x1xf32>
    %707 = tpu.reciprocal %706 {approx = true} : vector<16x1xf32> -> vector<16x1xf32>
    %708 = vector.broadcast %707 : vector<16x1xf32> to vector<16x16xf32>
    %709 = arith.mulf %704, %708 : vector<16x16xf32>
    %710 = vector.broadcast %4 : vector<1x32xf32> to vector<16x32xf32>
    %711 = arith.mulf %652, %710 : vector<16x32xf32>
    %cst_245 = arith.constant dense<0.000000e+00> : vector<16x32xf32>
    %712 = tpu.matmul %709, %711, %cst_245 {dimension_numbers = #tpu.dot_dimension_numbers<[1], [0], [0], [1], [0, 0, 1, 1], [], []>} : vector<16x16xf32>, vector<16x32xf32>, vector<16x32xf32> -> vector<16x32xf32>
    %713 = arith.addf %693, %712 : vector<16x32xf32>
    %714 = vector.broadcast %5 : vector<1x32xf32> to vector<16x32xf32>
    %715 = arith.mulf %642, %714 : vector<16x32xf32>
    %cst_246 = arith.constant dense<0.000000e+00> : vector<16x16xf32>
    %716 = tpu.matmul %715, %647, %cst_246 {dimension_numbers = #tpu.dot_dimension_numbers<[1], [1], [0], [0], [0, 0, 1, 0], [], []>} : vector<16x32xf32>, vector<16x32xf32>, vector<16x16xf32> -> vector<16x16xf32>
    %cst_247 = arith.constant 0.353553385 : f32
    %717 = vector.broadcast %cst_247 : f32 to vector<16x16xf32>
    %718 = arith.mulf %716, %717 : vector<16x16xf32>
    %719 = arith.addf %718, %347 : vector<16x16xf32>
    %cst_248 = arith.constant dense<0xFF800000> : vector<16xf32>
    %720 = vector.multi_reduction <maximumf>, %719, %cst_248 [1] : vector<16x16xf32> to vector<16xf32>
    %721 = vector.shape_cast %720 : vector<16xf32> to vector<16x1xf32>
    %722 = vector.broadcast %721 : vector<16x1xf32> to vector<16x16xf32>
    %723 = arith.subf %719, %722 : vector<16x16xf32>
    %724 = math.exp %723 : vector<16x16xf32>
    %cst_249 = arith.constant dense<0.000000e+00> : vector<16xf32>
    %725 = vector.multi_reduction <add>, %724, %cst_249 [1] : vector<16x16xf32> to vector<16xf32>
    %726 = vector.shape_cast %725 : vector<16xf32> to vector<16x1xf32>
    %727 = tpu.reciprocal %726 {approx = true} : vector<16x1xf32> -> vector<16x1xf32>
    %728 = vector.broadcast %727 : vector<16x1xf32> to vector<16x16xf32>
    %729 = arith.mulf %724, %728 : vector<16x16xf32>
    %730 = vector.broadcast %5 : vector<1x32xf32> to vector<16x32xf32>
    %731 = arith.mulf %652, %730 : vector<16x32xf32>
    %cst_250 = arith.constant dense<0.000000e+00> : vector<16x32xf32>
    %732 = tpu.matmul %729, %731, %cst_250 {dimension_numbers = #tpu.dot_dimension_numbers<[1], [0], [0], [1], [0, 0, 1, 1], [], []>} : vector<16x16xf32>, vector<16x32xf32>, vector<16x32xf32> -> vector<16x32xf32>
    %733 = arith.addf %713, %732 : vector<16x32xf32>
    %c1056 = arith.constant 1056 : index
    %c0_251 = arith.constant 0 : index
    %734 = vector.load %arg2[%c1056, %c0_251] : memref<1368x128xf32, #tpu.memory_space<vmem>>, vector<32x32xf32>
    %cst_252 = arith.constant dense<0.000000e+00> : vector<16x32xf32>
    %735 = tpu.matmul %733, %734, %cst_252 {dimension_numbers = #tpu.dot_dimension_numbers<[1], [0], [0], [1], [0, 0, 1, 1], [], []>} : vector<16x32xf32>, vector<32x32xf32>, vector<16x32xf32> -> vector<16x32xf32>
    %c1353 = arith.constant 1353 : index
    %c0_253 = arith.constant 0 : index
    %736 = vector.load %arg2[%c1353, %c0_253] : memref<1368x128xf32, #tpu.memory_space<vmem>>, vector<1x32xf32>
    %737 = vector.broadcast %736 : vector<1x32xf32> to vector<16x32xf32>
    %738 = arith.addf %735, %737 : vector<16x32xf32>
    %739 = arith.addf %637, %738 : vector<16x32xf32>
    %c1360 = arith.constant 1360 : index
    %c0_254 = arith.constant 0 : index
    %740 = vector.load %arg2[%c1360, %c0_254] : memref<1368x128xf32, #tpu.memory_space<vmem>>, vector<1x32xf32>
    %c1361 = arith.constant 1361 : index
    %c0_255 = arith.constant 0 : index
    %741 = vector.load %arg2[%c1361, %c0_255] : memref<1368x128xf32, #tpu.memory_space<vmem>>, vector<1x32xf32>
    %cst_256 = arith.constant dense<0.000000e+00> : vector<16xf32>
    %742 = vector.multi_reduction <add>, %739, %cst_256 [1] : vector<16x32xf32> to vector<16xf32>
    %743 = vector.shape_cast %742 : vector<16xf32> to vector<16x1xf32>
    %cst_257 = arith.constant 3.200000e+01 : f32
    %744 = vector.broadcast %cst_257 : f32 to vector<16x1xf32>
    %745 = arith.divf %743, %744 : vector<16x1xf32>
    %746 = vector.broadcast %745 : vector<16x1xf32> to vector<16x32xf32>
    %747 = arith.subf %739, %746 : vector<16x32xf32>
    %748 = arith.mulf %747, %747 : vector<16x32xf32>
    %cst_258 = arith.constant dense<0.000000e+00> : vector<16xf32>
    %749 = vector.multi_reduction <add>, %748, %cst_258 [1] : vector<16x32xf32> to vector<16xf32>
    %750 = vector.shape_cast %749 : vector<16xf32> to vector<16x1xf32>
    %cst_259 = arith.constant 3.200000e+01 : f32
    %751 = vector.broadcast %cst_259 : f32 to vector<16x1xf32>
    %752 = arith.divf %750, %751 : vector<16x1xf32>
    %753 = vector.broadcast %745 : vector<16x1xf32> to vector<16x32xf32>
    %754 = arith.subf %739, %753 : vector<16x32xf32>
    %cst_260 = arith.constant 9.99999974E-6 : f32
    %755 = vector.broadcast %cst_260 : f32 to vector<16x1xf32>
    %756 = arith.addf %752, %755 : vector<16x1xf32>
    %757 = math.rsqrt %756 : vector<16x1xf32>
    %758 = vector.broadcast %757 : vector<16x1xf32> to vector<16x32xf32>
    %759 = arith.mulf %754, %758 : vector<16x32xf32>
    %760 = vector.broadcast %740 : vector<1x32xf32> to vector<16x32xf32>
    %761 = arith.mulf %759, %760 : vector<16x32xf32>
    %762 = vector.broadcast %741 : vector<1x32xf32> to vector<16x32xf32>
    %763 = arith.addf %761, %762 : vector<16x32xf32>
    %c1088 = arith.constant 1088 : index
    %c0_261 = arith.constant 0 : index
    %764 = vector.load %arg2[%c1088, %c0_261] : memref<1368x128xf32, #tpu.memory_space<vmem>>, vector<32x32xf32>
    %cst_262 = arith.constant dense<0.000000e+00> : vector<16x32xf32>
    %765 = tpu.matmul %763, %764, %cst_262 {dimension_numbers = #tpu.dot_dimension_numbers<[1], [0], [0], [1], [0, 0, 1, 1], [], []>} : vector<16x32xf32>, vector<32x32xf32>, vector<16x32xf32> -> vector<16x32xf32>
    %c1354 = arith.constant 1354 : index
    %c0_263 = arith.constant 0 : index
    %766 = vector.load %arg2[%c1354, %c0_263] : memref<1368x128xf32, #tpu.memory_space<vmem>>, vector<1x32xf32>
    %767 = vector.broadcast %766 : vector<1x32xf32> to vector<16x32xf32>
    %768 = arith.addf %765, %767 : vector<16x32xf32>
    %c1120 = arith.constant 1120 : index
    %c0_264 = arith.constant 0 : index
    %769 = vector.load %arg2[%c1120, %c0_264] : memref<1368x128xf32, #tpu.memory_space<vmem>>, vector<32x32xf32>
    %cst_265 = arith.constant dense<0.000000e+00> : vector<16x32xf32>
    %770 = tpu.matmul %342, %769, %cst_265 {dimension_numbers = #tpu.dot_dimension_numbers<[1], [0], [0], [1], [0, 0, 1, 1], [], []>} : vector<16x32xf32>, vector<32x32xf32>, vector<16x32xf32> -> vector<16x32xf32>
    %c1355 = arith.constant 1355 : index
    %c0_266 = arith.constant 0 : index
    %771 = vector.load %arg2[%c1355, %c0_266] : memref<1368x128xf32, #tpu.memory_space<vmem>>, vector<1x32xf32>
    %772 = vector.broadcast %771 : vector<1x32xf32> to vector<16x32xf32>
    %773 = arith.addf %770, %772 : vector<16x32xf32>
    %c1152 = arith.constant 1152 : index
    %c0_267 = arith.constant 0 : index
    %774 = vector.load %arg2[%c1152, %c0_267] : memref<1368x128xf32, #tpu.memory_space<vmem>>, vector<32x32xf32>
    %cst_268 = arith.constant dense<0.000000e+00> : vector<16x32xf32>
    %775 = tpu.matmul %342, %774, %cst_268 {dimension_numbers = #tpu.dot_dimension_numbers<[1], [0], [0], [1], [0, 0, 1, 1], [], []>} : vector<16x32xf32>, vector<32x32xf32>, vector<16x32xf32> -> vector<16x32xf32>
    %c1356 = arith.constant 1356 : index
    %c0_269 = arith.constant 0 : index
    %776 = vector.load %arg2[%c1356, %c0_269] : memref<1368x128xf32, #tpu.memory_space<vmem>>, vector<1x32xf32>
    %777 = vector.broadcast %776 : vector<1x32xf32> to vector<16x32xf32>
    %778 = arith.addf %775, %777 : vector<16x32xf32>
    %cst_270 = arith.constant 0.000000e+00 : f32
    %779 = vector.broadcast %cst_270 : f32 to vector<16x32xf32>
    %780 = vector.broadcast %2 : vector<1x32xf32> to vector<16x32xf32>
    %781 = arith.mulf %768, %780 : vector<16x32xf32>
    %cst_271 = arith.constant dense<0.000000e+00> : vector<16x16xf32>
    %782 = tpu.matmul %781, %773, %cst_271 {dimension_numbers = #tpu.dot_dimension_numbers<[1], [1], [0], [0], [0, 0, 1, 0], [], []>} : vector<16x32xf32>, vector<16x32xf32>, vector<16x16xf32> -> vector<16x16xf32>
    %cst_272 = arith.constant 0.353553385 : f32
    %783 = vector.broadcast %cst_272 : f32 to vector<16x16xf32>
    %784 = arith.mulf %782, %783 : vector<16x16xf32>
    %785 = arith.addf %784, %348 : vector<16x16xf32>
    %cst_273 = arith.constant dense<0xFF800000> : vector<16xf32>
    %786 = vector.multi_reduction <maximumf>, %785, %cst_273 [1] : vector<16x16xf32> to vector<16xf32>
    %787 = vector.shape_cast %786 : vector<16xf32> to vector<16x1xf32>
    %788 = vector.broadcast %787 : vector<16x1xf32> to vector<16x16xf32>
    %789 = arith.subf %785, %788 : vector<16x16xf32>
    %790 = math.exp %789 : vector<16x16xf32>
    %cst_274 = arith.constant dense<0.000000e+00> : vector<16xf32>
    %791 = vector.multi_reduction <add>, %790, %cst_274 [1] : vector<16x16xf32> to vector<16xf32>
    %792 = vector.shape_cast %791 : vector<16xf32> to vector<16x1xf32>
    %793 = tpu.reciprocal %792 {approx = true} : vector<16x1xf32> -> vector<16x1xf32>
    %794 = vector.broadcast %793 : vector<16x1xf32> to vector<16x16xf32>
    %795 = arith.mulf %790, %794 : vector<16x16xf32>
    %796 = vector.broadcast %2 : vector<1x32xf32> to vector<16x32xf32>
    %797 = arith.mulf %778, %796 : vector<16x32xf32>
    %cst_275 = arith.constant dense<0.000000e+00> : vector<16x32xf32>
    %798 = tpu.matmul %795, %797, %cst_275 {dimension_numbers = #tpu.dot_dimension_numbers<[1], [0], [0], [1], [0, 0, 1, 1], [], []>} : vector<16x16xf32>, vector<16x32xf32>, vector<16x32xf32> -> vector<16x32xf32>
    %799 = arith.addf %779, %798 : vector<16x32xf32>
    %800 = vector.broadcast %3 : vector<1x32xf32> to vector<16x32xf32>
    %801 = arith.mulf %768, %800 : vector<16x32xf32>
    %cst_276 = arith.constant dense<0.000000e+00> : vector<16x16xf32>
    %802 = tpu.matmul %801, %773, %cst_276 {dimension_numbers = #tpu.dot_dimension_numbers<[1], [1], [0], [0], [0, 0, 1, 0], [], []>} : vector<16x32xf32>, vector<16x32xf32>, vector<16x16xf32> -> vector<16x16xf32>
    %cst_277 = arith.constant 0.353553385 : f32
    %803 = vector.broadcast %cst_277 : f32 to vector<16x16xf32>
    %804 = arith.mulf %802, %803 : vector<16x16xf32>
    %805 = arith.addf %804, %348 : vector<16x16xf32>
    %cst_278 = arith.constant dense<0xFF800000> : vector<16xf32>
    %806 = vector.multi_reduction <maximumf>, %805, %cst_278 [1] : vector<16x16xf32> to vector<16xf32>
    %807 = vector.shape_cast %806 : vector<16xf32> to vector<16x1xf32>
    %808 = vector.broadcast %807 : vector<16x1xf32> to vector<16x16xf32>
    %809 = arith.subf %805, %808 : vector<16x16xf32>
    %810 = math.exp %809 : vector<16x16xf32>
    %cst_279 = arith.constant dense<0.000000e+00> : vector<16xf32>
    %811 = vector.multi_reduction <add>, %810, %cst_279 [1] : vector<16x16xf32> to vector<16xf32>
    %812 = vector.shape_cast %811 : vector<16xf32> to vector<16x1xf32>
    %813 = tpu.reciprocal %812 {approx = true} : vector<16x1xf32> -> vector<16x1xf32>
    %814 = vector.broadcast %813 : vector<16x1xf32> to vector<16x16xf32>
    %815 = arith.mulf %810, %814 : vector<16x16xf32>
    %816 = vector.broadcast %3 : vector<1x32xf32> to vector<16x32xf32>
    %817 = arith.mulf %778, %816 : vector<16x32xf32>
    %cst_280 = arith.constant dense<0.000000e+00> : vector<16x32xf32>
    %818 = tpu.matmul %815, %817, %cst_280 {dimension_numbers = #tpu.dot_dimension_numbers<[1], [0], [0], [1], [0, 0, 1, 1], [], []>} : vector<16x16xf32>, vector<16x32xf32>, vector<16x32xf32> -> vector<16x32xf32>
    %819 = arith.addf %799, %818 : vector<16x32xf32>
    %820 = vector.broadcast %4 : vector<1x32xf32> to vector<16x32xf32>
    %821 = arith.mulf %768, %820 : vector<16x32xf32>
    %cst_281 = arith.constant dense<0.000000e+00> : vector<16x16xf32>
    %822 = tpu.matmul %821, %773, %cst_281 {dimension_numbers = #tpu.dot_dimension_numbers<[1], [1], [0], [0], [0, 0, 1, 0], [], []>} : vector<16x32xf32>, vector<16x32xf32>, vector<16x16xf32> -> vector<16x16xf32>
    %cst_282 = arith.constant 0.353553385 : f32
    %823 = vector.broadcast %cst_282 : f32 to vector<16x16xf32>
    %824 = arith.mulf %822, %823 : vector<16x16xf32>
    %825 = arith.addf %824, %348 : vector<16x16xf32>
    %cst_283 = arith.constant dense<0xFF800000> : vector<16xf32>
    %826 = vector.multi_reduction <maximumf>, %825, %cst_283 [1] : vector<16x16xf32> to vector<16xf32>
    %827 = vector.shape_cast %826 : vector<16xf32> to vector<16x1xf32>
    %828 = vector.broadcast %827 : vector<16x1xf32> to vector<16x16xf32>
    %829 = arith.subf %825, %828 : vector<16x16xf32>
    %830 = math.exp %829 : vector<16x16xf32>
    %cst_284 = arith.constant dense<0.000000e+00> : vector<16xf32>
    %831 = vector.multi_reduction <add>, %830, %cst_284 [1] : vector<16x16xf32> to vector<16xf32>
    %832 = vector.shape_cast %831 : vector<16xf32> to vector<16x1xf32>
    %833 = tpu.reciprocal %832 {approx = true} : vector<16x1xf32> -> vector<16x1xf32>
    %834 = vector.broadcast %833 : vector<16x1xf32> to vector<16x16xf32>
    %835 = arith.mulf %830, %834 : vector<16x16xf32>
    %836 = vector.broadcast %4 : vector<1x32xf32> to vector<16x32xf32>
    %837 = arith.mulf %778, %836 : vector<16x32xf32>
    %cst_285 = arith.constant dense<0.000000e+00> : vector<16x32xf32>
    %838 = tpu.matmul %835, %837, %cst_285 {dimension_numbers = #tpu.dot_dimension_numbers<[1], [0], [0], [1], [0, 0, 1, 1], [], []>} : vector<16x16xf32>, vector<16x32xf32>, vector<16x32xf32> -> vector<16x32xf32>
    %839 = arith.addf %819, %838 : vector<16x32xf32>
    %840 = vector.broadcast %5 : vector<1x32xf32> to vector<16x32xf32>
    %841 = arith.mulf %768, %840 : vector<16x32xf32>
    %cst_286 = arith.constant dense<0.000000e+00> : vector<16x16xf32>
    %842 = tpu.matmul %841, %773, %cst_286 {dimension_numbers = #tpu.dot_dimension_numbers<[1], [1], [0], [0], [0, 0, 1, 0], [], []>} : vector<16x32xf32>, vector<16x32xf32>, vector<16x16xf32> -> vector<16x16xf32>
    %cst_287 = arith.constant 0.353553385 : f32
    %843 = vector.broadcast %cst_287 : f32 to vector<16x16xf32>
    %844 = arith.mulf %842, %843 : vector<16x16xf32>
    %845 = arith.addf %844, %348 : vector<16x16xf32>
    %cst_288 = arith.constant dense<0xFF800000> : vector<16xf32>
    %846 = vector.multi_reduction <maximumf>, %845, %cst_288 [1] : vector<16x16xf32> to vector<16xf32>
    %847 = vector.shape_cast %846 : vector<16xf32> to vector<16x1xf32>
    %848 = vector.broadcast %847 : vector<16x1xf32> to vector<16x16xf32>
    %849 = arith.subf %845, %848 : vector<16x16xf32>
    %850 = math.exp %849 : vector<16x16xf32>
    %cst_289 = arith.constant dense<0.000000e+00> : vector<16xf32>
    %851 = vector.multi_reduction <add>, %850, %cst_289 [1] : vector<16x16xf32> to vector<16xf32>
    %852 = vector.shape_cast %851 : vector<16xf32> to vector<16x1xf32>
    %853 = tpu.reciprocal %852 {approx = true} : vector<16x1xf32> -> vector<16x1xf32>
    %854 = vector.broadcast %853 : vector<16x1xf32> to vector<16x16xf32>
    %855 = arith.mulf %850, %854 : vector<16x16xf32>
    %856 = vector.broadcast %5 : vector<1x32xf32> to vector<16x32xf32>
    %857 = arith.mulf %778, %856 : vector<16x32xf32>
    %cst_290 = arith.constant dense<0.000000e+00> : vector<16x32xf32>
    %858 = tpu.matmul %855, %857, %cst_290 {dimension_numbers = #tpu.dot_dimension_numbers<[1], [0], [0], [1], [0, 0, 1, 1], [], []>} : vector<16x16xf32>, vector<16x32xf32>, vector<16x32xf32> -> vector<16x32xf32>
    %859 = arith.addf %839, %858 : vector<16x32xf32>
    %c1184 = arith.constant 1184 : index
    %c0_291 = arith.constant 0 : index
    %860 = vector.load %arg2[%c1184, %c0_291] : memref<1368x128xf32, #tpu.memory_space<vmem>>, vector<32x32xf32>
    %cst_292 = arith.constant dense<0.000000e+00> : vector<16x32xf32>
    %861 = tpu.matmul %859, %860, %cst_292 {dimension_numbers = #tpu.dot_dimension_numbers<[1], [0], [0], [1], [0, 0, 1, 1], [], []>} : vector<16x32xf32>, vector<32x32xf32>, vector<16x32xf32> -> vector<16x32xf32>
    %c1357 = arith.constant 1357 : index
    %c0_293 = arith.constant 0 : index
    %862 = vector.load %arg2[%c1357, %c0_293] : memref<1368x128xf32, #tpu.memory_space<vmem>>, vector<1x32xf32>
    %863 = vector.broadcast %862 : vector<1x32xf32> to vector<16x32xf32>
    %864 = arith.addf %861, %863 : vector<16x32xf32>
    %865 = arith.addf %763, %864 : vector<16x32xf32>
    %c1362 = arith.constant 1362 : index
    %c0_294 = arith.constant 0 : index
    %866 = vector.load %arg2[%c1362, %c0_294] : memref<1368x128xf32, #tpu.memory_space<vmem>>, vector<1x32xf32>
    %c1363 = arith.constant 1363 : index
    %c0_295 = arith.constant 0 : index
    %867 = vector.load %arg2[%c1363, %c0_295] : memref<1368x128xf32, #tpu.memory_space<vmem>>, vector<1x32xf32>
    %cst_296 = arith.constant dense<0.000000e+00> : vector<16xf32>
    %868 = vector.multi_reduction <add>, %865, %cst_296 [1] : vector<16x32xf32> to vector<16xf32>
    %869 = vector.shape_cast %868 : vector<16xf32> to vector<16x1xf32>
    %cst_297 = arith.constant 3.200000e+01 : f32
    %870 = vector.broadcast %cst_297 : f32 to vector<16x1xf32>
    %871 = arith.divf %869, %870 : vector<16x1xf32>
    %872 = vector.broadcast %871 : vector<16x1xf32> to vector<16x32xf32>
    %873 = arith.subf %865, %872 : vector<16x32xf32>
    %874 = arith.mulf %873, %873 : vector<16x32xf32>
    %cst_298 = arith.constant dense<0.000000e+00> : vector<16xf32>
    %875 = vector.multi_reduction <add>, %874, %cst_298 [1] : vector<16x32xf32> to vector<16xf32>
    %876 = vector.shape_cast %875 : vector<16xf32> to vector<16x1xf32>
    %cst_299 = arith.constant 3.200000e+01 : f32
    %877 = vector.broadcast %cst_299 : f32 to vector<16x1xf32>
    %878 = arith.divf %876, %877 : vector<16x1xf32>
    %879 = vector.broadcast %871 : vector<16x1xf32> to vector<16x32xf32>
    %880 = arith.subf %865, %879 : vector<16x32xf32>
    %cst_300 = arith.constant 9.99999974E-6 : f32
    %881 = vector.broadcast %cst_300 : f32 to vector<16x1xf32>
    %882 = arith.addf %878, %881 : vector<16x1xf32>
    %883 = math.rsqrt %882 : vector<16x1xf32>
    %884 = vector.broadcast %883 : vector<16x1xf32> to vector<16x32xf32>
    %885 = arith.mulf %880, %884 : vector<16x32xf32>
    %886 = vector.broadcast %866 : vector<1x32xf32> to vector<16x32xf32>
    %887 = arith.mulf %885, %886 : vector<16x32xf32>
    %888 = vector.broadcast %867 : vector<1x32xf32> to vector<16x32xf32>
    %889 = arith.addf %887, %888 : vector<16x32xf32>
    %c1216 = arith.constant 1216 : index
    %c0_301 = arith.constant 0 : index
    %890 = vector.load %arg2[%c1216, %c0_301] : memref<1368x128xf32, #tpu.memory_space<vmem>>, vector<32x64xf32>
    %cst_302 = arith.constant dense<0.000000e+00> : vector<16x64xf32>
    %891 = tpu.matmul %889, %890, %cst_302 {dimension_numbers = #tpu.dot_dimension_numbers<[1], [0], [0], [1], [0, 0, 1, 1], [], []>} : vector<16x32xf32>, vector<32x64xf32>, vector<16x64xf32> -> vector<16x64xf32>
    %c1358 = arith.constant 1358 : index
    %c0_303 = arith.constant 0 : index
    %892 = vector.load %arg2[%c1358, %c0_303] : memref<1368x128xf32, #tpu.memory_space<vmem>>, vector<1x64xf32>
    %893 = vector.broadcast %892 : vector<1x64xf32> to vector<16x64xf32>
    %894 = arith.addf %891, %893 : vector<16x64xf32>
    %cst_304 = arith.constant 0.000000e+00 : f32
    %895 = vector.broadcast %cst_304 : f32 to vector<16x64xf32>
    %896 = arith.maximumf %894, %895 : vector<16x64xf32>
    %c1248 = arith.constant 1248 : index
    %c0_305 = arith.constant 0 : index
    %897 = vector.load %arg2[%c1248, %c0_305] : memref<1368x128xf32, #tpu.memory_space<vmem>>, vector<64x32xf32>
    %cst_306 = arith.constant dense<0.000000e+00> : vector<16x32xf32>
    %898 = tpu.matmul %896, %897, %cst_306 {dimension_numbers = #tpu.dot_dimension_numbers<[1], [0], [0], [1], [0, 0, 1, 1], [], []>} : vector<16x64xf32>, vector<64x32xf32>, vector<16x32xf32> -> vector<16x32xf32>
    %c1359 = arith.constant 1359 : index
    %c0_307 = arith.constant 0 : index
    %899 = vector.load %arg2[%c1359, %c0_307] : memref<1368x128xf32, #tpu.memory_space<vmem>>, vector<1x32xf32>
    %900 = vector.broadcast %899 : vector<1x32xf32> to vector<16x32xf32>
    %901 = arith.addf %898, %900 : vector<16x32xf32>
    %902 = arith.addf %889, %901 : vector<16x32xf32>
    %c1364 = arith.constant 1364 : index
    %c0_308 = arith.constant 0 : index
    %903 = vector.load %arg2[%c1364, %c0_308] : memref<1368x128xf32, #tpu.memory_space<vmem>>, vector<1x32xf32>
    %c1365 = arith.constant 1365 : index
    %c0_309 = arith.constant 0 : index
    %904 = vector.load %arg2[%c1365, %c0_309] : memref<1368x128xf32, #tpu.memory_space<vmem>>, vector<1x32xf32>
    %cst_310 = arith.constant dense<0.000000e+00> : vector<16xf32>
    %905 = vector.multi_reduction <add>, %902, %cst_310 [1] : vector<16x32xf32> to vector<16xf32>
    %906 = vector.shape_cast %905 : vector<16xf32> to vector<16x1xf32>
    %cst_311 = arith.constant 3.200000e+01 : f32
    %907 = vector.broadcast %cst_311 : f32 to vector<16x1xf32>
    %908 = arith.divf %906, %907 : vector<16x1xf32>
    %909 = vector.broadcast %908 : vector<16x1xf32> to vector<16x32xf32>
    %910 = arith.subf %902, %909 : vector<16x32xf32>
    %911 = arith.mulf %910, %910 : vector<16x32xf32>
    %cst_312 = arith.constant dense<0.000000e+00> : vector<16xf32>
    %912 = vector.multi_reduction <add>, %911, %cst_312 [1] : vector<16x32xf32> to vector<16xf32>
    %913 = vector.shape_cast %912 : vector<16xf32> to vector<16x1xf32>
    %cst_313 = arith.constant 3.200000e+01 : f32
    %914 = vector.broadcast %cst_313 : f32 to vector<16x1xf32>
    %915 = arith.divf %913, %914 : vector<16x1xf32>
    %916 = vector.broadcast %908 : vector<16x1xf32> to vector<16x32xf32>
    %917 = arith.subf %902, %916 : vector<16x32xf32>
    %cst_314 = arith.constant 9.99999974E-6 : f32
    %918 = vector.broadcast %cst_314 : f32 to vector<16x1xf32>
    %919 = arith.addf %915, %918 : vector<16x1xf32>
    %920 = math.rsqrt %919 : vector<16x1xf32>
    %921 = vector.broadcast %920 : vector<16x1xf32> to vector<16x32xf32>
    %922 = arith.mulf %917, %921 : vector<16x32xf32>
    %923 = vector.broadcast %903 : vector<1x32xf32> to vector<16x32xf32>
    %924 = arith.mulf %922, %923 : vector<16x32xf32>
    %925 = vector.broadcast %904 : vector<1x32xf32> to vector<16x32xf32>
    %926 = arith.addf %924, %925 : vector<16x32xf32>
    %c128 = arith.constant 128 : index
    %c0_315 = arith.constant 0 : index
    %927 = vector.load %arg2[%c128, %c0_315] : memref<1368x128xf32, #tpu.memory_space<vmem>>, vector<32x128xf32>
    %cst_316 = arith.constant dense<0.000000e+00> : vector<16x128xf32>
    %928 = tpu.matmul %926, %927, %cst_316 {dimension_numbers = #tpu.dot_dimension_numbers<[1], [0], [0], [1], [0, 0, 1, 1], [], []>} : vector<16x32xf32>, vector<32x128xf32>, vector<16x128xf32> -> vector<16x128xf32>
    %c1313 = arith.constant 1313 : index
    %c0_317 = arith.constant 0 : index
    %929 = vector.load %arg2[%c1313, %c0_317] : memref<1368x128xf32, #tpu.memory_space<vmem>>, vector<1x128xf32>
    %930 = vector.broadcast %929 : vector<1x128xf32> to vector<16x128xf32>
    %931 = arith.addf %928, %930 : vector<16x128xf32>
    %c0_318 = arith.constant 0 : index
    %c0_319 = arith.constant 0 : index
    %932 = vector.load %arg3[%c0_318, %c0_319] : memref<16x128xf32, #tpu.memory_space<vmem>>, vector<16x128xf32>
    tpu.vector_store %arg3[%c0_318, %c0_319], %931 {strides = array<i32>} : memref<16x128xf32, #tpu.memory_space<vmem>>, vector<16x128xf32>,
    return
  }
}

</mosaic_0001>

<bundles_post_ra>
// kernel: squeeze.1
= control target key start
LH: loop header
LB: loop body
LE: loop exit
PB: predicated region body
PF: predicated region fallthrough
CT: control target
= control target key end

     0   :  { %s77_s0 = inlined_call_operand.vmem [shape: f32[16], index: 0, kind: input, shape index: {}]   ;;  %s78_s1 = inlined_call_operand.hbm [shape: f32[2,8], index: 1, kind: output, shape index: {}]  }
   0x1   :  { %v6_v0 = vld [vmem:[%s77_s0] sm:$0x1] }
   0x2   :  { %2 = vsyncpa [#allocation1], 0  ;;  %7 = vst [vmem:[#allocation3] sm:$0x1] %v6_v0  ;;  %vm9_vm0 = vcmask 64512   ;;  %s59_s0 = smov 120  }
   0x3   :  { %s60_s8 = smov [#allocation0]  }
   0x4   :  { %s29_s9 = sshll.u32 %s60_s8, 4  ;;  %s30_s9 = int_to_ptr.vmem [resolvable:$true] %s29_s9 }
   0x5   :  { %s37_s10 = scalar_lea.vmem %s30_s9, 32  ;;  %p42_p1 = scmp.lt.s32.totalorder %s30_s9, %s30_s9 }
   0x6   :  { %p38_p0 = scmp.ne.s32.totalorder %s30_s9, %s37_s10  ;;  %p43_p2 = scmp.lt.s32.totalorder %s37_s10, %s37_s10 }
   0x8   :  { %p44_p3 = por %p43_p2, %p42_p1 }
   0x9   :  { %v11_v1 = vld [vmem:[#allocation3] sm:$0x1]  }
   0xa   :  { %v8_v2 = vld [vmem:[#allocation3] sm:$0x1]   ;;  %12 = vrot.lane.b32.xlu0 %v11_v1, %s59_s0  ;;  %p45_p4 = pnand %p44_p3, %p38_p0 }
   0xb   :  { %10 = vst.msk [vmem:[#allocation2] sm:$0x1] %vm9_vm0, %v8_v2  }
  0x7c   :  { %v13_v3 = vpop.permute.xlu0 %12  }
  0x7d   :  { %16 = vst.msk [vmem:[#allocation2 + $0x1] sm:$0x1] %vm9_vm0, %v13_v3  }
  0x84   :  { %v21_v4 = vld [vmem:[#allocation2] sm:$0x3] }
  0x85   :  { %24 = vst [vmem:[#allocation0] sm:$0x3] %v21_v4 }
  0x86   :  { %48 = shalt.err (!%p45_p4)
}
  0x87   :  { %32 = dma.vmem_to_hbm [thread:$0]  %s30_s9, 32, %s78_s1, [#allocation1]  }
  0x88   :  { %57 = dma.done.wait [#allocation1], 32  }
  0x89   :  { %58 = vsyncadd [#allocation1], 4294967264 }
  0x8a   :  { %34 = vsyncpa [#allocation1], 1 }

// kernel: forward.1
= control target key start
LH: loop header
LB: loop body
LE: loop exit
PB: predicated region body
PF: predicated region fallthrough
CT: control target
= control target key end

     0   :  { %8 = vsyncpa [#allocation3], 0  ;;  %s10066_s12 = smov [#allocation2]   ;;  %s11100_s0 = inlined_call_operand.vmem [shape: f32[16,4], index: 0, kind: input, shape index: {}]   ;;  %s11101_s1 = inlined_call_operand.vmem [shape: f32[16,32], index: 1, kind: input, shape index: {}]   ;;  %s11102_s2 = inlined_call_operand.hbm [shape: f32[1368,128], index: 2, kind: input, shape index: {}]   ;;  %s11103_s3 = inlined_call_operand.vmem [shape: f32[16,128], index: 3, kind: output, shape index: {}]  }
   0x1   :  { %s18_s13 = sshll.u32 %s10066_s12, 4  ;;  %s19_s13 = int_to_ptr.vmem [resolvable:$true] %s18_s13 }
   0x2   :  { %s10052_s14 = scalar_lea.vmem %s19_s13, 21888  ;;  %p10057_p1 = scmp.lt.s32.totalorder %s19_s13, %s19_s13 }
   0x3   :  { %p10053_p0 = scmp.ne.s32.totalorder %s19_s13, %s10052_s14  ;;  %p10058_p2 = scmp.lt.s32.totalorder %s10052_s14, %s10052_s14 }
   0x5   :  { %p10059_p3 = por %p10058_p2, %p10057_p1 }
   0x7   :  { %p10060_p4 = pnand %p10059_p3, %p10053_p0 }
   0x9   :  { %10063 = shalt.err (!%p10060_p4)
}
   0xa   :  { %s10067_s15 = smov 128   ;;  %s10068_s16 = smov 8  }
   0xb   :  { %24 = dma.hbm_to_vmem [thread:$0]  %s11102_s2, 21888, %s19_s13, [#allocation3], %s10067_s15, %s10067_s15, %s10068_s16  }
   0xc   :  { %10064 = dma.done.wait [#allocation3], 21888  }
   0xd   :  { %10065 = vsyncadd [#allocation3], 4294945408  ;;  %vm38_vm0 = vcmask 130048   ;;  %v29_v0 = vld [vmem:[%s11100_s0 + $0x8] sm:$0xff]  ;;  %v28_v1 = vld [vmem:[%s11100_s0] sm:$0xff]  ;;  %vm137_vm1 = vcmask 1043456  }
   0xe   :  { %v36_v2 = vld [vmem:[#allocation2 + $0x20] sm:$0xff]  ;;  %9043 = vmatprep.subr.mxu0 %v29_v0  ;;  %v37_v3 = vld [vmem:[#allocation2 + $0x28] sm:$0xff]  ;;  %v124_v4 = vld [vmem:[#allocation2 + $0x78] sm:$0xf]  ;;  %vm130_vm2 = vcmask 31744   ;;  %vm229_vm3 = vcmask 261120  }
   0xf   :  { %9047 = vmatprep.mubr.msk.f32.mxu0 %vm38_vm0, %v36_v2  ;;  %9044 = vmatpush3.msra.mxu0 %v29_v0  ;;  %v223_v5 = vld [vmem:[#allocation2 + $0xb8] sm:$0xff]  ;;  %v222_v11 = vld [vmem:[#allocation2 + $0xb0] sm:$0xff]  ;;  %v221_v13 = vld [vmem:[#allocation2 + $0xa8] sm:$0xff]  ;;  %vm1511_vm4 = vcmask 523264  }
  0x10   :  { %9045 = vmatprep.subr.mxu0 %v28_v1  ;;  %9050 = vmatprep.subr.msk.mxu1 %vm137_vm1, %v124_v4  ;;  %v314_v10 = vld [vmem:[#allocation2 + $0xd8] sm:$0xff]  ;;  %v313_v12 = vld [vmem:[#allocation2 + $0xd0] sm:$0xff]  ;;  %v312_v14 = vld [vmem:[#allocation2 + $0xc8] sm:$0xff] }
  0x11   :  { %9046 = vmatpush3.msra.mxu0 %v28_v1  ;;  %9051 = vmatpush3.msk.msra.mxu1 %vm137_vm1, %v124_v4  ;;  %v220_v15 = vld [vmem:[#allocation2 + $0xa0] sm:$0xff]  ;;  %v398_v17 = vld [vmem:[#allocation2 + $0xf8] sm:$0xff]  ;;  %v217_v23 = vld [vmem:[#allocation2 + $0x8] sm:$0xff] }
  0x12   :  { %9048 = vmatmul.mubr.msk.f32.vlgmr.msra.gmra.mxu0 %vm38_vm0, %v37_v3  ;;  %9055 = vmatprep.subr.mxu1 %v223_v5  ;;  %v311_v16 = vld [vmem:[#allocation2 + $0xc0] sm:$0xff]  ;;  %v397_v27 = vld [vmem:[#allocation2 + $0xf0] sm:$0xff]  ;;  %v396_v28 = vld [vmem:[#allocation2 + $0xe8] sm:$0xff] }
  0x13   :  { %9066 = vmatprep.subr.mxu0 %v314_v10  ;;  %v8353_v18 = vld [vmem:[#allocation2 + $0x520] ss:$0 sm:$0xff]  ;;  %v8360_v30 = vld [vmem:[#allocation2 + $0x523] ss:$0 sm:$0xff]  ;;  %v8357_v36 = vld [vmem:[#allocation2 + $0x522] ss:$0 sm:$0xff] }
  0x14   :  { %9067 = vmatpush3.msra.mxu0 %v314_v10  ;;  %v216_v22 = vld [vmem:[#allocation2] sm:$0xff]  ;;  %v10128_v39 = vld [vmem:[#allocation2 + $0x70] ss:$0 sm:$0xff]  ;;  %v10130_v40 = vld [vmem:[#allocation2 + $0x71] ss:$0 sm:$0xff] }
  0x15   :  { %9068 = vmatprep.subr.mxu0 %v313_v12  ;;  %v395_v29 = vld [vmem:[#allocation2 + $0xe0] sm:$0xff]  ;;  %v10168_v55 = vld [vmem:[#allocation2 + $0x72] ss:$0 sm:$0xff] }
  0x16   :  { %9069 = vmatpush3.msra.mxu0 %v313_v12  ;;  %v8363_v42 = vld [vmem:[#allocation2 + $0x524] ss:$0 sm:$0xff] }
  0x17   :  { %9070 = vmatprep.subr.mxu0 %v312_v14  ;;  %v10177_v60 = vld [vmem:[#allocation2 + $0x40] sm:$0xff] }
  0x18   :  { %9071 = vmatpush3.msra.mxu0 %v312_v14 }
  0x19   :  { %9072 = vmatprep.subr.mxu0 %v311_v16 }
  0x1a   :  { %9073 = vmatpush3.msra.mxu0 %v311_v16 }
  0xd2   :  { %v9049_v6 = vpop.f32.mrf.mxu0 }
  0xd3   :  { %v121_v9 = vsub.f32 %v29_v0, %v9049_v6  ;;  %v10179_v0 = vld [vmem:[#allocation2 + $0x48] sm:$0xff] }
  0xd4   :  { %v111_v7 = vpop.f32.mrf.mxu0 }
  0xd5   :  { %v120_v8 = vsub.f32 %v28_v1, %v111_v7 }
  0xd7   :  { %9052 = vmatprep.mubr.msk.f32.mxu1 %vm130_vm2, %v120_v8 }
  0xd8   :  { %9053 = vmatmul.mubr.msk.f32.vlgmr.msra.gmra.mxu1 %vm130_vm2, %v121_v9 }
  0xd9   :  { %9056 = vmatpush3.msra.mxu1 %v223_v5 }
  0xda   :  { %9057 = vmatprep.subr.mxu1 %v222_v11 }
  0xdb   :  { %9058 = vmatpush3.msra.mxu1 %v222_v11 }
  0xdc   :  { %9059 = vmatprep.subr.mxu1 %v221_v13 }
  0xdd   :  { %9060 = vmatpush3.msra.mxu1 %v221_v13 }
  0xde   :  { %9061 = vmatprep.subr.mxu1 %v220_v15 }
  0xdf   :  { %9062 = vmatpush3.msra.mxu1 %v220_v15 }
  0xe0   :  { %9077 = vmatprep.subr.mxu1 %v398_v17 }
 0x198   :  { %v9054_v19 = vpop.f32.mrf.mxu1 }
 0x199   :  { %v213_v20 = vadd.f32 %v9054_v19, %v8353_v18 }
 0x19a   :  { %v207_v21 = vpop.f32.mrf.mxu1 }
 0x19b   :  { %v208_v24 = vadd.f32 %v8353_v18, %v207_v21  ;;  %v10102_v26 = vadd.f32 %v217_v23, %v213_v20 }
 0x19d   :  { %v10100_v25 = vadd.f32 %v216_v22, %v208_v24 }
 0x19f   :  { %9063 = vmatprep.mubr.msk.f32.mxu1 %vm229_vm3, %v10100_v25  ;;  %9074 = vmatprep.mubr.msk.f32.mxu0 %vm229_vm3, %v10100_v25 }
 0x1a0   :  { %9064 = vmatmul.mubr.msk.f32.vlgmr.msra.gmra.mxu1 %vm229_vm3, %v10102_v26  ;;  %9075 = vmatmul.mubr.msk.f32.vlgmr.msra.gmra.mxu0 %vm229_vm3, %v10102_v26 }
 0x1a1   :  { %9078 = vmatpush3.msra.mxu1 %v398_v17  ;;  %9085 = vmatprep.mubr.msk.f32.mxu1 %vm229_vm3, %v10100_v25 }
 0x1a2   :  { %9079 = vmatprep.subr.mxu1 %v397_v27 }
 0x1a3   :  { %9080 = vmatpush3.msra.mxu1 %v397_v27 }
 0x1a4   :  { %9081 = vmatprep.subr.mxu1 %v396_v28 }
 0x1a5   :  { %9082 = vmatpush3.msra.mxu1 %v396_v28 }
 0x1a6   :  { %9083 = vmatprep.subr.mxu1 %v395_v29 }
 0x1a7   :  { %9084 = vmatpush3.msra.mxu1 %v395_v29 }
 0x1a8   :  { %9086 = vmatmul.mubr.msk.f32.vlgmr.msra.gmra.mxu1 %vm229_vm3, %v10102_v26 }
 0x260   :  { %v9065_v31 = vpop.f32.mrf.mxu1  ;;  %v9076_v32 = vpop.f32.mrf.mxu0 }
 0x261   :  { %v10116_v33 = vadd.f32 %v9076_v32, %v8360_v30  ;;  %v10134_v41 = vadd.f32 %v9065_v31, %v8357_v36 }
 0x262   :  { %v302_v34 = vpop.f32.mrf.mxu1  ;;  %v386_v35 = vpop.f32.mrf.mxu0 }
 0x263   :  { %9088 = vmatprep.subr.msk.mxu0 %vm229_vm3, %v10116_v33  ;;  %v10120_v37 = vadd.f32 %v8357_v36, %v302_v34  ;;  %v10122_v38 = vadd.f32 %v8360_v30, %v386_v35  ;;  %9095 = vmatprep.subr.msk.mxu1 %vm229_vm3, %v10116_v33  ;;  %v484_v47 = vmul.f32 %v10128_v39, %v10134_v41  ;;  %v10200_v30 = vld [vmem:[#allocation2 + $0x73] ss:$0 sm:$0xff] }
 0x264   :  { %9089 = vmatpush3.xpose.msk.msra.mxu0 %vm229_vm3, %v10116_v33  ;;  %9096 = vmatpush3.xpose.msk.msra.mxu1 %vm229_vm3, %v10116_v33  ;;  %v605_v48 = vmul.f32 %v10130_v40, %v10134_v41  ;;  %v882_v32 = vmul.f32 %v10168_v55, %v10134_v41 }
 0x265   :  { %9090 = vmatprep.subr.msk.mxu0 %vm229_vm3, %v10122_v38  ;;  %9097 = vmatprep.subr.msk.mxu1 %vm229_vm3, %v10122_v38  ;;  %v483_v43 = vmul.f32 %v10128_v39, %v10120_v37  ;;  %v604_v44 = vmul.f32 %v10130_v40, %v10120_v37  ;;  %v881_v29 = vmul.f32 %v10168_v55, %v10120_v37 }
 0x267   :  { %9092 = vmatprep.mubr.msk.f32.mxu0 %vm229_vm3, %v483_v43  ;;  %9099 = vmatprep.mubr.msk.f32.mxu1 %vm229_vm3, %v604_v44 }
 0x268   :  { %v9087_v45 = vpop.f32.mrf.mxu1  ;;  %9091 = vmatpush3.xpose.msk.msra.mxu0 %vm229_vm3, %v10122_v38  ;;  %9098 = vmatpush3.xpose.msk.msra.mxu1 %vm229_vm3, %v10122_v38 }
 0x269   :  { %v10146_v46 = vadd.f32 %v9087_v45, %v8363_v42 }
 0x26a   :  { %v470_v49 = vpop.f32.mrf.mxu1 }
 0x26b   :  { %v10156_v50 = vadd.f32 %v8363_v42, %v470_v49  ;;  %v714_v51 = vmul.f32 %v10130_v40, %v10146_v46  ;;  %v599_v52 = vmul.f32 %v10128_v39, %v10146_v46  ;;  %9093 = vmatmul.mubr.msk.f32.vlgmr.msra.gmra.mxu0 %vm229_vm3, %v484_v47  ;;  %9100 = vmatmul.mubr.msk.f32.vlgmr.msra.gmra.mxu1 %vm229_vm3, %v605_v48 }
 0x26c   :  { %v10172_v56 = vmul.f32 %v10168_v55, %v10146_v46  ;;  %v1189_v31 = vmul.f32 %v10200_v30, %v10146_v46 }
 0x26d   :  { %9102 = vmatprep.subr.mxu1 %v714_v51  ;;  %9109 = vmatprep.subr.mxu0 %v599_v52  ;;  %v713_v53 = vmul.f32 %v10130_v40, %v10156_v50  ;;  %v598_v54 = vmul.f32 %v10128_v39, %v10156_v50  ;;  %v1188_v34 = vmul.f32 %v10200_v30, %v10156_v50 }
 0x26e   :  { %9103 = vmatpush3.msra.mxu1 %v714_v51  ;;  %9110 = vmatpush3.msra.mxu0 %v599_v52 }
 0x26f   :  { %9104 = vmatprep.subr.mxu1 %v713_v53  ;;  %9111 = vmatprep.subr.mxu0 %v598_v54 }
 0x270   :  { %9105 = vmatpush3.msra.mxu1 %v713_v53  ;;  %9112 = vmatpush3.msra.mxu0 %v598_v54 }
 0x271   :  { %9116 = vmatprep.subr.msk.mxu1 %vm229_vm3, %v10116_v33  ;;  %9123 = vmatprep.subr.mxu0 %v10172_v56 }
 0x32b   :  { %v9094_v57 = vpop.f32.mrf.mxu0  ;;  %v9101_v58 = vpop.f32.mrf.mxu1 }
 0x32c   :  { %v688_v61 = vmul.f32 0.35355338, %v9101_v58  ;;  %v573_v15 = vmul.f32 0.35355338, %v9094_v57 }
 0x32d   :  { %v678_v59 = vpop.f32.mrf.mxu1  ;;  %v563_v63 = vpop.f32.mrf.mxu0 }
 0x32e   :  { %v687_v62 = vmul.f32 0.35355338, %v678_v59  ;;  %v572_v2 = vmul.f32 0.35355338, %v563_v63  ;;  %v690_v4 = vadd.f32 %v688_v61, %v10179_v0  ;;  %v575_v19 = vadd.f32 %v573_v15, %v10179_v0 }
 0x330   :  { %v689_v1 = vadd.f32 %v687_v62, %v10177_v60  ;;  %v694_v5 = vsel %vm38_vm0, %v690_v4, -inf  ;;  %v574_v6 = vadd.f32 %v572_v2, %v10177_v60  ;;  %v579_v20 = vsel %vm38_vm0, %v575_v19, -inf }
 0x332   :  { %v691_v3 = vsel %vm38_vm0, %v689_v1, -inf  ;;  %v576_v7 = vsel %vm38_vm0, %v574_v6, -inf }
 0x333   :  { %692 = vmax.xlane.f32.xlu0 %v691_v3 }
 0x337   :  { %695 = vmax.xlane.f32.xlu0 %v694_v5 }
 0x33b   :  { %577 = vmax.xlane.f32.xlu0 %v576_v7 }
 0x3bc   :  { %v693_v8 = vpop.xlane.xlu0 %692 }
 0x3bd   :  { %v697_v9 = vsub.f32 %v689_v1, %v693_v8 }
 0x3bf   :  { %v699_v10 = vmul.f32 1.442695, %v697_v9 }
 0x3c0   :  { %v696_v11 = vpop.xlane.xlu0 %695 }
 0x3c1   :  { %9796 = vpow2.f32 %v699_v10  ;;  %v698_v12 = vsub.f32 %v690_v4, %v696_v11 }
 0x3c3   :  { %v701_v13 = vmul.f32 1.442695, %v698_v12 }
 0x3c4   :  { %v578_v36 = vpop.xlane.xlu0 %577 }
 0x3c5   :  { %9798 = vpow2.f32 %v701_v13  ;;  %v582_v43 = vsub.f32 %v574_v6, %v578_v36 }
 0x3c7   :  { %v584_v45 = vmul.f32 1.442695, %v582_v43 }
 0x3ce   :  { %v9797_v14 = vpop.eup %9796 }
 0x3cf   :  { %v703_v16 = vsel %vm38_vm0, %v9797_v14, 0.0 }
 0x3d0   :  { %704 = vadd.xlane.f32.xlu1 %v703_v16 }
 0x3d2   :  { %v9799_v17 = vpop.eup %9798 }
 0x3d3   :  { %v706_v18 = vsel %vm38_vm0, %v9799_v17, 0.0 }
 0x3d4   :  { %707 = vadd.xlane.f32.xlu1 %v706_v18 }
 0x3d8   :  { %580 = vmax.xlane.f32.xlu1 %v579_v20 }
 0x459   :  { %v705_v21 = vpop.xlane.xlu1 %704 }
 0x45a   :  { %9800 = vrcp.f32 %v705_v21 }
 0x45d   :  { %v708_v22 = vpop.xlane.xlu1 %707 }
 0x45e   :  { %9802 = vrcp.f32 %v708_v22 }
 0x461   :  { %v581_v35 = vpop.xlane.xlu1 %580 }
 0x462   :  { %v583_v42 = vsub.f32 %v575_v19, %v581_v35 }
 0x464   :  { %v586_v44 = vmul.f32 1.442695, %v583_v42 }
 0x466   :  { %9804 = vpow2.f32 %v586_v44 }
 0x467   :  { %v9801_v23 = vpop.eup %9800  ;;  %9806 = vpow2.f32 %v584_v45 }
 0x468   :  { %v711_v24 = vmul.f32 %v9801_v23, %v9797_v14 }
 0x46a   :  { %9106 = vmatprep.mubr.msk.f32.mxu1 %vm38_vm0, %v711_v24 }
 0x46b   :  { %v9803_v27 = vpop.eup %9802 }
 0x46c   :  { %v712_v28 = vmul.f32 %v9803_v27, %v9799_v17  ;;  %v990_v17 = vmul.f32 %v10168_v55, %v10156_v50  ;;  %v1079_v50 = vmul.f32 %v10200_v30, %v10120_v37 }
 0x46e   :  { %9107 = vmatmul.mubr.msk.f32.vlgmr.msra.gmra.mxu1 %vm38_vm0, %v712_v28 }
 0x46f   :  { %9117 = vmatpush3.xpose.msk.msra.mxu1 %vm229_vm3, %v10116_v33  ;;  %9120 = vmatprep.mubr.msk.f32.mxu1 %vm229_vm3, %v881_v29 }
 0x470   :  { %9118 = vmatprep.subr.msk.mxu1 %vm229_vm3, %v10122_v38 }
 0x473   :  { %9119 = vmatpush3.xpose.msk.msra.mxu1 %vm229_vm3, %v10122_v38  ;;  %v9805_v58 = vpop.eup %9804 }
 0x474   :  { %9137 = vmatprep.subr.mxu1 %v1189_v31  ;;  %v9807_v61 = vpop.eup %9806  ;;  %v591_v62 = vsel %vm38_vm0, %v9805_v58, 0.0 }
 0x475   :  { %v588_v63 = vsel %vm38_vm0, %v9807_v61, 0.0 }
 0x476   :  { %9121 = vmatmul.mubr.msk.f32.vlgmr.msra.gmra.mxu1 %vm229_vm3, %v882_v32 }
 0x477   :  { %9138 = vmatpush3.msra.mxu1 %v1189_v31 }
 0x478   :  { %9139 = vmatprep.subr.mxu1 %v1188_v34 }
 0x479   :  { %9140 = vmatpush3.msra.mxu1 %v1188_v34 }
 0x52e   :  { %v10211_v46 = vpop.f32.mrf.mxu1 }
 0x530   :  { %v10213_v47 = vpop.f32.mrf.mxu1 }
 0x536   :  { %v9122_v48 = vpop.f32.mrf.mxu1 }
 0x537   :  { %v965_v49 = vmul.f32 0.35355338, %v9122_v48 }
 0x538   :  { %v955_v51 = vpop.f32.mrf.mxu1 }
 0x539   :  { %v964_v52 = vmul.f32 0.35355338, %v955_v51  ;;  %v967_v53 = vadd.f32 %v965_v49, %v10179_v0 }
 0x53b   :  { %v971_v54 = vsel %vm38_vm0, %v967_v53, -inf  ;;  %v966_v57 = vadd.f32 %v964_v52, %v10177_v60 }
 0x53c   :  { %972 = vmax.xlane.f32.xlu1 %v971_v54 }
 0x53d   :  { %v968_v59 = vsel %vm38_vm0, %v966_v57, -inf }
 0x53e   :  { %969 = vmax.xlane.f32.xlu0 %v968_v59 }
 0x540   :  { %592 = vadd.xlane.f32.xlu1 %v591_v62 }
 0x542   :  { %589 = vadd.xlane.f32.xlu0 %v588_v63 }
 0x5c5   :  { %v973_v1 = vpop.xlane.xlu1 %972 }
 0x5c6   :  { %v975_v2 = vsub.f32 %v967_v53, %v973_v1 }
 0x5c7   :  { %v970_v3 = vpop.xlane.xlu0 %969 }
 0x5c8   :  { %v978_v4 = vmul.f32 1.442695, %v975_v2  ;;  %v974_v5 = vsub.f32 %v966_v57, %v970_v3  ;;  %v1276_v57 = vld [vmem:[#allocation2 + $0x118] sm:$0xff]  ;;  %v1275_v2 = vld [vmem:[#allocation2 + $0x110] sm:$0xff]  ;;  %v1274_v3 = vld [vmem:[#allocation2 + $0x108] sm:$0xff] }
 0x5c9   :  { %v593_v6 = vpop.xlane.xlu1 %592  ;;  %9144 = vmatprep.subr.mxu1 %v1276_v57 }
 0x5ca   :  { %9808 = vpow2.f32 %v978_v4  ;;  %v976_v7 = vmul.f32 1.442695, %v974_v5  ;;  %v1273_v4 = vld [vmem:[#allocation2 + $0x100] sm:$0xff] }
 0x5cb   :  { %9810 = vrcp.f32 %v593_v6  ;;  %v590_v8 = vpop.xlane.xlu0 %589 }
 0x5cc   :  { %9812 = vpow2.f32 %v976_v7 }
 0x5cd   :  { %9814 = vrcp.f32 %v590_v8 }
 0x5d7   :  { %v9809_v9 = vpop.eup %9808 }
 0x5d8   :  { %v9811_v10 = vpop.eup %9810  ;;  %v983_v11 = vsel %vm38_vm0, %v9809_v9, 0.0 }
 0x5d9   :  { %v9813_v12 = vpop.eup %9812  ;;  %984 = vadd.xlane.f32.xlu1 %v983_v11  ;;  %v597_v16 = vmul.f32 %v9811_v10, %v9805_v58  ;;  %v8394_v11 = vld [vmem:[#allocation2 + $0x525] ss:$0 sm:$0xff] }
 0x5da   :  { %v9815_v13 = vpop.eup %9814  ;;  %v980_v14 = vsel %vm38_vm0, %v9813_v12, 0.0 }
 0x5db   :  { %981 = vadd.xlane.f32.xlu0 %v980_v14  ;;  %v596_v15 = vmul.f32 %v9815_v13, %v9807_v61 }
 0x5dd   :  { %9113 = vmatprep.mubr.msk.f32.mxu0 %vm38_vm0, %v596_v15 }
 0x5de   :  { %9114 = vmatmul.mubr.msk.f32.vlgmr.msra.gmra.mxu0 %vm38_vm0, %v597_v16 }
 0x5df   :  { %9124 = vmatpush3.msra.mxu0 %v10172_v56  ;;  %v1080_v56 = vmul.f32 %v10200_v30, %v10134_v41 }
 0x5e0   :  { %9125 = vmatprep.subr.mxu0 %v990_v17 }
 0x5e1   :  { %9126 = vmatpush3.msra.mxu0 %v990_v17 }
 0x5e2   :  { %9130 = vmatprep.subr.msk.mxu0 %vm229_vm3, %v10116_v33 }
 0x662   :  { %v985_v18 = vpop.xlane.xlu1 %984 }
 0x663   :  { %9816 = vrcp.f32 %v985_v18 }
 0x664   :  { %v982_v19 = vpop.xlane.xlu0 %981 }
 0x665   :  { %9818 = vrcp.f32 %v982_v19 }
 0x670   :  { %v9817_v20 = vpop.eup %9816 }
 0x671   :  { %v989_v23 = vmul.f32 %v9817_v20, %v9809_v9 }
 0x672   :  { %v9819_v21 = vpop.eup %9818 }
 0x673   :  { %v988_v22 = vmul.f32 %v9819_v21, %v9813_v12 }
 0x675   :  { %9127 = vmatprep.mubr.msk.f32.mxu0 %vm38_vm0, %v988_v22 }
 0x676   :  { %9128 = vmatmul.mubr.msk.f32.vlgmr.msra.gmra.mxu0 %vm38_vm0, %v989_v23 }
 0x677   :  { %9131 = vmatpush3.xpose.msk.msra.mxu0 %vm229_vm3, %v10116_v33  ;;  %9134 = vmatprep.mubr.msk.f32.mxu0 %vm229_vm3, %v1079_v50 }
 0x678   :  { %9132 = vmatprep.subr.msk.mxu0 %vm229_vm3, %v10122_v38 }
 0x67b   :  { %9133 = vmatpush3.xpose.msk.msra.mxu0 %vm229_vm3, %v10122_v38 }
 0x67e   :  { %9135 = vmatmul.mubr.msk.f32.vlgmr.msra.gmra.mxu0 %vm229_vm3, %v1080_v56 }
 0x69e   :  { %v9115_v24 = vpop.f32.mrf.mxu0 }
 0x69f   :  { %v874_v27 = vadd.f32 %v9115_v24, %v10211_v46 }
 0x6a0   :  { %v868_v37 = vpop.f32.mrf.mxu0 }
 0x6a1   :  { %v869_v5 = vadd.f32 %v868_v37, %v10213_v47 }
 0x736   :  { %v9129_v28 = vpop.f32.mrf.mxu0 }
 0x737   :  { %v1074_v29 = vadd.f32 %v9129_v28, %v874_v27  ;;  %v1409_v27 = vld [vmem:[#allocation2 + $0x138] sm:$0xff]  ;;  %v1407_v28 = vld [vmem:[#allocation2 + $0x128] sm:$0xff] }
 0x738   :  { %v1064_v33 = vpop.f32.mrf.mxu0  ;;  %9155 = vmatprep.subr.mxu0 %v1409_v27 }
 0x739   :  { %v1073_v7 = vadd.f32 %v1064_v33, %v869_v5  ;;  %9156 = vmatpush3.msra.mxu0 %v1409_v27  ;;  %v1505_v33 = vld [vmem:[#allocation2 + $0x178] sm:$0xff]  ;;  %v1636_v27 = vld [vmem:[#allocation2 + $0x188] sm:$0xff] }
 0x73e   :  { %v9136_v31 = vpop.f32.mrf.mxu0 }
 0x73f   :  { %v1163_v32 = vmul.f32 0.35355338, %v9136_v31  ;;  %v1504_v31 = vld [vmem:[#allocation2 + $0x170] sm:$0xff] }
 0x740   :  { %v1153_v34 = vpop.f32.mrf.mxu0 }
 0x741   :  { %v1162_v35 = vmul.f32 0.35355338, %v1153_v34  ;;  %v1165_v36 = vadd.f32 %v1163_v32, %v10179_v0  ;;  %v1503_v32 = vld [vmem:[#allocation2 + $0x168] sm:$0xff]  ;;  %v1502_v34 = vld [vmem:[#allocation2 + $0x160] sm:$0xff] }
 0x743   :  { %v1169_v38 = vsel %vm38_vm0, %v1165_v36, -inf  ;;  %v1164_v42 = vadd.f32 %v1162_v35, %v10177_v60 }
 0x744   :  { %1170 = vmax.xlane.f32.xlu1 %v1169_v38 }
 0x745   :  { %v1166_v41 = vsel %vm38_vm0, %v1164_v42, -inf }
 0x746   :  { %1167 = vmax.xlane.f32.xlu0 %v1166_v41 }
 0x7cd   :  { %v1171_v43 = vpop.xlane.xlu1 %1170 }
 0x7ce   :  { %v1173_v44 = vsub.f32 %v1165_v36, %v1171_v43 }
 0x7cf   :  { %v1168_v45 = vpop.xlane.xlu0 %1167 }
 0x7d0   :  { %v1176_v46 = vmul.f32 1.442695, %v1173_v44  ;;  %v1172_v48 = vsub.f32 %v1164_v42, %v1168_v45  ;;  %v8397_v45 = vld [vmem:[#allocation2 + $0x528] ss:$0 sm:$0xff] }
 0x7d2   :  { %9820 = vpow2.f32 %v1176_v46  ;;  %v1174_v49 = vmul.f32 1.442695, %v1172_v48 }
 0x7d4   :  { %9822 = vpow2.f32 %v1174_v49 }
 0x7df   :  { %v9821_v51 = vpop.eup %9820 }
 0x7e0   :  { %v1181_v52 = vsel %vm38_vm0, %v9821_v51, 0.0 }
 0x7e1   :  { %v9823_v53 = vpop.eup %9822  ;;  %1182 = vadd.xlane.f32.xlu1 %v1181_v52  ;;  %v8398_v52 = vld [vmem:[#allocation2 + $0x529] ss:$0 sm:$0xff] }
 0x7e2   :  { %v1178_v54 = vsel %vm38_vm0, %v9823_v53, 0.0 }
 0x7e3   :  { %1179 = vadd.xlane.f32.xlu0 %v1178_v54 }
 0x86a   :  { %v1183_v58 = vpop.xlane.xlu1 %1182 }
 0x86b   :  { %9824 = vrcp.f32 %v1183_v58  ;;  %v1501_v58 = vld [vmem:[#allocation2 + $0x158] sm:$0xff] }
 0x86c   :  { %v1180_v59 = vpop.xlane.xlu0 %1179 }
 0x86d   :  { %9826 = vrcp.f32 %v1180_v59  ;;  %v1500_v59 = vld [vmem:[#allocation2 + $0x150] sm:$0xff] }
 0x878   :  { %v9825_v61 = vpop.eup %9824 }
 0x879   :  { %v1187_v1 = vmul.f32 %v9825_v61, %v9821_v51  ;;  %v1499_v61 = vld [vmem:[#allocation2 + $0x148] sm:$0xff] }
 0x87a   :  { %v9827_v62 = vpop.eup %9826 }
 0x87b   :  { %v1186_v63 = vmul.f32 %v9827_v62, %v9823_v53  ;;  %v1498_v62 = vld [vmem:[#allocation2 + $0x140] sm:$0xff] }
 0x87d   :  { %9141 = vmatprep.mubr.msk.f32.mxu1 %vm38_vm0, %v1186_v63  ;;  %v8399_v63 = vld [vmem:[#allocation2 + $0x526] ss:$0 sm:$0xff] }
 0x87e   :  { %9142 = vmatmul.mubr.msk.f32.vlgmr.msra.gmra.mxu1 %vm38_vm0, %v1187_v1 }
 0x87f   :  { %9145 = vmatpush3.msra.mxu1 %v1276_v57 }
 0x880   :  { %9146 = vmatprep.subr.mxu1 %v1275_v2 }
 0x881   :  { %9147 = vmatpush3.msra.mxu1 %v1275_v2 }
 0x882   :  { %9148 = vmatprep.subr.mxu1 %v1274_v3 }
 0x883   :  { %9149 = vmatpush3.msra.mxu1 %v1274_v3 }
 0x884   :  { %9150 = vmatprep.subr.mxu1 %v1273_v4 }
 0x885   :  { %9151 = vmatpush3.msra.mxu1 %v1273_v4 }
 0x886   :  { %9166 = vmatprep.subr.mxu1 %v1505_v33 }
 0x93e   :  { %v9143_v6 = vpop.f32.mrf.mxu1 }
 0x93f   :  { %v1272_v10 = vadd.f32 %v9143_v6, %v1074_v29  ;;  %v1406_v29 = vld [vmem:[#allocation2 + $0x120] sm:$0xff] }
 0x940   :  { %v1262_v8 = vpop.f32.mrf.mxu1 }
 0x941   :  { %v1271_v9 = vadd.f32 %v1262_v8, %v1073_v7  ;;  %v8402_v7 = vld [vmem:[#allocation2 + $0x527] ss:$0 sm:$0xff] }
 0x943   :  { %9152 = vmatprep.mubr.msk.f32.mxu1 %vm229_vm3, %v1271_v9 }
 0x944   :  { %9153 = vmatmul.mubr.msk.f32.vlgmr.msra.gmra.mxu1 %vm229_vm3, %v1272_v10 }
 0x945   :  { %9167 = vmatpush3.msra.mxu1 %v1505_v33  ;;  %v1728_v33 = vld [vmem:[#allocation2 + $0x1b8] sm:$0xff] }
 0x946   :  { %9168 = vmatprep.subr.mxu1 %v1504_v31 }
 0x947   :  { %9169 = vmatpush3.msra.mxu1 %v1504_v31 }
 0x948   :  { %9170 = vmatprep.subr.mxu1 %v1503_v32 }
 0x949   :  { %9171 = vmatpush3.msra.mxu1 %v1503_v32 }
 0x94a   :  { %9172 = vmatprep.subr.mxu1 %v1502_v34 }
 0x94b   :  { %9173 = vmatpush3.msra.mxu1 %v1502_v34 }
 0x94c   :  { %9174 = vmatprep.subr.mxu1 %v1501_v58 }
 0x94d   :  { %9175 = vmatpush3.msra.mxu1 %v1501_v58 }
 0x94e   :  { %9176 = vmatprep.subr.mxu1 %v1500_v59 }
 0x94f   :  { %9177 = vmatpush3.msra.mxu1 %v1500_v59 }
 0x950   :  { %9178 = vmatprep.subr.mxu1 %v1499_v61 }
 0x951   :  { %9179 = vmatpush3.msra.mxu1 %v1499_v61  ;;  %v8407_v61 = vld [vmem:[#allocation2 + $0x52c] ss:$0 sm:$0xff] }
 0x952   :  { %9180 = vmatprep.subr.mxu1 %v1498_v62 }
 0x953   :  { %9181 = vmatpush3.msra.mxu1 %v1498_v62 }
 0xa04   :  { %v9154_v12 = vpop.f32.mrf.mxu1 }
 0xa05   :  { %v1360_v13 = vadd.f32 %v9154_v12, %v8394_v11 }
 0xa06   :  { %v1354_v14 = vpop.f32.mrf.mxu1 }
 0xa07   :  { %v1355_v15 = vadd.f32 %v8394_v11, %v1354_v14  ;;  %v1364_v16 = vadd.f32 %v1360_v13, %v10102_v26 }
 0xa09   :  { %v1370_v17 = vsel %vm229_vm3, %v1364_v16, 0.0  ;;  %v1363_v47 = vadd.f32 %v1355_v15, %v10100_v25  ;;  %v1408_v25 = vld [vmem:[#allocation2 + $0x130] sm:$0xff] }
 0xa0a   :  { %1371 = vadd.xlane.f32.xlu1 %v1370_v17  ;;  %9157 = vmatprep.subr.mxu0 %v1408_v25 }
 0xa0b   :  { %v1367_v18 = vsel %vm229_vm3, %v1363_v47, 0.0  ;;  %9158 = vmatpush3.msra.mxu0 %v1408_v25  ;;  %v1810_v25 = vld [vmem:[#allocation2 + $0x1c8] sm:$0xff] }
 0xa0c   :  { %1368 = vadd.xlane.f32.xlu0 %v1367_v18  ;;  %9159 = vmatprep.subr.mxu0 %v1407_v28 }
 0xa0d   :  { %9160 = vmatpush3.msra.mxu0 %v1407_v28  ;;  %v1635_v28 = vld [vmem:[#allocation2 + $0x180] sm:$0xff] }
 0xa0e   :  { %9161 = vmatprep.subr.mxu0 %v1406_v29 }
 0xa0f   :  { %9162 = vmatpush3.msra.mxu0 %v1406_v29  ;;  %v1809_v29 = vld [vmem:[#allocation2 + $0x1c0] sm:$0xff] }
 0xa93   :  { %v1372_v19 = vpop.xlane.xlu1 %1371 }
 0xa94   :  { %v1375_v20 = vmul.f32 0.03125, %v1372_v19 }
 0xa95   :  { %v1369_v21 = vpop.xlane.xlu0 %1368 }
 0xa96   :  { %v1377_v22 = vsub.f32 %v1364_v16, %v1375_v20  ;;  %v1374_v23 = vmul.f32 0.03125, %v1369_v21 }
 0xa98   :  { %v1376_v50 = vsub.f32 %v1363_v47, %v1374_v23  ;;  %v1379_v56 = vmul.f32 %v1377_v22, %v1377_v22 }
 0xa9a   :  { %v1383_v24 = vsel %vm229_vm3, %v1379_v56, 0.0  ;;  %v1378_v37 = vmul.f32 %v1376_v50, %v1376_v50  ;;  %v1638_v56 = vld [vmem:[#allocation2 + $0x198] sm:$0xff] }
 0xa9b   :  { %1384 = vadd.xlane.f32.xlu1 %v1383_v24  ;;  %v1812_v24 = vld [vmem:[#allocation2 + $0x1d8] sm:$0xff]  ;;  %9185 = vmatprep.subr.mxu0 %v1638_v56 }
 0xa9c   :  { %v1380_v26 = vsel %vm229_vm3, %v1378_v37, 0.0  ;;  %v1637_v37 = vld [vmem:[#allocation2 + $0x190] sm:$0xff]  ;;  %9207 = vmatprep.subr.mxu1 %v1812_v24 }
 0xa9d   :  { %1381 = vadd.xlane.f32.xlu0 %v1380_v26  ;;  %v1811_v26 = vld [vmem:[#allocation2 + $0x1d0] sm:$0xff] }
 0xb24   :  { %v1385_v35 = vpop.xlane.xlu1 %1384 }
 0xb25   :  { %v1387_v36 = vmul.f32 0.03125, %v1385_v35 }
 0xb26   :  { %v1382_v38 = vpop.xlane.xlu0 %1381 }
 0xb27   :  { %v1389_v42 = vadd.f32 1e-05, %v1387_v36  ;;  %v1386_v41 = vmul.f32 0.03125, %v1382_v38 }
 0xb29   :  { %9828 = vrsqrt.f32 %v1389_v42  ;;  %v1388_v43 = vadd.f32 1e-05, %v1386_v41  ;;  %v8405_v41 = vld [vmem:[#allocation2 + $0x52a] ss:$0 sm:$0xff] }
 0xb2b   :  { %9830 = vrsqrt.f32 %v1388_v43 }
 0xb36   :  { %v9829_v44 = vpop.eup %9828 }
 0xb37   :  { %v1393_v46 = vmul.f32 %v9829_v44, %v1377_v22 }
 0xb38   :  { %v9831_v48 = vpop.eup %9830 }
 0xb39   :  { %v1392_v49 = vmul.f32 %v9831_v48, %v1376_v50  ;;  %v1399_v51 = vmul.f32 %v8397_v45, %v1393_v46  ;;  %v8406_v48 = vld [vmem:[#allocation2 + $0x52b] ss:$0 sm:$0xff] }
 0xb3b   :  { %v1398_v53 = vmul.f32 %v8397_v45, %v1392_v49  ;;  %v1405_v57 = vadd.f32 %v8398_v52, %v1399_v51 }
 0xb3d   :  { %v1404_v54 = vadd.f32 %v8398_v52, %v1398_v53  ;;  %v1727_v53 = vld [vmem:[#allocation2 + $0x1b0] sm:$0xff] }
 0xb3f   :  { %9163 = vmatprep.mubr.msk.f32.mxu0 %vm229_vm3, %v1404_v54 }
 0xb40   :  { %9164 = vmatmul.mubr.msk.f32.vlgmr.msra.gmra.mxu0 %vm229_vm3, %v1405_v57 }
 0xb41   :  { %9186 = vmatpush3.msra.mxu0 %v1638_v56 }
 0xb42   :  { %9187 = vmatprep.subr.mxu0 %v1637_v37 }
 0xb43   :  { %9188 = vmatpush3.msra.mxu0 %v1637_v37 }
 0xb44   :  { %9189 = vmatprep.subr.mxu0 %v1636_v27 }
 0xb45   :  { %9190 = vmatpush3.msra.mxu0 %v1636_v27 }
 0xb46   :  { %9191 = vmatprep.subr.mxu0 %v1635_v28 }
 0xb47   :  { %9192 = vmatpush3.msra.mxu0 %v1635_v28 }
 0xb48   :  { %9196 = vmatprep.subr.mxu0 %v1728_v33 }
 0xc00   :  { %v9165_v1 = vpop.f32.mrf.mxu0 }
 0xc01   :  { %v1493_v2 = vadd.f32 %v9165_v1, %v8399_v63 }
 0xc02   :  { %v1487_v3 = vpop.f32.mrf.mxu0 }
 0xc03   :  { %v1488_v4 = vadd.f32 %v8399_v63, %v1487_v3  ;;  %v1497_v6 = vmax.f32 %v1493_v2, 0.0  ;;  %v8410_v63 = vld [vmem:[#allocation2 + $0x52d] ss:$0 sm:$0xff] }
 0xc05   :  { %v1496_v5 = vmax.f32 %v1488_v4, 0.0  ;;  %v8413_v4 = vld [vmem:[#allocation2 + $0x52e] ss:$0 sm:$0xff] }
 0xc07   :  { %9182 = vmatprep.mubr.msk.f32.mxu1 %vm1511_vm4, %v1496_v5 }
 0xc08   :  { %9183 = vmatmul.mubr.msk.f32.vlgmr.msra.gmra.mxu1 %vm1511_vm4, %v1497_v6 }
 0xc09   :  { %9208 = vmatpush3.msra.mxu1 %v1812_v24 }
 0xc0a   :  { %9209 = vmatprep.subr.mxu1 %v1811_v26 }
 0xc0b   :  { %9210 = vmatpush3.msra.mxu1 %v1811_v26 }
 0xc0c   :  { %9211 = vmatprep.subr.mxu1 %v1810_v25 }
 0xc0d   :  { %9212 = vmatpush3.msra.mxu1 %v1810_v25 }
 0xc0e   :  { %9213 = vmatprep.subr.mxu1 %v1809_v29 }
 0xc0f   :  { %9214 = vmatpush3.msra.mxu1 %v1809_v29 }
 0xcc8   :  { %v9184_v8 = vpop.f32.mrf.mxu1 }
 0xcc9   :  { %v1590_v9 = vadd.f32 %v9184_v8, %v8402_v7 }
 0xcca   :  { %v1584_v10 = vpop.f32.mrf.mxu1 }
 0xccb   :  { %v1585_v11 = vadd.f32 %v8402_v7, %v1584_v10  ;;  %v1594_v12 = vadd.f32 %v1590_v9, %v1405_v57  ;;  %v1725_v57 = vld [vmem:[#allocation2 + $0x1a0] sm:$0xff] }
 0xccd   :  { %v1600_v13 = vsel %vm229_vm3, %v1594_v12, 0.0  ;;  %v1593_v14 = vadd.f32 %v1585_v11, %v1404_v54  ;;  %v1726_v54 = vld [vmem:[#allocation2 + $0x1a8] sm:$0xff] }
 0xcce   :  { %1601 = vadd.xlane.f32.xlu1 %v1600_v13 }
 0xccf   :  { %v1597_v15 = vsel %vm229_vm3, %v1593_v14, 0.0 }
 0xcd0   :  { %1598 = vadd.xlane.f32.xlu0 %v1597_v15 }
 0xd57   :  { %v1602_v16 = vpop.xlane.xlu1 %1601 }
 0xd58   :  { %v1604_v17 = vmul.f32 0.03125, %v1602_v16 }
 0xd59   :  { %v1599_v47 = vpop.xlane.xlu0 %1598 }
 0xd5a   :  { %v1606_v18 = vsub.f32 %v1594_v12, %v1604_v17  ;;  %v1603_v19 = vmul.f32 0.03125, %v1599_v47 }
 0xd5c   :  { %v1605_v20 = vsub.f32 %v1593_v14, %v1603_v19  ;;  %v1608_v21 = vmul.f32 %v1606_v18, %v1606_v18 }
 0xd5e   :  { %v1612_v22 = vsel %vm229_vm3, %v1608_v21, 0.0  ;;  %v1607_v23 = vmul.f32 %v1605_v20, %v1605_v20 }
 0xd5f   :  { %1613 = vadd.xlane.f32.xlu1 %v1612_v22 }
 0xd60   :  { %v1609_v50 = vsel %vm229_vm3, %v1607_v23, 0.0 }
 0xd61   :  { %1610 = vadd.xlane.f32.xlu0 %v1609_v50 }
 0xde8   :  { %v1614_v31 = vpop.xlane.xlu1 %1613 }
 0xde9   :  { %v1616_v32 = vmul.f32 0.03125, %v1614_v31 }
 0xdea   :  { %v1611_v34 = vpop.xlane.xlu0 %1610 }
 0xdeb   :  { %v1618_v35 = vadd.f32 1e-05, %v1616_v32  ;;  %v1615_v36 = vmul.f32 0.03125, %v1611_v34 }
 0xded   :  { %9832 = vrsqrt.f32 %v1618_v35  ;;  %v1617_v38 = vadd.f32 1e-05, %v1615_v36 }
 0xdef   :  { %9834 = vrsqrt.f32 %v1617_v38 }
 0xdfa   :  { %v9833_v42 = vpop.eup %9832 }
 0xdfb   :  { %v1622_v43 = vmul.f32 %v9833_v42, %v1606_v18 }
 0xdfc   :  { %v9835_v44 = vpop.eup %9834 }
 0xdfd   :  { %v1621_v45 = vmul.f32 %v9835_v44, %v1605_v20  ;;  %v1628_v46 = vmul.f32 %v8405_v41, %v1622_v43 }
 0xdff   :  { %v1627_v49 = vmul.f32 %v8405_v41, %v1621_v45  ;;  %v10272_v52 = vadd.f32 %v8406_v48, %v1628_v46 }
 0xe01   :  { %v10270_v51 = vadd.f32 %v8406_v48, %v1627_v49 }
 0xe03   :  { %9193 = vmatprep.mubr.msk.f32.mxu0 %vm229_vm3, %v10270_v51  ;;  %9215 = vmatprep.mubr.msk.f32.mxu1 %vm229_vm3, %v10270_v51 }
 0xe04   :  { %9194 = vmatmul.mubr.msk.f32.vlgmr.msra.gmra.mxu0 %vm229_vm3, %v10272_v52  ;;  %9216 = vmatmul.mubr.msk.f32.vlgmr.msra.gmra.mxu1 %vm229_vm3, %v10272_v52 }
 0xe05   :  { %9197 = vmatpush3.msra.mxu0 %v1728_v33  ;;  %9204 = vmatprep.mubr.msk.f32.mxu0 %vm229_vm3, %v10270_v51 }
 0xe06   :  { %9198 = vmatprep.subr.mxu0 %v1727_v53 }
 0xe07   :  { %9199 = vmatpush3.msra.mxu0 %v1727_v53 }
 0xe08   :  { %9200 = vmatprep.subr.mxu0 %v1726_v54 }
 0xe09   :  { %9201 = vmatpush3.msra.mxu0 %v1726_v54 }
 0xe0a   :  { %9202 = vmatprep.subr.mxu0 %v1725_v57 }
 0xe0b   :  { %9203 = vmatpush3.msra.mxu0 %v1725_v57 }
 0xe0c   :  { %9205 = vmatmul.mubr.msk.f32.vlgmr.msra.gmra.mxu0 %vm229_vm3, %v10272_v52 }
 0xec4   :  { %v9195_v58 = vpop.f32.mrf.mxu0  ;;  %v9217_v3 = vpop.f32.mrf.mxu1 }
 0xec5   :  { %v10296_v8 = vadd.f32 %v9217_v3, %v8413_v4  ;;  %v10308_v11 = vadd.f32 %v9195_v58, %v8407_v61 }
 0xec6   :  { %v1716_v59 = vpop.f32.mrf.mxu0  ;;  %v1884_v10 = vpop.f32.mrf.mxu1 }
 0xec7   :  { %v10286_v62 = vadd.f32 %v8407_v61, %v1716_v59  ;;  %v10314_v12 = vadd.f32 %v8413_v4, %v1884_v10  ;;  %v2120_v13 = vmul.f32 %v10130_v40, %v10296_v8  ;;  %v1894_v14 = vmul.f32 %v10128_v39, %v10308_v11 }
 0xec8   :  { %v2011_v15 = vmul.f32 %v10130_v40, %v10308_v11  ;;  %v10339_v47 = vmul.f32 %v10128_v39, %v10296_v8  ;;  %v2284_v18 = vmul.f32 %v10168_v55, %v10308_v11 }
 0xec9   :  { %v1893_v1 = vmul.f32 %v10128_v39, %v10286_v62  ;;  %v2010_v2 = vmul.f32 %v10130_v40, %v10286_v62  ;;  %v2283_v16 = vmul.f32 %v10168_v55, %v10286_v62  ;;  %v2119_v17 = vmul.f32 %v10130_v40, %v10314_v12 }
 0xeca   :  { %v2587_v40 = vmul.f32 %v10200_v30, %v10296_v8  ;;  %v2586_v39 = vmul.f32 %v10200_v30, %v10314_v12 }
 0xecb   :  { %9222 = vmatprep.mubr.msk.f32.mxu0 %vm229_vm3, %v1893_v1  ;;  %9229 = vmatprep.mubr.msk.f32.mxu1 %vm229_vm3, %v2010_v2 }
 0xecc   :  { %v9206_v5 = vpop.f32.mrf.mxu0 }
 0xecd   :  { %v10294_v6 = vadd.f32 %v9206_v5, %v8410_v63 }
 0xece   :  { %v1800_v7 = vpop.f32.mrf.mxu0 }
 0xecf   :  { %v10298_v9 = vadd.f32 %v8410_v63, %v1800_v7  ;;  %9218 = vmatprep.subr.msk.mxu0 %vm229_vm3, %v10294_v6  ;;  %9225 = vmatprep.subr.msk.mxu1 %vm229_vm3, %v10294_v6 }
 0xed0   :  { %9219 = vmatpush3.xpose.msk.msra.mxu0 %vm229_vm3, %v10294_v6  ;;  %9226 = vmatpush3.xpose.msk.msra.mxu1 %vm229_vm3, %v10294_v6 }
 0xed1   :  { %9220 = vmatprep.subr.msk.mxu0 %vm229_vm3, %v10298_v9  ;;  %9227 = vmatprep.subr.msk.mxu1 %vm229_vm3, %v10298_v9 }
 0xed4   :  { %9221 = vmatpush3.xpose.msk.msra.mxu0 %vm229_vm3, %v10298_v9  ;;  %9228 = vmatpush3.xpose.msk.msra.mxu1 %vm229_vm3, %v10298_v9 }
 0xed5   :  { %9232 = vmatprep.subr.mxu0 %v2120_v13  ;;  %9246 = vmatprep.subr.msk.mxu1 %vm229_vm3, %v10294_v6 }
 0xed7   :  { %9223 = vmatmul.mubr.msk.f32.vlgmr.msra.gmra.mxu0 %vm229_vm3, %v1894_v14  ;;  %9230 = vmatmul.mubr.msk.f32.vlgmr.msra.gmra.mxu1 %vm229_vm3, %v2011_v15 }
 0xed8   :  { %9233 = vmatpush3.msra.mxu0 %v2120_v13  ;;  %9247 = vmatpush3.xpose.msk.msra.mxu1 %vm229_vm3, %v10294_v6 }
 0xed9   :  { %9250 = vmatprep.mubr.msk.f32.mxu1 %vm229_vm3, %v2283_v16  ;;  %9234 = vmatprep.subr.mxu0 %v2119_v17 }
 0xeda   :  { %9248 = vmatprep.subr.msk.mxu1 %vm229_vm3, %v10298_v9  ;;  %9235 = vmatpush3.msra.mxu0 %v2119_v17 }
 0xedb   :  { %9239 = vmatprep.subr.mxu0 %v10339_v47 }
 0xedc   :  { %9249 = vmatpush3.xpose.msk.msra.mxu1 %vm229_vm3, %v10298_v9 }
 0xedd   :  { %9267 = vmatprep.subr.mxu1 %v2587_v40 }
 0xedf   :  { %9251 = vmatmul.mubr.msk.f32.vlgmr.msra.gmra.mxu1 %vm229_vm3, %v2284_v18 }
 0xee0   :  { %9268 = vmatpush3.msra.mxu1 %v2587_v40 }
 0xee1   :  { %9269 = vmatprep.subr.mxu1 %v2586_v39 }
 0xee2   :  { %9270 = vmatpush3.msra.mxu1 %v2586_v39 }
 0xf97   :  { %v9224_v19 = vpop.f32.mrf.mxu0  ;;  %v9231_v20 = vpop.f32.mrf.mxu1 }
 0xf98   :  { %v1983_v21 = vmul.f32 0.35355338, %v9224_v19  ;;  %v2094_v22 = vmul.f32 0.35355338, %v9231_v20 }
 0xf99   :  { %v1973_v23 = vpop.f32.mrf.mxu0  ;;  %v2084_v50 = vpop.f32.mrf.mxu1 }
 0xf9a   :  { %v1982_v56 = vmul.f32 0.35355338, %v1973_v23  ;;  %v2093_v24 = vmul.f32 0.35355338, %v2084_v50  ;;  %v2096_v37 = vadd.f32 %v2094_v22, %v10179_v0  ;;  %v1985_v27 = vadd.f32 %v1983_v21, %v10179_v0 }
 0xf9c   :  { %v2100_v55 = vsel %vm38_vm0, %v2096_v37, -inf  ;;  %v2095_v26 = vadd.f32 %v2093_v24, %v10177_v60  ;;  %v1984_v28 = vadd.f32 %v1982_v56, %v10177_v60  ;;  %v1989_v31 = vsel %vm38_vm0, %v1985_v27, -inf }
 0xf9d   :  { %2101 = vmax.xlane.f32.xlu1 %v2100_v55 }
 0xf9e   :  { %v2097_v25 = vsel %vm38_vm0, %v2095_v26, -inf  ;;  %v1986_v35 = vsel %vm38_vm0, %v1984_v28, -inf }
 0xf9f   :  { %v9252_v29 = vpop.f32.mrf.mxu1  ;;  %2098 = vmax.xlane.f32.xlu0 %v2097_v25  ;;  %v10373_v25 = vld [vmem:[#allocation2 + $0x70] ss:$0 sm:$0xff] }
 0xfa0   :  { %v2367_v33 = vmul.f32 0.35355338, %v9252_v29 }
 0xfa1   :  { %v2357_v32 = vpop.f32.mrf.mxu1  ;;  %1990 = vmax.xlane.f32.xlu1 %v1989_v31 }
 0xfa2   :  { %v2366_v34 = vmul.f32 0.35355338, %v2357_v32  ;;  %v2369_v36 = vadd.f32 %v2367_v33, %v10179_v0  ;;  %v10378_v33 = vld [vmem:[#allocation2 + $0x72] ss:$0 sm:$0xff] }
 0xfa3   :  { %1987 = vmax.xlane.f32.xlu0 %v1986_v35  ;;  %v2393_v31 = vmul.f32 %v10378_v33, %v10296_v8  ;;  %v2477_v8 = vmul.f32 %v10200_v30, %v10286_v62 }
 0xfa4   :  { %v2373_v38 = vsel %vm38_vm0, %v2369_v36, -inf  ;;  %v2368_v42 = vadd.f32 %v2366_v34, %v10177_v60 }
 0xfa5   :  { %2374 = vmax.xlane.f32.xlu1 %v2373_v38 }
 0xfa6   :  { %v2370_v41 = vsel %vm38_vm0, %v2368_v42, -inf }
 0xfa7   :  { %2371 = vmax.xlane.f32.xlu0 %v2370_v41 }
0x1026   :  { %v2102_v43 = vpop.xlane.xlu1 %2101 }
0x1027   :  { %v2104_v44 = vsub.f32 %v2096_v37, %v2102_v43 }
0x1028   :  { %v2099_v45 = vpop.xlane.xlu0 %2098 }
0x1029   :  { %v2107_v46 = vmul.f32 1.442695, %v2104_v44  ;;  %v2103_v48 = vsub.f32 %v2095_v26, %v2099_v45 }
0x102a   :  { %v1991_v49 = vpop.xlane.xlu1 %1990 }
0x102b   :  { %9836 = vpow2.f32 %v2107_v46  ;;  %v2105_v53 = vmul.f32 1.442695, %v2103_v48  ;;  %v1993_v54 = vsub.f32 %v1985_v27, %v1991_v49 }
0x102c   :  { %v1988_v57 = vpop.xlane.xlu0 %1987 }
0x102d   :  { %9838 = vpow2.f32 %v2105_v53  ;;  %v1996_v0 = vmul.f32 1.442695, %v1993_v54  ;;  %v1992_v58 = vsub.f32 %v1984_v28, %v1988_v57  ;;  %v2008_v28 = vmul.f32 %v10373_v25, %v10314_v12 }
0x102e   :  { %v2375_v59 = vpop.xlane.xlu1 %2374 }
0x102f   :  { %9840 = vpow2.f32 %v1996_v0  ;;  %v1994_v60 = vmul.f32 1.442695, %v1992_v58  ;;  %v2377_v61 = vsub.f32 %v2369_v36, %v2375_v59  ;;  %v2392_v36 = vmul.f32 %v10378_v33, %v10314_v12 }
0x1030   :  { %v2372_v63 = vpop.xlane.xlu0 %2371  ;;  %v2478_v12 = vmul.f32 %v10200_v30, %v10308_v11  ;;  %v10031_v11 = vld [vmem:[#allocation2 + $0x40] sm:$0xff] }
0x1031   :  { %9842 = vpow2.f32 %v1994_v60  ;;  %v2380_v1 = vmul.f32 1.442695, %v2377_v61  ;;  %v2376_v2 = vsub.f32 %v2368_v42, %v2372_v63 }
0x1033   :  { %9844 = vpow2.f32 %v2380_v1  ;;  %v2378_v3 = vmul.f32 1.442695, %v2376_v2 }
0x1035   :  { %9846 = vpow2.f32 %v2378_v3 }
0x1038   :  { %v9837_v4 = vpop.eup %9836 }
0x1039   :  { %v2112_v5 = vsel %vm38_vm0, %v9837_v4, 0.0 }
0x103a   :  { %v9839_v7 = vpop.eup %9838  ;;  %2113 = vadd.xlane.f32.xlu1 %v2112_v5 }
0x103b   :  { %v2109_v10 = vsel %vm38_vm0, %v9839_v7, 0.0 }
0x103c   :  { %v9841_v13 = vpop.eup %9840  ;;  %2110 = vadd.xlane.f32.xlu0 %v2109_v10 }
0x103d   :  { %v2001_v14 = vsel %vm38_vm0, %v9841_v13, 0.0 }
0x103e   :  { %v9843_v15 = vpop.eup %9842  ;;  %2002 = vadd.xlane.f32.xlu1 %v2001_v14  ;;  %v2674_v14 = vld [vmem:[#allocation2 + $0x1f8] sm:$0xff] }
0x103f   :  { %v1998_v16 = vsel %vm38_vm0, %v9843_v15, 0.0  ;;  %9274 = vmatprep.subr.mxu1 %v2674_v14 }
0x1040   :  { %v9845_v17 = vpop.eup %9844  ;;  %1999 = vadd.xlane.f32.xlu0 %v1998_v16 }
0x1041   :  { %v2385_v40 = vsel %vm38_vm0, %v9845_v17, 0.0 }
0x1042   :  { %v9847_v18 = vpop.eup %9846  ;;  %2386 = vadd.xlane.f32.xlu1 %v2385_v40 }
0x1043   :  { %v2382_v39 = vsel %vm38_vm0, %v9847_v18, 0.0 }
0x1044   :  { %2383 = vadd.xlane.f32.xlu0 %v2382_v39 }
0x10c3   :  { %v2114_v19 = vpop.xlane.xlu1 %2113 }
0x10c4   :  { %9848 = vrcp.f32 %v2114_v19  ;;  %v2673_v19 = vld [vmem:[#allocation2 + $0x1f0] sm:$0xff] }
0x10c5   :  { %v2111_v20 = vpop.xlane.xlu0 %2110 }
0x10c6   :  { %9850 = vrcp.f32 %v2111_v20  ;;  %v2672_v20 = vld [vmem:[#allocation2 + $0x1e8] sm:$0xff] }
0x10c7   :  { %v2003_v21 = vpop.xlane.xlu1 %2002 }
0x10c8   :  { %9852 = vrcp.f32 %v2003_v21  ;;  %v2671_v21 = vld [vmem:[#allocation2 + $0x1e0] sm:$0xff] }
0x10c9   :  { %v2000_v22 = vpop.xlane.xlu0 %1999 }
0x10ca   :  { %9854 = vrcp.f32 %v2000_v22 }
0x10cb   :  { %v2387_v23 = vpop.xlane.xlu1 %2386 }
0x10cc   :  { %9856 = vrcp.f32 %v2387_v23 }
0x10cd   :  { %v2384_v50 = vpop.xlane.xlu0 %2383 }
0x10ce   :  { %9858 = vrcp.f32 %v2384_v50 }
0x10d1   :  { %v9849_v56 = vpop.eup %9848 }
0x10d2   :  { %v2118_v55 = vmul.f32 %v9849_v56, %v9837_v4 }
0x10d3   :  { %v9851_v24 = vpop.eup %9850 }
0x10d4   :  { %v2117_v37 = vmul.f32 %v9851_v24, %v9839_v7  ;;  %v8440_v24 = vld [vmem:[#allocation2 + $0x52f] ss:$0 sm:$0xff] }
0x10d5   :  { %v9853_v26 = vpop.eup %9852 }
0x10d6   :  { %9236 = vmatprep.mubr.msk.f32.mxu0 %vm38_vm0, %v2117_v37  ;;  %v2007_v32 = vmul.f32 %v9853_v26, %v9841_v13 }
0x10d7   :  { %v9855_v27 = vpop.eup %9854  ;;  %9237 = vmatmul.mubr.msk.f32.vlgmr.msra.gmra.mxu0 %vm38_vm0, %v2118_v55 }
0x10d8   :  { %9240 = vmatpush3.msra.mxu0 %v10339_v47  ;;  %v2006_v29 = vmul.f32 %v9855_v27, %v9843_v15 }
0x10d9   :  { %9241 = vmatprep.subr.mxu0 %v2008_v28  ;;  %v9857_v34 = vpop.eup %9856 }
0x10da   :  { %9242 = vmatpush3.msra.mxu0 %v2008_v28  ;;  %9243 = vmatprep.mubr.msk.f32.mxu0 %vm38_vm0, %v2006_v29  ;;  %v2391_v38 = vmul.f32 %v9857_v34, %v9845_v17 }
0x10db   :  { %v9859_v35 = vpop.eup %9858  ;;  %9253 = vmatprep.subr.mxu0 %v2393_v31  ;;  %9244 = vmatmul.mubr.msk.f32.vlgmr.msra.gmra.mxu0 %vm38_vm0, %v2007_v32 }
0x10dc   :  { %9254 = vmatpush3.msra.mxu0 %v2393_v31  ;;  %v2390_v47 = vmul.f32 %v9859_v35, %v9847_v18 }
0x10dd   :  { %9255 = vmatprep.subr.mxu0 %v2392_v36 }
0x10de   :  { %9256 = vmatpush3.msra.mxu0 %v2392_v36  ;;  %9257 = vmatprep.mubr.msk.f32.mxu0 %vm38_vm0, %v2390_v47 }
0x10df   :  { %9260 = vmatprep.subr.msk.mxu0 %vm229_vm3, %v10294_v6  ;;  %9258 = vmatmul.mubr.msk.f32.vlgmr.msra.gmra.mxu0 %vm38_vm0, %v2391_v38 }
0x10e0   :  { %9261 = vmatpush3.xpose.msk.msra.mxu0 %vm229_vm3, %v10294_v6  ;;  %9264 = vmatprep.mubr.msk.f32.mxu0 %vm229_vm3, %v2477_v8 }
0x10e1   :  { %9262 = vmatprep.subr.msk.mxu0 %vm229_vm3, %v10298_v9 }
0x10e4   :  { %9263 = vmatpush3.xpose.msk.msra.mxu0 %vm229_vm3, %v10298_v9  ;;  %v10030_v9 = vld [vmem:[#allocation2 + $0x48] sm:$0xff] }
0x10e7   :  { %9265 = vmatmul.mubr.msk.f32.vlgmr.msra.gmra.mxu0 %vm229_vm3, %v2478_v12 }
0x1197   :  { %v9238_v62 = vpop.f32.mrf.mxu0 }
0x1199   :  { %v2193_v42 = vpop.f32.mrf.mxu0 }
0x119b   :  { %v9245_v41 = vpop.f32.mrf.mxu0 }
0x119c   :  { %v2280_v43 = vadd.f32 %v9245_v41, %v9238_v62  ;;  %v2806_v41 = vld [vmem:[#allocation2 + $0x218] sm:$0xff] }
0x119d   :  { %v2274_v44 = vpop.f32.mrf.mxu0  ;;  %9285 = vmatprep.subr.mxu0 %v2806_v41 }
0x119e   :  { %v2275_v45 = vadd.f32 %v2274_v44, %v2193_v42  ;;  %9286 = vmatpush3.msra.mxu0 %v2806_v41  ;;  %v2803_v44 = vld [vmem:[#allocation2 + $0x200] sm:$0xff] }
0x119f   :  { %v9259_v6 = vpop.f32.mrf.mxu0 }
0x11a0   :  { %v2476_v46 = vadd.f32 %v9259_v6, %v2280_v43  ;;  %v2804_v43 = vld [vmem:[#allocation2 + $0x208] sm:$0xff]  ;;  %v2902_v6 = vld [vmem:[#allocation2 + $0x258] sm:$0xff] }
0x11a1   :  { %v2466_v48 = vpop.f32.mrf.mxu0 }
0x11a2   :  { %v2475_v49 = vadd.f32 %v2466_v48, %v2275_v45  ;;  %v31_v45 = vld [vmem:[%s11101_s1 + $0x8] sm:$0xff] }
0x11a3   :  { %v2900_v48 = vld [vmem:[#allocation2 + $0x248] sm:$0xff] }
0x11a7   :  { %v9266_v53 = vpop.f32.mrf.mxu0 }
0x11a8   :  { %v2561_v54 = vmul.f32 0.35355338, %v9266_v53  ;;  %v2898_v53 = vld [vmem:[#allocation2 + $0x238] sm:$0xff] }
0x11a9   :  { %v2551_v57 = vpop.f32.mrf.mxu0 }
0x11aa   :  { %v2560_v0 = vmul.f32 0.35355338, %v2551_v57  ;;  %v2563_v58 = vadd.f32 %v10030_v9, %v2561_v54 }
0x11ac   :  { %v2567_v30 = vsel %vm38_vm0, %v2563_v58, -inf  ;;  %v2562_v59 = vadd.f32 %v10031_v11, %v2560_v0 }
0x11ad   :  { %2568 = vmax.xlane.f32.xlu1 %v2567_v30 }
0x11ae   :  { %v2564_v60 = vsel %vm38_vm0, %v2562_v59, -inf }
0x11af   :  { %2565 = vmax.xlane.f32.xlu0 %v2564_v60 }
0x1236   :  { %v2569_v61 = vpop.xlane.xlu1 %2568 }
0x1237   :  { %v2571_v63 = vsub.f32 %v2563_v58, %v2569_v61 }
0x1238   :  { %v2566_v1 = vpop.xlane.xlu0 %2565 }
0x1239   :  { %v2574_v2 = vmul.f32 1.442695, %v2571_v63  ;;  %v2570_v3 = vsub.f32 %v2562_v59, %v2566_v1  ;;  %v8443_v59 = vld [vmem:[#allocation2 + $0x532] ss:$0 sm:$0xff] }
0x123b   :  { %9860 = vpow2.f32 %v2574_v2  ;;  %v2572_v4 = vmul.f32 1.442695, %v2570_v3  ;;  %v8444_v2 = vld [vmem:[#allocation2 + $0x533] ss:$0 sm:$0xff] }
0x123d   :  { %9862 = vpow2.f32 %v2572_v4 }
0x1248   :  { %v9861_v5 = vpop.eup %9860 }
0x1249   :  { %v2579_v7 = vsel %vm38_vm0, %v9861_v5, 0.0 }
0x124a   :  { %v9863_v10 = vpop.eup %9862  ;;  %2580 = vadd.xlane.f32.xlu1 %v2579_v7  ;;  %v3031_v7 = vld [vmem:[#allocation2 + $0x30] sm:$0xff] }
0x124b   :  { %v2576_v13 = vsel %vm38_vm0, %v9863_v10, 0.0 }
0x124c   :  { %2577 = vadd.xlane.f32.xlu0 %v2576_v13  ;;  %v3032_v13 = vld [vmem:[#allocation2 + $0x38] sm:$0xff] }
0x12d3   :  { %v2581_v15 = vpop.xlane.xlu1 %2580 }
0x12d4   :  { %9864 = vrcp.f32 %v2581_v15  ;;  %v3123_v15 = vld [vmem:[#allocation2 + $0x278] sm:$0xff] }
0x12d5   :  { %v2578_v16 = vpop.xlane.xlu0 %2577 }
0x12d6   :  { %9866 = vrcp.f32 %v2578_v16  ;;  %v2896_v16 = vld [vmem:[#allocation2 + $0x228] sm:$0xff] }
0x12e1   :  { %v9865_v17 = vpop.eup %9864 }
0x12e2   :  { %v2585_v39 = vmul.f32 %v9865_v17, %v9861_v5  ;;  %v3122_v17 = vld [vmem:[#allocation2 + $0x270] sm:$0xff] }
0x12e3   :  { %v9867_v40 = vpop.eup %9866 }
0x12e4   :  { %v2584_v18 = vmul.f32 %v9867_v40, %v9863_v10  ;;  %v30_v10 = vld [vmem:[%s11101_s1] sm:$0xff] }
0x12e5   :  { %v2895_v40 = vld [vmem:[#allocation2 + $0x220] sm:$0xff] }
0x12e6   :  { %9271 = vmatprep.mubr.msk.f32.mxu1 %vm38_vm0, %v2584_v18  ;;  %v3121_v18 = vld [vmem:[#allocation2 + $0x268] sm:$0xff] }
0x12e7   :  { %9272 = vmatmul.mubr.msk.f32.vlgmr.msra.gmra.mxu1 %vm38_vm0, %v2585_v39  ;;  %v3120_v39 = vld [vmem:[#allocation2 + $0x260] sm:$0xff] }
0x12e8   :  { %9275 = vmatpush3.msra.mxu1 %v2674_v14  ;;  %v2897_v14 = vld [vmem:[#allocation2 + $0x230] sm:$0xff] }
0x12e9   :  { %9276 = vmatprep.subr.mxu1 %v2673_v19 }
0x12ea   :  { %9277 = vmatpush3.msra.mxu1 %v2673_v19  ;;  %v3297_v19 = vld [vmem:[#allocation2 + $0x2b8] sm:$0xff] }
0x12eb   :  { %9278 = vmatprep.subr.mxu1 %v2672_v20 }
0x12ec   :  { %9279 = vmatpush3.msra.mxu1 %v2672_v20  ;;  %v3213_v20 = vld [vmem:[#allocation2 + $0x298] sm:$0xff] }
0x12ed   :  { %9280 = vmatprep.subr.mxu1 %v2671_v21 }
0x12ee   :  { %9281 = vmatpush3.msra.mxu1 %v2671_v21  ;;  %v8445_v21 = vld [vmem:[#allocation2 + $0x530] ss:$0 sm:$0xff] }
0x12ef   :  { %9296 = vmatprep.subr.mxu1 %v2902_v6 }
0x13a7   :  { %v9273_v22 = vpop.f32.mrf.mxu1 }
0x13a8   :  { %v2670_v56 = vadd.f32 %v9273_v22, %v2476_v46  ;;  %v2901_v46 = vld [vmem:[#allocation2 + $0x250] sm:$0xff] }
0x13a9   :  { %v2660_v23 = vpop.f32.mrf.mxu1 }
0x13aa   :  { %v2669_v50 = vadd.f32 %v2660_v23, %v2475_v49  ;;  %v2899_v49 = vld [vmem:[#allocation2 + $0x240] sm:$0xff] }
0x13ac   :  { %9282 = vmatprep.mubr.msk.f32.mxu1 %vm229_vm3, %v2669_v50 }
0x13ad   :  { %9283 = vmatmul.mubr.msk.f32.vlgmr.msra.gmra.mxu1 %vm229_vm3, %v2670_v56 }
0x13ae   :  { %9297 = vmatpush3.msra.mxu1 %v2902_v6 }
0x13af   :  { %9298 = vmatprep.subr.mxu1 %v2901_v46 }
0x13b0   :  { %9299 = vmatpush3.msra.mxu1 %v2901_v46  ;;  %v8461_v46 = vld [vmem:[#allocation2 + $0x538] ss:$0 sm:$0xff] }
0x13b1   :  { %9300 = vmatprep.subr.mxu1 %v2900_v48 }
0x13b2   :  { %9301 = vmatpush3.msra.mxu1 %v2900_v48 }
0x13b3   :  { %9302 = vmatprep.subr.mxu1 %v2899_v49 }
0x13b4   :  { %9303 = vmatpush3.msra.mxu1 %v2899_v49 }
0x13b5   :  { %9304 = vmatprep.subr.mxu1 %v2898_v53 }
0x13b6   :  { %9305 = vmatpush3.msra.mxu1 %v2898_v53 }
0x13b7   :  { %9306 = vmatprep.subr.mxu1 %v2897_v14 }
0x13b8   :  { %9307 = vmatpush3.msra.mxu1 %v2897_v14 }
0x13b9   :  { %9308 = vmatprep.subr.mxu1 %v2896_v16 }
0x13ba   :  { %9309 = vmatpush3.msra.mxu1 %v2896_v16 }
0x13bb   :  { %9310 = vmatprep.subr.mxu1 %v2895_v40 }
0x13bc   :  { %9311 = vmatpush3.msra.mxu1 %v2895_v40 }
0x13bd   :  { %9344 = vmatprep.subr.mxu1 %v3297_v19 }
0x146d   :  { %v9284_v37 = vpop.f32.mrf.mxu1 }
0x146e   :  { %v2758_v55 = vadd.f32 %v9284_v37, %v8440_v24  ;;  %v3033_v37 = vld [vmem:[#allocation2 + $0x10] sm:$0xff] }
0x146f   :  { %v2752_v26 = vpop.f32.mrf.mxu1 }
0x1470   :  { %v2753_v27 = vadd.f32 %v8440_v24, %v2752_v26  ;;  %v2762_v28 = vadd.f32 %v2758_v55, %v10272_v52 }
0x1472   :  { %v2768_v29 = vsel %vm229_vm3, %v2762_v28, 0.0  ;;  %v2761_v31 = vadd.f32 %v2753_v27, %v10270_v51  ;;  %v2805_v51 = vld [vmem:[#allocation2 + $0x210] sm:$0xff]  ;;  %v3034_v27 = vld [vmem:[#allocation2 + $0x18] sm:$0xff] }
0x1473   :  { %2769 = vadd.xlane.f32.xlu1 %v2768_v29  ;;  %9287 = vmatprep.subr.mxu0 %v2805_v51 }
0x1474   :  { %v2765_v32 = vsel %vm229_vm3, %v2761_v31, 0.0  ;;  %9288 = vmatpush3.msra.mxu0 %v2805_v51  ;;  %v8458_v51 = vld [vmem:[#allocation2 + $0x537] ss:$0 sm:$0xff] }
0x1475   :  { %2766 = vadd.xlane.f32.xlu0 %v2765_v32  ;;  %9289 = vmatprep.subr.mxu0 %v2804_v43 }
0x1476   :  { %9290 = vmatpush3.msra.mxu0 %v2804_v43 }
0x1477   :  { %9291 = vmatprep.subr.mxu0 %v2803_v44 }
0x1478   :  { %9292 = vmatpush3.msra.mxu0 %v2803_v44  ;;  %v10458_v44 = vld [vmem:[#allocation2 + $0x71] ss:$0 sm:$0xff] }
0x1479   :  { %9315 = vmatprep.subr.mxu0 %v31_v45 }
0x14fc   :  { %v2770_v34 = vpop.xlane.xlu1 %2769 }
0x14fd   :  { %v2772_v35 = vmul.f32 0.03125, %v2770_v34  ;;  %v3212_v34 = vld [vmem:[#allocation2 + $0x290] sm:$0xff] }
0x14fe   :  { %v2767_v36 = vpop.xlane.xlu0 %2766 }
0x14ff   :  { %v2774_v47 = vsub.f32 %v2762_v28, %v2772_v35  ;;  %v2771_v38 = vmul.f32 0.03125, %v2767_v36  ;;  %v3295_v35 = vld [vmem:[#allocation2 + $0x2a8] sm:$0xff] }
0x1500   :  { %v3211_v36 = vld [vmem:[#allocation2 + $0x288] sm:$0xff] }
0x1501   :  { %v2773_v8 = vsub.f32 %v2761_v31, %v2771_v38  ;;  %v2776_v12 = vmul.f32 %v2774_v47, %v2774_v47  ;;  %v3296_v31 = vld [vmem:[#allocation2 + $0x2b0] sm:$0xff]  ;;  %v3210_v38 = vld [vmem:[#allocation2 + $0x280] sm:$0xff] }
0x1503   :  { %v2780_v62 = vsel %vm229_vm3, %v2776_v12, 0.0  ;;  %v2775_v42 = vmul.f32 %v2773_v8, %v2773_v8 }
0x1504   :  { %2781 = vadd.xlane.f32.xlu1 %v2780_v62 }
0x1505   :  { %v2777_v52 = vsel %vm229_vm3, %v2775_v42, 0.0  ;;  %v8455_v42 = vld [vmem:[#allocation2 + $0x536] ss:$0 sm:$0xff] }
0x1506   :  { %2778 = vadd.xlane.f32.xlu0 %v2777_v52 }
0x158d   :  { %v2782_v54 = vpop.xlane.xlu1 %2781 }
0x158e   :  { %v2784_v57 = vmul.f32 0.03125, %v2782_v54 }
0x158f   :  { %v2779_v0 = vpop.xlane.xlu0 %2778 }
0x1590   :  { %v2786_v9 = vadd.f32 1e-05, %v2784_v57  ;;  %v2783_v58 = vmul.f32 0.03125, %v2779_v0 }
0x1592   :  { %9868 = vrsqrt.f32 %v2786_v9  ;;  %v2785_v30 = vadd.f32 1e-05, %v2783_v58 }
0x1594   :  { %9870 = vrsqrt.f32 %v2785_v30 }
0x159f   :  { %v9869_v11 = vpop.eup %9868 }
0x15a0   :  { %v2790_v60 = vmul.f32 %v9869_v11, %v2774_v47  ;;  %v3294_v47 = vld [vmem:[#allocation2 + $0x2a0] sm:$0xff] }
0x15a1   :  { %v9871_v61 = vpop.eup %9870 }
0x15a2   :  { %v2789_v63 = vmul.f32 %v9871_v61, %v2773_v8  ;;  %v2796_v1 = vmul.f32 %v8443_v59, %v2790_v60 }
0x15a4   :  { %v2795_v3 = vmul.f32 %v8443_v59, %v2789_v63  ;;  %v10421_v5 = vadd.f32 %v8444_v2, %v2796_v1 }
0x15a6   :  { %v10419_v4 = vadd.f32 %v8444_v2, %v2795_v3  ;;  %v10511_v3 = vld [vmem:[#allocation2 + $0x58] sm:$0xff] }
0x15a8   :  { %9293 = vmatprep.mubr.msk.f32.mxu0 %vm229_vm3, %v10419_v4 }
0x15a9   :  { %9294 = vmatmul.mubr.msk.f32.vlgmr.msra.gmra.mxu0 %vm229_vm3, %v10421_v5 }
0x15aa   :  { %9316 = vmatpush3.msra.mxu0 %v31_v45  ;;  %9319 = vmatprep.mubr.msk.f32.mxu0 %vm38_vm0, %v3031_v7 }
0x15ab   :  { %9317 = vmatprep.subr.mxu0 %v30_v10 }
0x15ac   :  { %9318 = vmatpush3.msra.mxu0 %v30_v10  ;;  %v10513_v10 = vld [vmem:[#allocation2 + $0x50] sm:$0xff] }
0x15ad   :  { %9320 = vmatmul.mubr.msk.f32.vlgmr.msra.gmra.mxu0 %vm38_vm0, %v3032_v13  ;;  %9322 = vmatprep.subr.mxu0 %v3123_v15 }
0x15ae   :  { %9323 = vmatpush3.msra.mxu0 %v3123_v15 }
0x15af   :  { %9324 = vmatprep.subr.mxu0 %v3122_v17 }
0x15b0   :  { %9325 = vmatpush3.msra.mxu0 %v3122_v17 }
0x15b1   :  { %9326 = vmatprep.subr.mxu0 %v3121_v18 }
0x15b2   :  { %9327 = vmatpush3.msra.mxu0 %v3121_v18 }
0x15b3   :  { %9328 = vmatprep.subr.mxu0 %v3120_v39 }
0x15b4   :  { %9329 = vmatpush3.msra.mxu0 %v3120_v39 }
0x15b5   :  { %9333 = vmatprep.subr.mxu0 %v3213_v20 }
0x1669   :  { %v9295_v22 = vpop.f32.mrf.mxu0 }
0x166a   :  { %v2890_v23 = vadd.f32 %v9295_v22, %v8445_v21 }
0x166b   :  { %v2884_v50 = vpop.f32.mrf.mxu0 }
0x166c   :  { %v2885_v56 = vadd.f32 %v8445_v21, %v2884_v50  ;;  %v2894_v26 = vmax.f32 %v2890_v23, 0.0 }
0x166d   :  { %v9321_v24 = vpop.f32.mrf.mxu0 }
0x166e   :  { %v2893_v55 = vmax.f32 %v2885_v56, 0.0  ;;  %v10436_v32 = vadd.f32 %v9321_v24, %v3034_v27 }
0x166f   :  { %v3107_v28 = vpop.f32.mrf.mxu0 }
0x1670   :  { %v10432_v29 = vadd.f32 %v3107_v28, %v3033_v37  ;;  %9312 = vmatprep.mubr.msk.f32.mxu1 %vm1511_vm4, %v2893_v55 }
0x1671   :  { %9313 = vmatmul.mubr.msk.f32.vlgmr.msra.gmra.mxu1 %vm1511_vm4, %v2894_v26 }
0x1672   :  { %9345 = vmatpush3.msra.mxu1 %v3297_v19  ;;  %9330 = vmatprep.mubr.msk.f32.mxu0 %vm229_vm3, %v10432_v29 }
0x1673   :  { %9346 = vmatprep.subr.mxu1 %v3296_v31  ;;  %9352 = vmatprep.mubr.msk.f32.mxu1 %vm229_vm3, %v10432_v29 }
0x1674   :  { %9331 = vmatmul.mubr.msk.f32.vlgmr.msra.gmra.mxu0 %vm229_vm3, %v10436_v32  ;;  %9347 = vmatpush3.msra.mxu1 %v3296_v31 }
0x1675   :  { %9334 = vmatpush3.msra.mxu0 %v3213_v20  ;;  %9341 = vmatprep.mubr.msk.f32.mxu0 %vm229_vm3, %v10432_v29 }
0x1676   :  { %9335 = vmatprep.subr.mxu0 %v3212_v34  ;;  %9348 = vmatprep.subr.mxu1 %v3295_v35 }
0x1677   :  { %9336 = vmatpush3.msra.mxu0 %v3212_v34  ;;  %9349 = vmatpush3.msra.mxu1 %v3295_v35 }
0x1678   :  { %9337 = vmatprep.subr.mxu0 %v3211_v36  ;;  %9350 = vmatprep.subr.mxu1 %v3294_v47 }
0x1679   :  { %9338 = vmatpush3.msra.mxu0 %v3211_v36  ;;  %9351 = vmatpush3.msra.mxu1 %v3294_v47 }
0x167a   :  { %9339 = vmatprep.subr.mxu0 %v3210_v38  ;;  %9353 = vmatmul.mubr.msk.f32.vlgmr.msra.gmra.mxu1 %vm229_vm3, %v10436_v32 }
0x167b   :  { %9340 = vmatpush3.msra.mxu0 %v3210_v38 }
0x167c   :  { %9342 = vmatmul.mubr.msk.f32.vlgmr.msra.gmra.mxu0 %vm229_vm3, %v10436_v32 }
0x1731   :  { %v10450_v12 = vpop.f32.mrf.mxu1 }
0x1733   :  { %v10454_v41 = vpop.f32.mrf.mxu1 }
0x1734   :  { %v9332_v8 = vpop.f32.mrf.mxu0 }
0x1735   :  { %v10478_v9 = vadd.f32 %v9332_v8, %v8455_v42 }
0x1736   :  { %v3201_v62 = vpop.f32.mrf.mxu0 }
0x1737   :  { %v10452_v52 = vadd.f32 %v8455_v42, %v3201_v62  ;;  %v3379_v59 = vmul.f32 %v10373_v25, %v10478_v9  ;;  %v3496_v60 = vmul.f32 %v10458_v44, %v10478_v9 }
0x1739   :  { %v3378_v43 = vmul.f32 %v10373_v25, %v10452_v52  ;;  %v3495_v45 = vmul.f32 %v10458_v44, %v10452_v52  ;;  %v3768_v42 = vmul.f32 %v10378_v33, %v10452_v52 }
0x173a   :  { %v9354_v6 = vpop.f32.mrf.mxu1 }
0x173b   :  { %9359 = vmatprep.mubr.msk.f32.mxu0 %vm229_vm3, %v3378_v43  ;;  %9366 = vmatprep.mubr.msk.f32.mxu1 %vm229_vm3, %v3495_v45  ;;  %v10466_v54 = vadd.f32 %v9354_v6, %v8461_v46  ;;  %v3769_v45 = vmul.f32 %v10378_v33, %v10478_v9 }
0x173c   :  { %v9343_v48 = vpop.f32.mrf.mxu0  ;;  %v3369_v0 = vpop.f32.mrf.mxu1 }
0x173d   :  { %v10464_v49 = vadd.f32 %v9343_v48, %v8458_v51  ;;  %v10484_v58 = vadd.f32 %v8461_v46, %v3369_v0  ;;  %v3605_v30 = vmul.f32 %v10458_v44, %v10466_v54  ;;  %v3494_v11 = vmul.f32 %v10373_v25, %v10466_v54 }
0x173e   :  { %v3285_v53 = vpop.f32.mrf.mxu0  ;;  %v10506_v1 = vmul.f32 %v10378_v33, %v10466_v54 }
0x173f   :  { %v10468_v57 = vadd.f32 %v8458_v51, %v3285_v53  ;;  %9355 = vmatprep.subr.msk.mxu0 %vm229_vm3, %v10464_v49  ;;  %9362 = vmatprep.subr.msk.mxu1 %vm229_vm3, %v10464_v49  ;;  %v3604_v61 = vmul.f32 %v10458_v44, %v10484_v58  ;;  %v3493_v63 = vmul.f32 %v10373_v25, %v10484_v58  ;;  %v10534_v51 = vld [vmem:[#allocation2 + $0x73] ss:$0 sm:$0xff] }
0x1740   :  { %9356 = vmatpush3.xpose.msk.msra.mxu0 %vm229_vm3, %v10464_v49  ;;  %9363 = vmatpush3.xpose.msk.msra.mxu1 %vm229_vm3, %v10464_v49  ;;  %v4072_v43 = vmul.f32 %v10534_v51, %v10466_v54  ;;  %v4071_v6 = vmul.f32 %v10534_v51, %v10484_v58 }
0x1741   :  { %9357 = vmatprep.subr.msk.mxu0 %vm229_vm3, %v10468_v57  ;;  %9364 = vmatprep.subr.msk.mxu1 %vm229_vm3, %v10468_v57 }
0x1744   :  { %9358 = vmatpush3.xpose.msk.msra.mxu0 %vm229_vm3, %v10468_v57  ;;  %9365 = vmatpush3.xpose.msk.msra.mxu1 %vm229_vm3, %v10468_v57 }
0x1745   :  { %9369 = vmatprep.subr.mxu0 %v3605_v30  ;;  %9376 = vmatprep.subr.mxu1 %v3494_v11 }
0x1747   :  { %9360 = vmatmul.mubr.msk.f32.vlgmr.msra.gmra.mxu0 %vm229_vm3, %v3379_v59  ;;  %9367 = vmatmul.mubr.msk.f32.vlgmr.msra.gmra.mxu1 %vm229_vm3, %v3496_v60 }
0x1748   :  { %9370 = vmatpush3.msra.mxu0 %v3605_v30  ;;  %9377 = vmatpush3.msra.mxu1 %v3494_v11 }
0x1749   :  { %9371 = vmatprep.subr.mxu0 %v3604_v61  ;;  %9378 = vmatprep.subr.mxu1 %v3493_v63 }
0x174a   :  { %9372 = vmatpush3.msra.mxu0 %v3604_v61  ;;  %9379 = vmatpush3.msra.mxu1 %v3493_v63 }
0x174b   :  { %9383 = vmatprep.subr.msk.mxu0 %vm229_vm3, %v10464_v49  ;;  %9390 = vmatprep.subr.mxu1 %v10506_v1 }
0x1807   :  { %v9368_v2 = vpop.f32.mrf.mxu1  ;;  %v9361_v22 = vpop.f32.mrf.mxu0 }
0x1808   :  { %v3579_v7 = vmul.f32 0.35355338, %v9368_v2  ;;  %v3468_v50 = vmul.f32 0.35355338, %v9361_v22 }
0x1809   :  { %v3569_v25 = vpop.f32.mrf.mxu1  ;;  %v3458_v23 = vpop.f32.mrf.mxu0 }
0x180a   :  { %v3578_v13 = vmul.f32 0.35355338, %v3569_v25  ;;  %v3581_v14 = vadd.f32 %v3579_v7, %v10511_v3  ;;  %v3467_v56 = vmul.f32 0.35355338, %v3458_v23  ;;  %v3470_v55 = vadd.f32 %v3468_v50, %v10511_v3 }
0x180c   :  { %v3585_v15 = vsel %vm38_vm0, %v3581_v14, -inf  ;;  %v3580_v16 = vadd.f32 %v3578_v13, %v10513_v10  ;;  %v3469_v28 = vadd.f32 %v3467_v56, %v10513_v10  ;;  %v3474_v31 = vsel %vm38_vm0, %v3470_v55, -inf }
0x180d   :  { %3586 = vmax.xlane.f32.xlu1 %v3585_v15 }
0x180e   :  { %v3582_v17 = vsel %vm38_vm0, %v3580_v16, -inf  ;;  %v3471_v34 = vsel %vm38_vm0, %v3469_v28, -inf }
0x180f   :  { %3583 = vmax.xlane.f32.xlu0 %v3582_v17 }
0x1896   :  { %v3587_v40 = vpop.xlane.xlu1 %3586 }
0x1897   :  { %v3589_v18 = vsub.f32 %v3581_v14, %v3587_v40 }
0x1898   :  { %v3584_v39 = vpop.xlane.xlu0 %3583 }
0x1899   :  { %v3592_v19 = vmul.f32 1.442695, %v3589_v18  ;;  %v3588_v20 = vsub.f32 %v3580_v16, %v3584_v39 }
0x189b   :  { %9872 = vpow2.f32 %v3592_v19  ;;  %v3590_v21 = vmul.f32 1.442695, %v3588_v20 }
0x189d   :  { %9874 = vpow2.f32 %v3590_v21 }
0x18a8   :  { %v9873_v24 = vpop.eup %9872 }
0x18a9   :  { %v3597_v37 = vsel %vm38_vm0, %v9873_v24, 0.0 }
0x18aa   :  { %v9875_v26 = vpop.eup %9874  ;;  %3598 = vadd.xlane.f32.xlu1 %v3597_v37 }
0x18ab   :  { %v3594_v27 = vsel %vm38_vm0, %v9875_v26, 0.0 }
0x18ac   :  { %3595 = vadd.xlane.f32.xlu0 %v3594_v27 }
0x18ae   :  { %3475 = vmax.xlane.f32.xlu1 %v3474_v31 }
0x18b0   :  { %3472 = vmax.xlane.f32.xlu0 %v3471_v34  ;;  %v3877_v34 = vmul.f32 %v10378_v33, %v10484_v58  ;;  %v3962_v33 = vmul.f32 %v10534_v51, %v10452_v52  ;;  %v3963_v58 = vmul.f32 %v10534_v51, %v10478_v9 }
0x1933   :  { %v3599_v35 = vpop.xlane.xlu1 %3598 }
0x1934   :  { %9876 = vrcp.f32 %v3599_v35 }
0x1935   :  { %v3596_v36 = vpop.xlane.xlu0 %3595 }
0x1936   :  { %9878 = vrcp.f32 %v3596_v36 }
0x1937   :  { %v3476_v46 = vpop.xlane.xlu1 %3475 }
0x1938   :  { %v3478_v53 = vsub.f32 %v3470_v55, %v3476_v46 }
0x1939   :  { %v3473_v48 = vpop.xlane.xlu0 %3472 }
0x193a   :  { %v3477_v0 = vsub.f32 %v3469_v28, %v3473_v48  ;;  %v3481_v54 = vmul.f32 1.442695, %v3478_v53 }
0x193c   :  { %v3479_v30 = vmul.f32 1.442695, %v3477_v0  ;;  %9880 = vpow2.f32 %v3481_v54 }
0x193e   :  { %9882 = vpow2.f32 %v3479_v30 }
0x1941   :  { %v9877_v47 = vpop.eup %9876 }
0x1942   :  { %v3603_v62 = vmul.f32 %v9877_v47, %v9873_v24 }
0x1943   :  { %v9879_v38 = vpop.eup %9878 }
0x1944   :  { %v3602_v8 = vmul.f32 %v9879_v38, %v9875_v26 }
0x1946   :  { %9373 = vmatprep.mubr.msk.f32.mxu0 %vm38_vm0, %v3602_v8 }
0x1947   :  { %9374 = vmatmul.mubr.msk.f32.vlgmr.msra.gmra.mxu0 %vm38_vm0, %v3603_v62 }
0x1948   :  { %9384 = vmatpush3.xpose.msk.msra.mxu0 %vm229_vm3, %v10464_v49  ;;  %9387 = vmatprep.mubr.msk.f32.mxu0 %vm229_vm3, %v3768_v42 }
0x1949   :  { %9385 = vmatprep.subr.msk.mxu0 %vm229_vm3, %v10468_v57  ;;  %v9881_v14 = vpop.eup %9880 }
0x194a   :  { %v3486_v17 = vsel %vm38_vm0, %v9881_v14, 0.0 }
0x194b   :  { %v9883_v16 = vpop.eup %9882 }
0x194c   :  { %9386 = vmatpush3.xpose.msk.msra.mxu0 %vm229_vm3, %v10468_v57  ;;  %v3483_v40 = vsel %vm38_vm0, %v9883_v16, 0.0 }
0x194d   :  { %9404 = vmatprep.subr.mxu0 %v4072_v43 }
0x194f   :  { %9388 = vmatmul.mubr.msk.f32.vlgmr.msra.gmra.mxu0 %vm229_vm3, %v3769_v45 }
0x1950   :  { %9405 = vmatpush3.msra.mxu0 %v4072_v43 }
0x1951   :  { %9406 = vmatprep.subr.mxu0 %v4071_v6 }
0x1952   :  { %9407 = vmatpush3.msra.mxu0 %v4071_v6 }
0x1a07   :  { %v10545_v11 = vpop.f32.mrf.mxu0 }
0x1a09   :  { %v10547_v59 = vpop.f32.mrf.mxu0 }
0x1a0f   :  { %v9389_v60 = vpop.f32.mrf.mxu0 }
0x1a10   :  { %v3852_v61 = vmul.f32 0.35355338, %v9389_v60 }
0x1a11   :  { %v3842_v63 = vpop.f32.mrf.mxu0 }
0x1a12   :  { %v3851_v2 = vmul.f32 0.35355338, %v3842_v63  ;;  %v3854_v7 = vadd.f32 %v3852_v61, %v10511_v3 }
0x1a14   :  { %v3858_v25 = vsel %vm38_vm0, %v3854_v7, -inf  ;;  %v3853_v13 = vadd.f32 %v3851_v2, %v10513_v10 }
0x1a15   :  { %3859 = vmax.xlane.f32.xlu1 %v3858_v25 }
0x1a16   :  { %v3855_v15 = vsel %vm38_vm0, %v3853_v13, -inf }
0x1a17   :  { %3856 = vmax.xlane.f32.xlu0 %v3855_v15 }
0x1a19   :  { %3487 = vadd.xlane.f32.xlu1 %v3486_v17 }
0x1a1b   :  { %3484 = vadd.xlane.f32.xlu0 %v3483_v40 }
0x1a9e   :  { %v3860_v18 = vpop.xlane.xlu1 %3859 }
0x1a9f   :  { %v3862_v39 = vsub.f32 %v3854_v7, %v3860_v18  ;;  %v8448_v7 = vld [vmem:[#allocation2 + $0x531] ss:$0 sm:$0xff] }
0x1aa0   :  { %v3857_v19 = vpop.xlane.xlu0 %3856  ;;  %v2986_v25 = vadd.f32 %v10450_v12, %v8448_v7  ;;  %v4159_v12 = vld [vmem:[#allocation2 + $0x2d8] sm:$0xff] }
0x1aa1   :  { %v3865_v20 = vmul.f32 1.442695, %v3862_v39  ;;  %v3861_v21 = vsub.f32 %v3853_v13, %v3857_v19  ;;  %9411 = vmatprep.subr.mxu0 %v4159_v12 }
0x1aa2   :  { %v3488_v22 = vpop.xlane.xlu1 %3487 }
0x1aa3   :  { %9884 = vpow2.f32 %v3865_v20  ;;  %v3863_v23 = vmul.f32 1.442695, %v3861_v21 }
0x1aa4   :  { %9886 = vrcp.f32 %v3488_v22  ;;  %v3485_v50 = vpop.xlane.xlu0 %3484  ;;  %v4157_v22 = vld [vmem:[#allocation2 + $0x2c8] sm:$0xff] }
0x1aa5   :  { %9888 = vpow2.f32 %v3863_v23  ;;  %v4156_v23 = vld [vmem:[#allocation2 + $0x2c0] sm:$0xff] }
0x1aa6   :  { %9890 = vrcp.f32 %v3485_v50 }
0x1ab0   :  { %v9885_v56 = vpop.eup %9884 }
0x1ab1   :  { %v9887_v24 = vpop.eup %9886  ;;  %v3870_v37 = vsel %vm38_vm0, %v9885_v56, 0.0 }
0x1ab2   :  { %v9889_v55 = vpop.eup %9888  ;;  %3871 = vadd.xlane.f32.xlu1 %v3870_v37  ;;  %v3492_v31 = vmul.f32 %v9887_v24, %v9881_v14  ;;  %v2990_v14 = vadd.f32 %v2986_v25, %v10421_v5 }
0x1ab3   :  { %v9891_v26 = vpop.eup %9890  ;;  %v3867_v27 = vsel %vm38_vm0, %v9889_v55, 0.0 }
0x1ab4   :  { %3868 = vadd.xlane.f32.xlu0 %v3867_v27  ;;  %v3491_v28 = vmul.f32 %v9891_v26, %v9883_v16  ;;  %v2996_v40 = vsel %vm229_vm3, %v2990_v14, 0.0 }
0x1ab6   :  { %9380 = vmatprep.mubr.msk.f32.mxu1 %vm38_vm0, %v3491_v28 }
0x1ab7   :  { %9381 = vmatmul.mubr.msk.f32.vlgmr.msra.gmra.mxu1 %vm38_vm0, %v3492_v31 }
0x1ab8   :  { %9391 = vmatpush3.msra.mxu1 %v10506_v1 }
0x1ab9   :  { %9392 = vmatprep.subr.mxu1 %v3877_v34 }
0x1aba   :  { %9393 = vmatpush3.msra.mxu1 %v3877_v34  ;;  %v8488_v34 = vld [vmem:[#allocation2 + $0x539] ss:$0 sm:$0xff] }
0x1abb   :  { %9397 = vmatprep.subr.msk.mxu1 %vm229_vm3, %v10464_v49 }
0x1b3b   :  { %v3872_v35 = vpop.xlane.xlu1 %3871 }
0x1b3c   :  { %9892 = vrcp.f32 %v3872_v35 }
0x1b3d   :  { %v3869_v36 = vpop.xlane.xlu0 %3868 }
0x1b3e   :  { %9894 = vrcp.f32 %v3869_v36 }
0x1b49   :  { %v9893_v47 = vpop.eup %9892 }
0x1b4a   :  { %v3876_v62 = vmul.f32 %v9893_v47, %v9885_v56 }
0x1b4b   :  { %v9895_v38 = vpop.eup %9894 }
0x1b4c   :  { %v3875_v8 = vmul.f32 %v9895_v38, %v9889_v55 }
0x1b4e   :  { %9394 = vmatprep.mubr.msk.f32.mxu1 %vm38_vm0, %v3875_v8 }
0x1b4f   :  { %9395 = vmatmul.mubr.msk.f32.vlgmr.msra.gmra.mxu1 %vm38_vm0, %v3876_v62 }
0x1b50   :  { %9398 = vmatpush3.xpose.msk.msra.mxu1 %vm229_vm3, %v10464_v49  ;;  %9401 = vmatprep.mubr.msk.f32.mxu1 %vm229_vm3, %v3962_v33 }
0x1b51   :  { %9399 = vmatprep.subr.msk.mxu1 %vm229_vm3, %v10468_v57 }
0x1b54   :  { %9400 = vmatpush3.xpose.msk.msra.mxu1 %vm229_vm3, %v10468_v57 }
0x1b57   :  { %9402 = vmatmul.mubr.msk.f32.vlgmr.msra.gmra.mxu1 %vm229_vm3, %v3963_v58 }
0x1b77   :  { %v9382_v1 = vpop.f32.mrf.mxu1 }
0x1b78   :  { %v3765_v42 = vadd.f32 %v9382_v1, %v10545_v11 }
0x1b79   :  { %v3759_v52 = vpop.f32.mrf.mxu1 }
0x1b7a   :  { %v3760_v50 = vadd.f32 %v3759_v52, %v10547_v59 }
0x1c0f   :  { %v9396_v43 = vpop.f32.mrf.mxu1 }
0x1c10   :  { %v3961_v45 = vadd.f32 %v9396_v43, %v3765_v42 }
0x1c11   :  { %v3951_v49 = vpop.f32.mrf.mxu1 }
0x1c12   :  { %v3960_v24 = vadd.f32 %v3951_v49, %v3760_v50 }
0x1c17   :  { %v9403_v6 = vpop.f32.mrf.mxu1 }
0x1c18   :  { %v4046_v46 = vmul.f32 0.35355338, %v9403_v6  ;;  %v4381_v6 = vld [vmem:[#allocation2 + $0x318] sm:$0xff] }
0x1c19   :  { %v4036_v48 = vpop.f32.mrf.mxu1 }
0x1c1a   :  { %v4045_v53 = vmul.f32 0.35355338, %v4036_v48  ;;  %v4048_v0 = vadd.f32 %v4046_v46, %v10511_v3  ;;  %v2981_v3 = vadd.f32 %v8448_v7, %v10454_v41  ;;  %v4380_v46 = vld [vmem:[#allocation2 + $0x310] sm:$0xff] }
0x1c1c   :  { %v4052_v57 = vsel %vm38_vm0, %v4048_v0, -inf  ;;  %v4047_v54 = vadd.f32 %v4045_v53, %v10513_v10  ;;  %v2989_v17 = vadd.f32 %v2981_v3, %v10419_v4  ;;  %v4158_v4 = vld [vmem:[#allocation2 + $0x2d0] sm:$0xff] }
0x1c1d   :  { %4053 = vmax.xlane.f32.xlu1 %v4052_v57 }
0x1c1e   :  { %v4049_v9 = vsel %vm38_vm0, %v4047_v54, -inf  ;;  %v2993_v18 = vsel %vm229_vm3, %v2989_v17, 0.0 }
0x1c1f   :  { %4050 = vmax.xlane.f32.xlu0 %v4049_v9 }
0x1ca6   :  { %v4054_v30 = vpop.xlane.xlu1 %4053 }
0x1ca7   :  { %v4056_v60 = vsub.f32 %v4048_v0, %v4054_v30 }
0x1ca8   :  { %v4051_v11 = vpop.xlane.xlu0 %4050 }
0x1ca9   :  { %v4059_v61 = vmul.f32 1.442695, %v4056_v60  ;;  %v4055_v63 = vsub.f32 %v4047_v54, %v4051_v11 }
0x1cab   :  { %9896 = vpow2.f32 %v4059_v61  ;;  %v4057_v2 = vmul.f32 1.442695, %v4055_v63 }
0x1cad   :  { %9898 = vpow2.f32 %v4057_v2 }
0x1cb8   :  { %v9897_v13 = vpop.eup %9896 }
0x1cb9   :  { %v4064_v10 = vsel %vm38_vm0, %v9897_v13, 0.0 }
0x1cba   :  { %v9899_v15 = vpop.eup %9898  ;;  %4065 = vadd.xlane.f32.xlu1 %v4064_v10 }
0x1cbb   :  { %v4061_v16 = vsel %vm38_vm0, %v9899_v15, 0.0 }
0x1cbc   :  { %4062 = vadd.xlane.f32.xlu0 %v4061_v16 }
0x1cbe   :  { %2997 = vadd.xlane.f32.xlu1 %v2996_v40  ;;  %v4290_v40 = vld [vmem:[#allocation2 + $0x2f0] sm:$0xff] }
0x1cc0   :  { %2994 = vadd.xlane.f32.xlu0 %v2993_v18 }
0x1d43   :  { %v4066_v41 = vpop.xlane.xlu1 %4065 }
0x1d44   :  { %9900 = vrcp.f32 %v4066_v41  ;;  %v4289_v41 = vld [vmem:[#allocation2 + $0x2e8] sm:$0xff] }
0x1d45   :  { %v4063_v39 = vpop.xlane.xlu0 %4062 }
0x1d46   :  { %9902 = vrcp.f32 %v4063_v39  ;;  %v8452_v39 = vld [vmem:[#allocation2 + $0x535] ss:$0 sm:$0xff] }
0x1d47   :  { %v2998_v27 = vpop.xlane.xlu1 %2997 }
0x1d48   :  { %v3000_v31 = vmul.f32 0.03125, %v2998_v27 }
0x1d49   :  { %v2995_v28 = vpop.xlane.xlu0 %2994 }
0x1d4a   :  { %v2999_v35 = vmul.f32 0.03125, %v2995_v28  ;;  %v3002_v47 = vsub.f32 %v2990_v14, %v3000_v31  ;;  %v8451_v14 = vld [vmem:[#allocation2 + $0x534] ss:$0 sm:$0xff] }
0x1d4c   :  { %v3001_v62 = vsub.f32 %v2989_v17, %v2999_v35  ;;  %v3004_v52 = vmul.f32 %v3002_v47, %v3002_v47  ;;  %v4291_v17 = vld [vmem:[#allocation2 + $0x2f8] sm:$0xff]  ;;  %v8492_v35 = vld [vmem:[#allocation2 + $0x541] ss:$0 sm:$0xff] }
0x1d4d   :  { %9422 = vmatprep.subr.mxu1 %v4291_v17 }
0x1d4e   :  { %v3003_v43 = vmul.f32 %v3001_v62, %v3001_v62  ;;  %9423 = vmatpush3.msra.mxu1 %v4291_v17 }
0x1d4f   :  { %9424 = vmatprep.subr.mxu1 %v4290_v40 }
0x1d50   :  { %v3005_v49 = vsel %vm229_vm3, %v3003_v43, 0.0  ;;  %9425 = vmatpush3.msra.mxu1 %v4290_v40 }
0x1d51   :  { %v9901_v5 = vpop.eup %9900  ;;  %9426 = vmatprep.subr.mxu1 %v4289_v41 }
0x1d52   :  { %v4070_v21 = vmul.f32 %v9901_v5, %v9897_v13  ;;  %9427 = vmatpush3.msra.mxu1 %v4289_v41 }
0x1d53   :  { %v9903_v19 = vpop.eup %9902 }
0x1d54   :  { %v4069_v20 = vmul.f32 %v9903_v19, %v9899_v15  ;;  %v4288_v19 = vld [vmem:[#allocation2 + $0x2e0] sm:$0xff] }
0x1d55   :  { %9428 = vmatprep.subr.mxu1 %v4288_v19 }
0x1d56   :  { %9408 = vmatprep.mubr.msk.f32.mxu0 %vm38_vm0, %v4069_v20  ;;  %9429 = vmatpush3.msra.mxu1 %v4288_v19 }
0x1d57   :  { %9409 = vmatmul.mubr.msk.f32.vlgmr.msra.gmra.mxu0 %vm38_vm0, %v4070_v21 }
0x1d58   :  { %9412 = vmatpush3.msra.mxu0 %v4159_v12 }
0x1d59   :  { %9413 = vmatprep.subr.mxu0 %v4158_v4 }
0x1d5a   :  { %9414 = vmatpush3.msra.mxu0 %v4158_v4  ;;  %v4471_v4 = vld [vmem:[#allocation2 + $0x338] sm:$0xff] }
0x1d5b   :  { %9415 = vmatprep.subr.mxu0 %v4157_v22  ;;  %9444 = vmatprep.subr.mxu1 %v4471_v4 }
0x1d5c   :  { %9416 = vmatpush3.msra.mxu0 %v4157_v22 }
0x1d5d   :  { %9417 = vmatprep.subr.mxu0 %v4156_v23 }
0x1d5e   :  { %9418 = vmatpush3.msra.mxu0 %v4156_v23 }
0x1d5f   :  { %9433 = vmatprep.subr.mxu0 %v4381_v6 }
0x1e17   :  { %v9410_v56 = vpop.f32.mrf.mxu0 }
0x1e18   :  { %v4155_v26 = vadd.f32 %v9410_v56, %v3961_v45  ;;  %v3008_v45 = vsel %vm229_vm3, %v3004_v52, 0.0 }
0x1e19   :  { %v4145_v37 = vpop.f32.mrf.mxu0 }
0x1e1a   :  { %v4154_v55 = vadd.f32 %v4145_v37, %v3960_v24 }
0x1e1c   :  { %9419 = vmatprep.mubr.msk.f32.mxu0 %vm229_vm3, %v4154_v55 }
0x1e1d   :  { %9420 = vmatmul.mubr.msk.f32.vlgmr.msra.gmra.mxu0 %vm229_vm3, %v4155_v26  ;;  %v8491_v26 = vld [vmem:[#allocation2 + $0x540] ss:$0 sm:$0xff] }
0x1e1e   :  { %9434 = vmatpush3.msra.mxu0 %v4381_v6 }
0x1e1f   :  { %9435 = vmatprep.subr.mxu0 %v4380_v46 }
0x1e20   :  { %9436 = vmatpush3.msra.mxu0 %v4380_v46 }
0x1edd   :  { %v9421_v36 = vpop.f32.mrf.mxu0 }
0x1ede   :  { %v4243_v38 = vadd.f32 %v9421_v36, %v8488_v34 }
0x1edf   :  { %v4237_v8 = vpop.f32.mrf.mxu0 }
0x1ee0   :  { %v4238_v59 = vadd.f32 %v8488_v34, %v4237_v8  ;;  %v4247_v33 = vadd.f32 %v4243_v38, %v10436_v32  ;;  %v4379_v32 = vld [vmem:[#allocation2 + $0x308] sm:$0xff]  ;;  %v4470_v8 = vld [vmem:[#allocation2 + $0x330] sm:$0xff] }
0x1ee1   :  { %9437 = vmatprep.subr.mxu0 %v4379_v32 }
0x1ee2   :  { %v4253_v58 = vsel %vm229_vm3, %v4247_v33, 0.0  ;;  %v4246_v1 = vadd.f32 %v4238_v59, %v10432_v29  ;;  %v4378_v29 = vld [vmem:[#allocation2 + $0x300] sm:$0xff]  ;;  %9438 = vmatpush3.msra.mxu0 %v4379_v32  ;;  %v8499_v32 = vld [vmem:[#allocation2 + $0x53c] ss:$0 sm:$0xff] }
0x1ee3   :  { %4254 = vadd.xlane.f32.xlu1 %v4253_v58  ;;  %9439 = vmatprep.subr.mxu0 %v4378_v29  ;;  %v4468_v59 = vld [vmem:[#allocation2 + $0x320] sm:$0xff] }
0x1ee4   :  { %v4250_v42 = vsel %vm229_vm3, %v4246_v1, 0.0  ;;  %9440 = vmatpush3.msra.mxu0 %v4378_v29  ;;  %v10648_v29 = vld [vmem:[#allocation2 + $0x70] ss:$0 sm:$0xff] }
0x1ee5   :  { %4251 = vadd.xlane.f32.xlu0 %v4250_v42 }
0x1ee7   :  { %3009 = vadd.xlane.f32.xlu1 %v3008_v45  ;;  %v8493_v45 = vld [vmem:[#allocation2 + $0x53a] ss:$0 sm:$0xff] }
0x1ee9   :  { %3006 = vadd.xlane.f32.xlu0 %v3005_v49 }
0x1f6c   :  { %v4255_v48 = vpop.xlane.xlu1 %4254 }
0x1f6d   :  { %v4257_v53 = vmul.f32 0.03125, %v4255_v48 }
0x1f6e   :  { %v4252_v0 = vpop.xlane.xlu0 %4251 }
0x1f6f   :  { %v4259_v57 = vsub.f32 %v4247_v33, %v4257_v53  ;;  %v4256_v54 = vmul.f32 0.03125, %v4252_v0  ;;  %v8496_v33 = vld [vmem:[#allocation2 + $0x53b] ss:$0 sm:$0xff] }
0x1f70   :  { %v3010_v9 = vpop.xlane.xlu1 %3009 }
0x1f71   :  { %v4258_v30 = vsub.f32 %v4246_v1, %v4256_v54  ;;  %v3012_v60 = vmul.f32 0.03125, %v3010_v9  ;;  %v4261_v11 = vmul.f32 %v4259_v57, %v4259_v57 }
0x1f72   :  { %v3007_v61 = vpop.xlane.xlu0 %3006 }
0x1f73   :  { %v3014_v63 = vadd.f32 1e-05, %v3012_v60  ;;  %v3011_v2 = vmul.f32 0.03125, %v3007_v61  ;;  %v4265_v7 = vsel %vm229_vm3, %v4261_v11, 0.0  ;;  %v4260_v25 = vmul.f32 %v4258_v30, %v4258_v30 }
0x1f74   :  { %4266 = vadd.xlane.f32.xlu1 %v4265_v7  ;;  %v10674_v7 = vld [vmem:[#allocation2 + $0x72] ss:$0 sm:$0xff] }
0x1f75   :  { %9904 = vrsqrt.f32 %v3014_v63  ;;  %v3013_v3 = vadd.f32 1e-05, %v3011_v2  ;;  %v4262_v13 = vsel %vm229_vm3, %v4260_v25, 0.0 }
0x1f76   :  { %4263 = vadd.xlane.f32.xlu0 %v4262_v13 }
0x1f77   :  { %9906 = vrsqrt.f32 %v3013_v3  ;;  %v10683_v3 = vld [vmem:[#allocation2 + $0x68] sm:$0xff] }
0x1f82   :  { %v9905_v10 = vpop.eup %9904 }
0x1f83   :  { %v3018_v15 = vmul.f32 %v9905_v10, %v3002_v47 }
0x1f84   :  { %v9907_v16 = vpop.eup %9906 }
0x1f85   :  { %v3017_v18 = vmul.f32 %v9907_v16, %v3001_v62  ;;  %v3024_v12 = vmul.f32 %v8451_v14, %v3018_v15  ;;  %v4469_v62 = vld [vmem:[#allocation2 + $0x328] sm:$0xff] }
0x1f87   :  { %v3023_v5 = vmul.f32 %v8451_v14, %v3017_v18  ;;  %v10606_v21 = vadd.f32 %v8452_v39, %v3024_v12  ;;  %v10685_v14 = vld [vmem:[#allocation2 + $0x60] sm:$0xff] }
0x1f89   :  { %v10604_v20 = vadd.f32 %v8452_v39, %v3023_v5 }
0x1f8b   :  { %9441 = vmatprep.mubr.msk.f32.mxu0 %vm229_vm3, %v10604_v20 }
0x1f8c   :  { %9442 = vmatmul.mubr.msk.f32.vlgmr.msra.gmra.mxu0 %vm229_vm3, %v10606_v21 }
0x1ffd   :  { %v4267_v22 = vpop.xlane.xlu1 %4266 }
0x1ffe   :  { %v4269_v23 = vmul.f32 0.03125, %v4267_v22 }
0x1fff   :  { %v4264_v50 = vpop.xlane.xlu0 %4263 }
0x2000   :  { %v4271_v56 = vadd.f32 1e-05, %v4269_v23  ;;  %v4268_v24 = vmul.f32 0.03125, %v4264_v50 }
0x2002   :  { %9908 = vrsqrt.f32 %v4271_v56  ;;  %v4270_v37 = vadd.f32 1e-05, %v4268_v24 }
0x2004   :  { %9910 = vrsqrt.f32 %v4270_v37 }
0x200f   :  { %v9909_v55 = vpop.eup %9908 }
0x2010   :  { %v4275_v27 = vmul.f32 %v9909_v55, %v4259_v57 }
0x2011   :  { %v9911_v28 = vpop.eup %9910 }
0x2012   :  { %v4274_v31 = vmul.f32 %v9911_v28, %v4258_v30  ;;  %v4281_v34 = vmul.f32 %v8491_v26, %v4275_v27 }
0x2014   :  { %v4280_v36 = vmul.f32 %v8491_v26, %v4274_v31  ;;  %v10614_v38 = vadd.f32 %v8492_v35, %v4281_v34 }
0x2016   :  { %v10612_v47 = vadd.f32 %v8492_v35, %v4280_v36 }
0x2018   :  { %9430 = vmatprep.mubr.msk.f32.mxu1 %vm229_vm3, %v10612_v47 }
0x2019   :  { %9431 = vmatmul.mubr.msk.f32.vlgmr.msra.gmra.mxu1 %vm229_vm3, %v10614_v38 }
0x201a   :  { %9445 = vmatpush3.msra.mxu1 %v4471_v4  ;;  %9452 = vmatprep.mubr.msk.f32.mxu1 %vm229_vm3, %v10604_v20 }
0x201b   :  { %9446 = vmatprep.subr.mxu1 %v4470_v8 }
0x201c   :  { %9447 = vmatpush3.msra.mxu1 %v4470_v8 }
0x201d   :  { %9448 = vmatprep.subr.mxu1 %v4469_v62 }
0x201e   :  { %9449 = vmatpush3.msra.mxu1 %v4469_v62 }
0x201f   :  { %9450 = vmatprep.subr.mxu1 %v4468_v59 }
0x2020   :  { %9451 = vmatpush3.msra.mxu1 %v4468_v59 }
0x2021   :  { %9453 = vmatmul.mubr.msk.f32.vlgmr.msra.gmra.mxu1 %vm229_vm3, %v10606_v21 }
0x204c   :  { %v9443_v58 = vpop.f32.mrf.mxu0 }
0x204d   :  { %v10624_v1 = vadd.f32 %v9443_v58, %v8496_v33 }
0x204e   :  { %v4459_v52 = vpop.f32.mrf.mxu0 }
0x204f   :  { %v10626_v42 = vadd.f32 %v8496_v33, %v4459_v52  ;;  %9455 = vmatprep.subr.msk.mxu0 %vm229_vm3, %v10624_v1  ;;  %9462 = vmatprep.subr.msk.mxu1 %vm229_vm3, %v10624_v1 }
0x2050   :  { %9456 = vmatpush3.xpose.msk.msra.mxu0 %vm229_vm3, %v10624_v1  ;;  %9463 = vmatpush3.xpose.msk.msra.mxu1 %vm229_vm3, %v10624_v1 }
0x2051   :  { %9457 = vmatprep.subr.msk.mxu0 %vm229_vm3, %v10626_v42  ;;  %9464 = vmatprep.subr.msk.mxu1 %vm229_vm3, %v10626_v42 }
0x2054   :  { %9458 = vmatpush3.xpose.msk.msra.mxu0 %vm229_vm3, %v10626_v42  ;;  %9465 = vmatpush3.xpose.msk.msra.mxu1 %vm229_vm3, %v10626_v42 }
0x20d9   :  { %v9432_v43 = vpop.f32.mrf.mxu1 }
0x20da   :  { %v10644_v6 = vadd.f32 %v9432_v43, %v8493_v45 }
0x20db   :  { %v4369_v49 = vpop.f32.mrf.mxu1 }
0x20dc   :  { %v10646_v46 = vadd.f32 %v8493_v45, %v4369_v49  ;;  %v4553_v0 = vmul.f32 %v10648_v29, %v10644_v6  ;;  %v4670_v57 = vmul.f32 %v10458_v44, %v10644_v6  ;;  %v4943_v43 = vmul.f32 %v10674_v7, %v10644_v6 }
0x20de   :  { %v4552_v48 = vmul.f32 %v10648_v29, %v10646_v46  ;;  %v4669_v53 = vmul.f32 %v10458_v44, %v10646_v46  ;;  %v4942_v58 = vmul.f32 %v10674_v7, %v10646_v46 }
0x20e0   :  { %9459 = vmatprep.mubr.msk.f32.mxu0 %vm229_vm3, %v4552_v48  ;;  %9466 = vmatprep.mubr.msk.f32.mxu1 %vm229_vm3, %v4669_v53 }
0x20e1   :  { %v9454_v54 = vpop.f32.mrf.mxu1  ;;  %9460 = vmatmul.mubr.msk.f32.vlgmr.msra.gmra.mxu0 %vm229_vm3, %v4553_v0  ;;  %9467 = vmatmul.mubr.msk.f32.vlgmr.msra.gmra.mxu1 %vm229_vm3, %v4670_v57 }
0x20e2   :  { %v10660_v9 = vadd.f32 %v9454_v54, %v8499_v32 }
0x20e3   :  { %v4543_v30 = vpop.f32.mrf.mxu1 }
0x20e4   :  { %v10664_v60 = vadd.f32 %v8499_v32, %v4543_v30  ;;  %v4779_v11 = vmul.f32 %v10458_v44, %v10660_v9  ;;  %v4668_v61 = vmul.f32 %v10648_v29, %v10660_v9  ;;  %v10678_v25 = vmul.f32 %v10674_v7, %v10660_v9 }
0x20e5   :  { %v5246_v52 = vmul.f32 %v10534_v51, %v10660_v9 }
0x20e6   :  { %9469 = vmatprep.subr.mxu0 %v4779_v11  ;;  %9476 = vmatprep.subr.mxu1 %v4668_v61  ;;  %v4778_v63 = vmul.f32 %v10458_v44, %v10664_v60  ;;  %v4667_v2 = vmul.f32 %v10648_v29, %v10664_v60  ;;  %v5245_v45 = vmul.f32 %v10534_v51, %v10664_v60 }
0x20e7   :  { %9470 = vmatpush3.msra.mxu0 %v4779_v11  ;;  %9477 = vmatpush3.msra.mxu1 %v4668_v61 }
0x20e8   :  { %9471 = vmatprep.subr.mxu0 %v4778_v63  ;;  %9478 = vmatprep.subr.mxu1 %v4667_v2 }
0x20e9   :  { %9472 = vmatpush3.msra.mxu0 %v4778_v63  ;;  %9479 = vmatpush3.msra.mxu1 %v4667_v2 }
0x20ea   :  { %9483 = vmatprep.subr.msk.mxu0 %vm229_vm3, %v10624_v1  ;;  %9490 = vmatprep.subr.mxu1 %v10678_v25 }
0x21a1   :  { %v9468_v44 = vpop.f32.mrf.mxu1  ;;  %v9461_v22 = vpop.f32.mrf.mxu0 }
0x21a2   :  { %v4753_v13 = vmul.f32 0.35355338, %v9468_v44  ;;  %v4642_v50 = vmul.f32 0.35355338, %v9461_v22 }
0x21a3   :  { %v4743_v10 = vpop.f32.mrf.mxu1  ;;  %v4632_v23 = vpop.f32.mrf.mxu0 }
0x21a4   :  { %v4752_v15 = vmul.f32 0.35355338, %v4743_v10  ;;  %v4755_v16 = vadd.f32 %v4753_v13, %v10683_v3  ;;  %v4641_v56 = vmul.f32 0.35355338, %v4632_v23  ;;  %v4644_v55 = vadd.f32 %v4642_v50, %v10683_v3 }
0x21a6   :  { %v4759_v17 = vsel %vm38_vm0, %v4755_v16, -inf  ;;  %v4754_v40 = vadd.f32 %v4752_v15, %v10685_v14  ;;  %v4643_v28 = vadd.f32 %v4641_v56, %v10685_v14  ;;  %v4648_v31 = vsel %vm38_vm0, %v4644_v55, -inf }
0x21a7   :  { %4760 = vmax.xlane.f32.xlu1 %v4759_v17 }
0x21a8   :  { %v4756_v18 = vsel %vm38_vm0, %v4754_v40, -inf  ;;  %v4645_v34 = vsel %vm38_vm0, %v4643_v28, -inf }
0x21a9   :  { %4757 = vmax.xlane.f32.xlu0 %v4756_v18 }
0x2230   :  { %v4761_v12 = vpop.xlane.xlu1 %4760 }
0x2231   :  { %v4763_v41 = vsub.f32 %v4755_v16, %v4761_v12 }
0x2232   :  { %v4758_v39 = vpop.xlane.xlu0 %4757 }
0x2233   :  { %v4766_v5 = vmul.f32 1.442695, %v4763_v41  ;;  %v4762_v19 = vsub.f32 %v4754_v40, %v4758_v39 }
0x2235   :  { %9912 = vpow2.f32 %v4766_v5  ;;  %v4764_v4 = vmul.f32 1.442695, %v4762_v19 }
0x2237   :  { %9914 = vpow2.f32 %v4764_v4 }
0x2242   :  { %v9913_v24 = vpop.eup %9912 }
0x2243   :  { %v4771_v37 = vsel %vm38_vm0, %v9913_v24, 0.0 }
0x2244   :  { %v9915_v26 = vpop.eup %9914  ;;  %4772 = vadd.xlane.f32.xlu1 %v4771_v37 }
0x2245   :  { %v4768_v27 = vsel %vm38_vm0, %v9915_v26, 0.0 }
0x2246   :  { %4769 = vadd.xlane.f32.xlu0 %v4768_v27 }
0x2248   :  { %4649 = vmax.xlane.f32.xlu1 %v4648_v31 }
0x224a   :  { %4646 = vmax.xlane.f32.xlu0 %v4645_v34 }
0x22cd   :  { %v4773_v35 = vpop.xlane.xlu1 %4772 }
0x22ce   :  { %9916 = vrcp.f32 %v4773_v35 }
0x22cf   :  { %v4770_v36 = vpop.xlane.xlu0 %4769 }
0x22d0   :  { %9918 = vrcp.f32 %v4770_v36 }
0x22d1   :  { %v4650_v49 = vpop.xlane.xlu1 %4649 }
0x22d2   :  { %v4652_v48 = vsub.f32 %v4644_v55, %v4650_v49 }
0x22d3   :  { %v4647_v32 = vpop.xlane.xlu0 %4646 }
0x22d4   :  { %v4651_v53 = vsub.f32 %v4643_v28, %v4647_v32  ;;  %v4655_v0 = vmul.f32 1.442695, %v4652_v48  ;;  %v5051_v28 = vmul.f32 %v10674_v7, %v10664_v60  ;;  %v5136_v60 = vmul.f32 %v10534_v51, %v10646_v46 }
0x22d6   :  { %v4653_v57 = vmul.f32 1.442695, %v4651_v53  ;;  %9920 = vpow2.f32 %v4655_v0 }
0x22d8   :  { %9922 = vpow2.f32 %v4653_v57 }
0x22db   :  { %v9917_v8 = vpop.eup %9916 }
0x22dc   :  { %v4777_v33 = vmul.f32 %v9917_v8, %v9913_v24 }
0x22dd   :  { %v9919_v62 = vpop.eup %9918 }
0x22de   :  { %v4776_v59 = vmul.f32 %v9919_v62, %v9915_v26 }
0x22e0   :  { %9473 = vmatprep.mubr.msk.f32.mxu0 %vm38_vm0, %v4776_v59 }
0x22e1   :  { %9474 = vmatmul.mubr.msk.f32.vlgmr.msra.gmra.mxu0 %vm38_vm0, %v4777_v33 }
0x22e2   :  { %9484 = vmatpush3.xpose.msk.msra.mxu0 %vm229_vm3, %v10624_v1  ;;  %9487 = vmatprep.mubr.msk.f32.mxu0 %vm229_vm3, %v4942_v58 }
0x22e3   :  { %9485 = vmatprep.subr.msk.mxu0 %vm229_vm3, %v10626_v42  ;;  %v9921_v10 = vpop.eup %9920 }
0x22e4   :  { %v4660_v17 = vsel %vm38_vm0, %v9921_v10, 0.0 }
0x22e5   :  { %v9923_v16 = vpop.eup %9922 }
0x22e6   :  { %9486 = vmatpush3.xpose.msk.msra.mxu0 %vm229_vm3, %v10626_v42  ;;  %v4657_v40 = vsel %vm38_vm0, %v9923_v16, 0.0 }
0x22e7   :  { %9504 = vmatprep.subr.mxu0 %v5246_v52 }
0x22e9   :  { %9488 = vmatmul.mubr.msk.f32.vlgmr.msra.gmra.mxu0 %vm229_vm3, %v4943_v43 }
0x22ea   :  { %9505 = vmatpush3.msra.mxu0 %v5246_v52 }
0x22eb   :  { %9506 = vmatprep.subr.mxu0 %v5245_v45 }
0x22ec   :  { %9507 = vmatpush3.msra.mxu0 %v5245_v45 }
0x23a1   :  { %v10715_v54 = vpop.f32.mrf.mxu0 }
0x23a3   :  { %v10717_v9 = vpop.f32.mrf.mxu0 }
0x23a9   :  { %v9489_v30 = vpop.f32.mrf.mxu0 }
0x23aa   :  { %v5026_v11 = vmul.f32 0.35355338, %v9489_v30 }
0x23ab   :  { %v5016_v61 = vpop.f32.mrf.mxu0 }
0x23ac   :  { %v5025_v63 = vmul.f32 0.35355338, %v5016_v61  ;;  %v5028_v2 = vadd.f32 %v5026_v11, %v10683_v3 }
0x23ae   :  { %v5032_v44 = vsel %vm38_vm0, %v5028_v2, -inf  ;;  %v5027_v13 = vadd.f32 %v5025_v63, %v10685_v14 }
0x23af   :  { %5033 = vmax.xlane.f32.xlu1 %v5032_v44 }
0x23b0   :  { %v5029_v15 = vsel %vm38_vm0, %v5027_v13, -inf }
0x23b1   :  { %5030 = vmax.xlane.f32.xlu0 %v5029_v15 }
0x23b3   :  { %4661 = vadd.xlane.f32.xlu1 %v4660_v17 }
0x23b5   :  { %4658 = vadd.xlane.f32.xlu0 %v4657_v40  ;;  %v5332_v40 = vld [vmem:[#allocation2 + $0x350] sm:$0xff] }
0x2438   :  { %v5034_v18 = vpop.xlane.xlu1 %5033 }
0x2439   :  { %v5036_v12 = vsub.f32 %v5028_v2, %v5034_v18  ;;  %v5331_v18 = vld [vmem:[#allocation2 + $0x348] sm:$0xff] }
0x243a   :  { %v5031_v41 = vpop.xlane.xlu0 %5030 }
0x243b   :  { %v5039_v39 = vmul.f32 1.442695, %v5036_v12  ;;  %v5035_v5 = vsub.f32 %v5027_v13, %v5031_v41  ;;  %v5330_v12 = vld [vmem:[#allocation2 + $0x340] sm:$0xff] }
0x243c   :  { %v4662_v19 = vpop.xlane.xlu1 %4661 }
0x243d   :  { %9924 = vpow2.f32 %v5039_v39  ;;  %v5037_v4 = vmul.f32 1.442695, %v5035_v5 }
0x243e   :  { %9926 = vrcp.f32 %v4662_v19  ;;  %v4659_v22 = vpop.xlane.xlu0 %4658 }
0x243f   :  { %9928 = vpow2.f32 %v5037_v4 }
0x2440   :  { %9930 = vrcp.f32 %v4659_v22 }
0x244a   :  { %v9925_v23 = vpop.eup %9924 }
0x244b   :  { %v9927_v50 = vpop.eup %9926  ;;  %v5044_v56 = vsel %vm38_vm0, %v9925_v23, 0.0 }
0x244c   :  { %v9929_v24 = vpop.eup %9928  ;;  %5045 = vadd.xlane.f32.xlu1 %v5044_v56  ;;  %v4666_v27 = vmul.f32 %v9927_v50, %v9921_v10 }
0x244d   :  { %v9931_v37 = vpop.eup %9930  ;;  %v5041_v55 = vsel %vm38_vm0, %v9929_v24, 0.0 }
0x244e   :  { %5042 = vadd.xlane.f32.xlu0 %v5041_v55  ;;  %v4665_v26 = vmul.f32 %v9931_v37, %v9923_v16 }
0x2450   :  { %9480 = vmatprep.mubr.msk.f32.mxu1 %vm38_vm0, %v4665_v26 }
0x2451   :  { %9481 = vmatmul.mubr.msk.f32.vlgmr.msra.gmra.mxu1 %vm38_vm0, %v4666_v27 }
0x2452   :  { %9491 = vmatpush3.msra.mxu1 %v10678_v25  ;;  %v5137_v25 = vmul.f32 %v10534_v51, %v10644_v6 }
0x2453   :  { %9492 = vmatprep.subr.mxu1 %v5051_v28 }
0x2454   :  { %9493 = vmatpush3.msra.mxu1 %v5051_v28 }
0x2455   :  { %9497 = vmatprep.subr.msk.mxu1 %vm229_vm3, %v10624_v1 }
0x24d5   :  { %v5046_v31 = vpop.xlane.xlu1 %5045 }
0x24d6   :  { %9932 = vrcp.f32 %v5046_v31 }
0x24d7   :  { %v5043_v34 = vpop.xlane.xlu0 %5042 }
0x24d8   :  { %9934 = vrcp.f32 %v5043_v34 }
0x24e3   :  { %v9933_v35 = vpop.eup %9932 }
0x24e4   :  { %v5050_v62 = vmul.f32 %v9933_v35, %v9925_v23  ;;  %v8526_v23 = vld [vmem:[#allocation2 + $0x53d] ss:$0 sm:$0xff] }
0x24e5   :  { %v9935_v36 = vpop.eup %9934 }
0x24e6   :  { %v5049_v8 = vmul.f32 %v9935_v36, %v9929_v24 }
0x24e8   :  { %9494 = vmatprep.mubr.msk.f32.mxu1 %vm38_vm0, %v5049_v8 }
0x24e9   :  { %9495 = vmatmul.mubr.msk.f32.vlgmr.msra.gmra.mxu1 %vm38_vm0, %v5050_v62 }
0x24ea   :  { %9498 = vmatpush3.xpose.msk.msra.mxu1 %vm229_vm3, %v10624_v1  ;;  %9501 = vmatprep.mubr.msk.f32.mxu1 %vm229_vm3, %v5136_v60 }
0x24eb   :  { %9499 = vmatprep.subr.msk.mxu1 %vm229_vm3, %v10626_v42 }
0x24ee   :  { %9500 = vmatpush3.xpose.msk.msra.mxu1 %vm229_vm3, %v10626_v42 }
0x24f1   :  { %9502 = vmatmul.mubr.msk.f32.vlgmr.msra.gmra.mxu1 %vm229_vm3, %v5137_v25 }
0x2511   :  { %v9482_v59 = vpop.f32.mrf.mxu1 }
0x2512   :  { %v4939_v33 = vadd.f32 %v9482_v59, %v10715_v54  ;;  %v5465_v59 = vld [vmem:[#allocation2 + $0x378] sm:$0xff] }
0x2513   :  { %v4933_v46 = vpop.f32.mrf.mxu1  ;;  %9522 = vmatprep.subr.mxu1 %v5465_v59 }
0x2514   :  { %v4934_v41 = vadd.f32 %v4933_v46, %v10717_v9  ;;  %9523 = vmatpush3.msra.mxu1 %v5465_v59  ;;  %v5463_v46 = vld [vmem:[#allocation2 + $0x368] sm:$0xff]  ;;  %v5690_v59 = vld [vmem:[#allocation2 + $0x3c0] sm:$0xff] }
0x25a9   :  { %v9496_v58 = vpop.f32.mrf.mxu1 }
0x25aa   :  { %v5135_v52 = vadd.f32 %v9496_v58, %v4939_v33  ;;  %v5462_v33 = vld [vmem:[#allocation2 + $0x360] sm:$0xff]  ;;  %v5561_v58 = vld [vmem:[#allocation2 + $0x3b8] sm:$0xff] }
0x25ab   :  { %v5125_v1 = vpop.f32.mrf.mxu1 }
0x25ac   :  { %v5134_v5 = vadd.f32 %v5125_v1, %v4934_v41  ;;  %v5559_v1 = vld [vmem:[#allocation2 + $0x3a8] sm:$0xff]  ;;  %v8534_v41 = vld [vmem:[#allocation2 + $0x53f] ss:$0 sm:$0xff] }
0x25b1   :  { %v9503_v43 = vpop.f32.mrf.mxu1 }
0x25b2   :  { %v5220_v45 = vmul.f32 0.35355338, %v9503_v43  ;;  %v5558_v43 = vld [vmem:[#allocation2 + $0x3a0] sm:$0xff] }
0x25b3   :  { %v5210_v49 = vpop.f32.mrf.mxu1 }
0x25b4   :  { %v5219_v32 = vmul.f32 0.35355338, %v5210_v49  ;;  %v5222_v48 = vadd.f32 %v5220_v45, %v10683_v3 }
0x25b6   :  { %v5226_v42 = vsel %vm38_vm0, %v5222_v48, -inf  ;;  %v5221_v53 = vadd.f32 %v5219_v32, %v10685_v14  ;;  %v5333_v14 = vld [vmem:[#allocation2 + $0x358] sm:$0xff] }
0x25b7   :  { %5227 = vmax.xlane.f32.xlu1 %v5226_v42  ;;  %9511 = vmatprep.subr.mxu0 %v5333_v14 }
0x25b8   :  { %v5223_v51 = vsel %vm38_vm0, %v5221_v53, -inf }
0x25b9   :  { %5224 = vmax.xlane.f32.xlu0 %v5223_v51 }
0x2640   :  { %v5228_v6 = vpop.xlane.xlu1 %5227 }
0x2641   :  { %v5230_v0 = vsub.f32 %v5222_v48, %v5228_v6  ;;  %v8529_v6 = vld [vmem:[#allocation2 + $0x542] ss:$0 sm:$0xff] }
0x2642   :  { %v5225_v57 = vpop.xlane.xlu0 %5224 }
0x2643   :  { %v5233_v54 = vmul.f32 1.442695, %v5230_v0  ;;  %v5229_v30 = vsub.f32 %v5221_v53, %v5225_v57 }
0x2645   :  { %9936 = vpow2.f32 %v5233_v54  ;;  %v5231_v11 = vmul.f32 1.442695, %v5229_v30 }
0x2647   :  { %9938 = vpow2.f32 %v5231_v11  ;;  %v8530_v11 = vld [vmem:[#allocation2 + $0x543] ss:$0 sm:$0xff] }
0x2652   :  { %v9937_v61 = vpop.eup %9936 }
0x2653   :  { %v5238_v63 = vsel %vm38_vm0, %v9937_v61, 0.0 }
0x2654   :  { %v9939_v3 = vpop.eup %9938  ;;  %5239 = vadd.xlane.f32.xlu1 %v5238_v63 }
0x2655   :  { %v5235_v2 = vsel %vm38_vm0, %v9939_v3, 0.0 }
0x2656   :  { %5236 = vadd.xlane.f32.xlu0 %v5235_v2  ;;  %v5557_v2 = vld [vmem:[#allocation2 + $0x398] sm:$0xff] }
0x26dd   :  { %v5240_v44 = vpop.xlane.xlu1 %5239 }
0x26de   :  { %9940 = vrcp.f32 %v5240_v44  ;;  %v5555_v44 = vld [vmem:[#allocation2 + $0x388] sm:$0xff] }
0x26df   :  { %v5237_v13 = vpop.xlane.xlu0 %5236 }
0x26e0   :  { %9942 = vrcp.f32 %v5237_v13  ;;  %v5554_v13 = vld [vmem:[#allocation2 + $0x380] sm:$0xff] }
0x26eb   :  { %v9941_v10 = vpop.eup %9940 }
0x26ec   :  { %v5244_v17 = vmul.f32 %v9941_v10, %v9937_v61  ;;  %v8531_v10 = vld [vmem:[#allocation2 + $0x53e] ss:$0 sm:$0xff] }
0x26ed   :  { %v9943_v15 = vpop.eup %9942 }
0x26ee   :  { %v5243_v16 = vmul.f32 %v9943_v15, %v9939_v3 }
0x26f0   :  { %9508 = vmatprep.mubr.msk.f32.mxu0 %vm38_vm0, %v5243_v16 }
0x26f1   :  { %9509 = vmatmul.mubr.msk.f32.vlgmr.msra.gmra.mxu0 %vm38_vm0, %v5244_v17 }
0x26f2   :  { %9512 = vmatpush3.msra.mxu0 %v5333_v14  ;;  %v5556_v14 = vld [vmem:[#allocation2 + $0x390] sm:$0xff] }
0x26f3   :  { %9513 = vmatprep.subr.mxu0 %v5332_v40 }
0x26f4   :  { %9514 = vmatpush3.msra.mxu0 %v5332_v40 }
0x26f5   :  { %9515 = vmatprep.subr.mxu0 %v5331_v18 }
0x26f6   :  { %9516 = vmatpush3.msra.mxu0 %v5331_v18 }
0x26f7   :  { %9517 = vmatprep.subr.mxu0 %v5330_v12 }
0x26f8   :  { %9518 = vmatpush3.msra.mxu0 %v5330_v12 }
0x26f9   :  { %9533 = vmatprep.subr.mxu0 %v5561_v58 }
0x27b1   :  { %v9510_v39 = vpop.f32.mrf.mxu0 }
0x27b2   :  { %v5329_v22 = vadd.f32 %v9510_v39, %v5135_v52  ;;  %v5560_v52 = vld [vmem:[#allocation2 + $0x3b0] sm:$0xff] }
0x27b3   :  { %v5319_v19 = vpop.f32.mrf.mxu0 }
0x27b4   :  { %v5328_v4 = vadd.f32 %v5319_v19, %v5134_v5 }
0x27b6   :  { %9519 = vmatprep.mubr.msk.f32.mxu0 %vm229_vm3, %v5328_v4 }
0x27b7   :  { %9520 = vmatmul.mubr.msk.f32.vlgmr.msra.gmra.mxu0 %vm229_vm3, %v5329_v22 }
0x27b8   :  { %9534 = vmatpush3.msra.mxu0 %v5561_v58 }
0x27b9   :  { %9535 = vmatprep.subr.mxu0 %v5560_v52 }
0x27ba   :  { %9536 = vmatpush3.msra.mxu0 %v5560_v52 }
0x27bb   :  { %9537 = vmatprep.subr.mxu0 %v5559_v1 }
0x27bc   :  { %9538 = vmatpush3.msra.mxu0 %v5559_v1 }
0x27bd   :  { %9539 = vmatprep.subr.mxu0 %v5558_v43 }
0x27be   :  { %9540 = vmatpush3.msra.mxu0 %v5558_v43 }
0x27bf   :  { %9541 = vmatprep.subr.mxu0 %v5557_v2 }
0x27c0   :  { %9542 = vmatpush3.msra.mxu0 %v5557_v2  ;;  %v8539_v2 = vld [vmem:[#allocation2 + $0x546] ss:$0 sm:$0xff] }
0x27c1   :  { %9543 = vmatprep.subr.mxu0 %v5556_v14 }
0x27c2   :  { %9544 = vmatpush3.msra.mxu0 %v5556_v14 }
0x27c3   :  { %9545 = vmatprep.subr.mxu0 %v5555_v44 }
0x27c4   :  { %9546 = vmatpush3.msra.mxu0 %v5555_v44  ;;  %v8542_v44 = vld [vmem:[#allocation2 + $0x547] ss:$0 sm:$0xff] }
0x27c5   :  { %9547 = vmatprep.subr.mxu0 %v5554_v13 }
0x27c6   :  { %9548 = vmatpush3.msra.mxu0 %v5554_v13 }
0x2877   :  { %v9521_v50 = vpop.f32.mrf.mxu0 }
0x2878   :  { %v5417_v56 = vadd.f32 %v9521_v50, %v8526_v23 }
0x2879   :  { %v5411_v24 = vpop.f32.mrf.mxu0 }
0x287a   :  { %v5412_v37 = vadd.f32 %v8526_v23, %v5411_v24  ;;  %v5421_v55 = vadd.f32 %v5417_v56, %v10614_v38 }
0x287c   :  { %v5427_v26 = vsel %vm229_vm3, %v5421_v55, 0.0  ;;  %v5420_v9 = vadd.f32 %v5412_v37, %v10612_v47  ;;  %v5464_v47 = vld [vmem:[#allocation2 + $0x370] sm:$0xff] }
0x287d   :  { %5428 = vadd.xlane.f32.xlu1 %v5427_v26  ;;  %9524 = vmatprep.subr.mxu1 %v5464_v47 }
0x287e   :  { %v5424_v27 = vsel %vm229_vm3, %v5420_v9, 0.0  ;;  %9525 = vmatpush3.msra.mxu1 %v5464_v47  ;;  %v5864_v47 = vld [vmem:[#allocation2 + $0x400] sm:$0xff] }
0x287f   :  { %5425 = vadd.xlane.f32.xlu0 %v5424_v27  ;;  %9526 = vmatprep.subr.mxu1 %v5463_v46 }
0x2880   :  { %9527 = vmatpush3.msra.mxu1 %v5463_v46  ;;  %v5783_v46 = vld [vmem:[#allocation2 + $0x3f8] sm:$0xff] }
0x2881   :  { %9528 = vmatprep.subr.mxu1 %v5462_v33 }
0x2882   :  { %9529 = vmatpush3.msra.mxu1 %v5462_v33 }
0x2906   :  { %v5429_v28 = vpop.xlane.xlu1 %5428 }
0x2907   :  { %v5431_v31 = vmul.f32 0.03125, %v5429_v28 }
0x2908   :  { %v5426_v34 = vpop.xlane.xlu0 %5425 }
0x2909   :  { %v5433_v35 = vsub.f32 %v5421_v55, %v5431_v31  ;;  %v5430_v36 = vmul.f32 0.03125, %v5426_v34 }
0x290b   :  { %v5432_v8 = vsub.f32 %v5420_v9, %v5430_v36  ;;  %v5435_v62 = vmul.f32 %v5433_v35, %v5433_v35  ;;  %v5693_v36 = vld [vmem:[#allocation2 + $0x3d8] sm:$0xff] }
0x290c   :  { %9552 = vmatprep.subr.mxu1 %v5693_v36 }
0x290d   :  { %v5439_v60 = vsel %vm229_vm3, %v5435_v62, 0.0  ;;  %v5434_v25 = vmul.f32 %v5432_v8, %v5432_v8  ;;  %v5692_v62 = vld [vmem:[#allocation2 + $0x3d0] sm:$0xff] }
0x290e   :  { %5440 = vadd.xlane.f32.xlu1 %v5439_v60  ;;  %v5866_v60 = vld [vmem:[#allocation2 + $0x410] sm:$0xff] }
0x290f   :  { %v5436_v38 = vsel %vm229_vm3, %v5434_v25, 0.0  ;;  %v5691_v25 = vld [vmem:[#allocation2 + $0x3c8] sm:$0xff] }
0x2910   :  { %5437 = vadd.xlane.f32.xlu0 %v5436_v38  ;;  %v5865_v38 = vld [vmem:[#allocation2 + $0x408] sm:$0xff] }
0x2997   :  { %v5441_v45 = vpop.xlane.xlu1 %5440 }
0x2998   :  { %v5443_v49 = vmul.f32 0.03125, %v5441_v45 }
0x2999   :  { %v5438_v32 = vpop.xlane.xlu0 %5437 }
0x299a   :  { %v5445_v48 = vadd.f32 1e-05, %v5443_v49  ;;  %v5442_v42 = vmul.f32 0.03125, %v5438_v32  ;;  %v8537_v32 = vld [vmem:[#allocation2 + $0x544] ss:$0 sm:$0xff] }
0x299c   :  { %9944 = vrsqrt.f32 %v5445_v48  ;;  %v5444_v53 = vadd.f32 1e-05, %v5442_v42 }
0x299e   :  { %9946 = vrsqrt.f32 %v5444_v53 }
0x29a9   :  { %v9945_v51 = vpop.eup %9944 }
0x29aa   :  { %v5449_v0 = vmul.f32 %v9945_v51, %v5433_v35 }
0x29ab   :  { %v9947_v57 = vpop.eup %9946 }
0x29ac   :  { %v5448_v54 = vmul.f32 %v9947_v57, %v5432_v8  ;;  %v5455_v30 = vmul.f32 %v8529_v6, %v5449_v0  ;;  %v5867_v8 = vld [vmem:[#allocation2 + $0x418] sm:$0xff] }
0x29ad   :  { %9574 = vmatprep.subr.mxu0 %v5867_v8 }
0x29ae   :  { %v5454_v61 = vmul.f32 %v8529_v6, %v5448_v54  ;;  %v5461_v3 = vadd.f32 %v8530_v11, %v5455_v30  ;;  %v8538_v6 = vld [vmem:[#allocation2 + $0x545] ss:$0 sm:$0xff]  ;;  %v5782_v30 = vld [vmem:[#allocation2 + $0x3f0] sm:$0xff] }
0x29b0   :  { %v5460_v63 = vadd.f32 %v8530_v11, %v5454_v61  ;;  %v5781_v11 = vld [vmem:[#allocation2 + $0x3e8] sm:$0xff]  ;;  %v5780_v61 = vld [vmem:[#allocation2 + $0x3e0] sm:$0xff] }
0x29b2   :  { %9530 = vmatprep.mubr.msk.f32.mxu1 %vm229_vm3, %v5460_v63 }
0x29b3   :  { %9531 = vmatmul.mubr.msk.f32.vlgmr.msra.gmra.mxu1 %vm229_vm3, %v5461_v3 }
0x29b4   :  { %9553 = vmatpush3.msra.mxu1 %v5693_v36 }
0x29b5   :  { %9554 = vmatprep.subr.mxu1 %v5692_v62 }
0x29b6   :  { %9555 = vmatpush3.msra.mxu1 %v5692_v62 }
0x29b7   :  { %9556 = vmatprep.subr.mxu1 %v5691_v25 }
0x29b8   :  { %9557 = vmatpush3.msra.mxu1 %v5691_v25 }
0x29b9   :  { %9558 = vmatprep.subr.mxu1 %v5690_v59 }
0x29ba   :  { %9559 = vmatpush3.msra.mxu1 %v5690_v59 }
0x29bb   :  { %9563 = vmatprep.subr.mxu1 %v5783_v46 }
0x2a73   :  { %v9532_v15 = vpop.f32.mrf.mxu1 }
0x2a74   :  { %v5549_v16 = vadd.f32 %v9532_v15, %v8531_v10 }
0x2a75   :  { %v5543_v17 = vpop.f32.mrf.mxu1 }
0x2a76   :  { %v5544_v40 = vadd.f32 %v8531_v10, %v5543_v17  ;;  %v5553_v12 = vmax.f32 %v5549_v16, 0.0  ;;  %v10794_v10 = vld [vmem:[#allocation2 + $0x71] ss:$0 sm:$0xff]  ;;  %v8545_v17 = vld [vmem:[#allocation2 + $0x548] ss:$0 sm:$0xff] }
0x2a78   :  { %v5552_v18 = vmax.f32 %v5544_v40, 0.0 }
0x2a7a   :  { %9549 = vmatprep.mubr.msk.f32.mxu0 %vm1511_vm4, %v5552_v18 }
0x2a7b   :  { %9550 = vmatmul.mubr.msk.f32.vlgmr.msra.gmra.mxu0 %vm1511_vm4, %v5553_v12 }
0x2a7c   :  { %9575 = vmatpush3.msra.mxu0 %v5867_v8 }
0x2a7d   :  { %9576 = vmatprep.subr.mxu0 %v5866_v60 }
0x2a7e   :  { %9577 = vmatpush3.msra.mxu0 %v5866_v60  ;;  %v10861_v60 = vld [vmem:[#allocation2 + $0x58] sm:$0xff] }
0x2a7f   :  { %9578 = vmatprep.subr.mxu0 %v5865_v38 }
0x2a80   :  { %9579 = vmatpush3.msra.mxu0 %v5865_v38  ;;  %v10865_v38 = vld [vmem:[#allocation2 + $0x50] sm:$0xff] }
0x2a81   :  { %9580 = vmatprep.subr.mxu0 %v5864_v47 }
0x2a82   :  { %9581 = vmatpush3.msra.mxu0 %v5864_v47 }
0x2b3b   :  { %v9551_v39 = vpop.f32.mrf.mxu0 }
0x2b3c   :  { %v5645_v5 = vadd.f32 %v9551_v39, %v8534_v41 }
0x2b3d   :  { %v5639_v19 = vpop.f32.mrf.mxu0 }
0x2b3e   :  { %v5640_v4 = vadd.f32 %v8534_v41, %v5639_v19  ;;  %v5649_v22 = vadd.f32 %v5645_v5, %v5461_v3 }
0x2b40   :  { %v5655_v23 = vsel %vm229_vm3, %v5649_v22, 0.0  ;;  %v5648_v50 = vadd.f32 %v5640_v4, %v5460_v63 }
0x2b41   :  { %5656 = vadd.xlane.f32.xlu1 %v5655_v23 }
0x2b42   :  { %v5652_v56 = vsel %vm229_vm3, %v5648_v50, 0.0 }
0x2b43   :  { %5653 = vadd.xlane.f32.xlu0 %v5652_v56 }
0x2bca   :  { %v5657_v24 = vpop.xlane.xlu1 %5656 }
0x2bcb   :  { %v5659_v37 = vmul.f32 0.03125, %v5657_v24 }
0x2bcc   :  { %v5654_v55 = vpop.xlane.xlu0 %5653 }
0x2bcd   :  { %v5661_v26 = vsub.f32 %v5649_v22, %v5659_v37  ;;  %v5658_v9 = vmul.f32 0.03125, %v5654_v55  ;;  %v10850_v55 = vld [vmem:[#allocation2 + $0x73] ss:$0 sm:$0xff] }
0x2bcf   :  { %v5660_v27 = vsub.f32 %v5648_v50, %v5658_v9  ;;  %v5663_v28 = vmul.f32 %v5661_v26, %v5661_v26 }
0x2bd1   :  { %v5667_v31 = vsel %vm229_vm3, %v5663_v28, 0.0  ;;  %v5662_v34 = vmul.f32 %v5660_v27, %v5660_v27 }
0x2bd2   :  { %5668 = vadd.xlane.f32.xlu1 %v5667_v31 }
0x2bd3   :  { %v5664_v35 = vsel %vm229_vm3, %v5662_v34, 0.0 }
0x2bd4   :  { %5665 = vadd.xlane.f32.xlu0 %v5664_v35 }
0x2c5b   :  { %v5669_v33 = vpop.xlane.xlu1 %5668 }
0x2c5c   :  { %v5671_v58 = vmul.f32 0.03125, %v5669_v33 }
0x2c5d   :  { %v5666_v52 = vpop.xlane.xlu0 %5665 }
0x2c5e   :  { %v5673_v1 = vadd.f32 1e-05, %v5671_v58  ;;  %v5670_v43 = vmul.f32 0.03125, %v5666_v52 }
0x2c60   :  { %9948 = vrsqrt.f32 %v5673_v1  ;;  %v5672_v45 = vadd.f32 1e-05, %v5670_v43 }
0x2c62   :  { %9950 = vrsqrt.f32 %v5672_v45 }
0x2c6d   :  { %v9949_v49 = vpop.eup %9948 }
0x2c6e   :  { %v5677_v48 = vmul.f32 %v9949_v49, %v5661_v26 }
0x2c6f   :  { %v9951_v42 = vpop.eup %9950 }
0x2c70   :  { %v5676_v53 = vmul.f32 %v9951_v42, %v5660_v27  ;;  %v5683_v51 = vmul.f32 %v8537_v32, %v5677_v48 }
0x2c72   :  { %v5682_v0 = vmul.f32 %v8537_v32, %v5676_v53  ;;  %v10776_v54 = vadd.f32 %v8538_v6, %v5683_v51 }
0x2c74   :  { %v10774_v57 = vadd.f32 %v8538_v6, %v5682_v0 }
0x2c76   :  { %9560 = vmatprep.mubr.msk.f32.mxu1 %vm229_vm3, %v10774_v57  ;;  %9582 = vmatprep.mubr.msk.f32.mxu0 %vm229_vm3, %v10774_v57 }
0x2c77   :  { %9561 = vmatmul.mubr.msk.f32.vlgmr.msra.gmra.mxu1 %vm229_vm3, %v10776_v54  ;;  %9583 = vmatmul.mubr.msk.f32.vlgmr.msra.gmra.mxu0 %vm229_vm3, %v10776_v54 }
0x2c78   :  { %9564 = vmatpush3.msra.mxu1 %v5783_v46  ;;  %9571 = vmatprep.mubr.msk.f32.mxu1 %vm229_vm3, %v10774_v57 }
0x2c79   :  { %9565 = vmatprep.subr.mxu1 %v5782_v30 }
0x2c7a   :  { %9566 = vmatpush3.msra.mxu1 %v5782_v30 }
0x2c7b   :  { %9567 = vmatprep.subr.mxu1 %v5781_v11 }
0x2c7c   :  { %9568 = vmatpush3.msra.mxu1 %v5781_v11 }
0x2c7d   :  { %9569 = vmatprep.subr.mxu1 %v5780_v61 }
0x2c7e   :  { %9570 = vmatpush3.msra.mxu1 %v5780_v61 }
0x2c7f   :  { %9572 = vmatmul.mubr.msk.f32.vlgmr.msra.gmra.mxu1 %vm229_vm3, %v10776_v54 }
0x2d37   :  { %v9562_v63 = vpop.f32.mrf.mxu1  ;;  %v9584_v16 = vpop.f32.mrf.mxu0 }
0x2d38   :  { %v10802_v41 = vadd.f32 %v9584_v16, %v8545_v17  ;;  %v10814_v19 = vadd.f32 %v9562_v63, %v8539_v2 }
0x2d39   :  { %v5771_v3 = vpop.f32.mrf.mxu1  ;;  %v5939_v5 = vpop.f32.mrf.mxu0 }
0x2d3a   :  { %v10790_v14 = vadd.f32 %v8539_v2, %v5771_v3  ;;  %v10820_v4 = vadd.f32 %v8545_v17, %v5939_v5  ;;  %v6175_v22 = vmul.f32 %v10794_v10, %v10802_v41  ;;  %v5949_v23 = vmul.f32 %v10648_v29, %v10814_v19 }
0x2d3b   :  { %v6066_v50 = vmul.f32 %v10794_v10, %v10814_v19  ;;  %v10845_v37 = vmul.f32 %v10648_v29, %v10802_v41  ;;  %v6642_v26 = vmul.f32 %v10850_v55, %v10802_v41  ;;  %v6339_v9 = vmul.f32 %v10674_v7, %v10814_v19 }
0x2d3c   :  { %v5948_v13 = vmul.f32 %v10648_v29, %v10790_v14  ;;  %v6065_v15 = vmul.f32 %v10794_v10, %v10790_v14  ;;  %v6338_v56 = vmul.f32 %v10674_v7, %v10790_v14  ;;  %v6174_v24 = vmul.f32 %v10794_v10, %v10820_v4 }
0x2d3d   :  { %v6641_v29 = vmul.f32 %v10850_v55, %v10820_v4 }
0x2d3e   :  { %9589 = vmatprep.mubr.msk.f32.mxu1 %vm229_vm3, %v5948_v13  ;;  %9596 = vmatprep.mubr.msk.f32.mxu0 %vm229_vm3, %v6065_v15 }
0x2d3f   :  { %v9573_v40 = vpop.f32.mrf.mxu1 }
0x2d40   :  { %v10800_v18 = vadd.f32 %v9573_v40, %v8542_v44 }
0x2d41   :  { %v5855_v12 = vpop.f32.mrf.mxu1 }
0x2d42   :  { %v10804_v39 = vadd.f32 %v8542_v44, %v5855_v12  ;;  %9585 = vmatprep.subr.msk.mxu1 %vm229_vm3, %v10800_v18  ;;  %9592 = vmatprep.subr.msk.mxu0 %vm229_vm3, %v10800_v18 }
0x2d43   :  { %9586 = vmatpush3.xpose.msk.msra.mxu1 %vm229_vm3, %v10800_v18  ;;  %9593 = vmatpush3.xpose.msk.msra.mxu0 %vm229_vm3, %v10800_v18 }
0x2d44   :  { %9587 = vmatprep.subr.msk.mxu1 %vm229_vm3, %v10804_v39  ;;  %9594 = vmatprep.subr.msk.mxu0 %vm229_vm3, %v10804_v39 }
0x2d47   :  { %9588 = vmatpush3.xpose.msk.msra.mxu1 %vm229_vm3, %v10804_v39  ;;  %9595 = vmatpush3.xpose.msk.msra.mxu0 %vm229_vm3, %v10804_v39 }
0x2d48   :  { %9599 = vmatprep.subr.mxu1 %v6175_v22  ;;  %9613 = vmatprep.subr.msk.mxu0 %vm229_vm3, %v10800_v18 }
0x2d4a   :  { %9590 = vmatmul.mubr.msk.f32.vlgmr.msra.gmra.mxu1 %vm229_vm3, %v5949_v23  ;;  %9597 = vmatmul.mubr.msk.f32.vlgmr.msra.gmra.mxu0 %vm229_vm3, %v6066_v50 }
0x2d4b   :  { %9600 = vmatpush3.msra.mxu1 %v6175_v22  ;;  %9614 = vmatpush3.xpose.msk.msra.mxu0 %vm229_vm3, %v10800_v18 }
0x2d4c   :  { %9617 = vmatprep.mubr.msk.f32.mxu0 %vm229_vm3, %v6338_v56  ;;  %9601 = vmatprep.subr.mxu1 %v6174_v24 }
0x2d4d   :  { %9615 = vmatprep.subr.msk.mxu0 %vm229_vm3, %v10804_v39  ;;  %9602 = vmatpush3.msra.mxu1 %v6174_v24 }
0x2d4e   :  { %9606 = vmatprep.subr.mxu1 %v10845_v37 }
0x2d4f   :  { %9616 = vmatpush3.xpose.msk.msra.mxu0 %vm229_vm3, %v10804_v39 }
0x2d50   :  { %9634 = vmatprep.subr.mxu0 %v6642_v26 }
0x2d52   :  { %9618 = vmatmul.mubr.msk.f32.vlgmr.msra.gmra.mxu0 %vm229_vm3, %v6339_v9 }
0x2d53   :  { %9635 = vmatpush3.msra.mxu0 %v6642_v26 }
0x2d54   :  { %9636 = vmatprep.subr.mxu0 %v6641_v29 }
0x2d55   :  { %9637 = vmatpush3.msra.mxu0 %v6641_v29 }
0x2e0a   :  { %v9591_v27 = vpop.f32.mrf.mxu1  ;;  %v9598_v28 = vpop.f32.mrf.mxu0 }
0x2e0b   :  { %v6038_v31 = vmul.f32 0.35355338, %v9591_v27  ;;  %v6149_v34 = vmul.f32 0.35355338, %v9598_v28 }
0x2e0c   :  { %v6028_v35 = vpop.f32.mrf.mxu1  ;;  %v6139_v36 = vpop.f32.mrf.mxu0 }
0x2e0d   :  { %v6037_v8 = vmul.f32 0.35355338, %v6028_v35  ;;  %v6148_v62 = vmul.f32 0.35355338, %v6139_v36  ;;  %v6151_v7 = vadd.f32 %v10861_v60, %v6149_v34  ;;  %v6040_v47 = vadd.f32 %v10861_v60, %v6038_v31 }
0x2e0f   :  { %v6155_v25 = vsel %vm38_vm0, %v6151_v7, -inf  ;;  %v6150_v59 = vadd.f32 %v10865_v38, %v6148_v62  ;;  %v6039_v33 = vadd.f32 %v10865_v38, %v6037_v8  ;;  %v6044_v1 = vsel %vm38_vm0, %v6040_v47, -inf }
0x2e10   :  { %6156 = vmax.xlane.f32.xlu1 %v6155_v25 }
0x2e11   :  { %v6152_v46 = vsel %vm38_vm0, %v6150_v59, -inf  ;;  %v6041_v49 = vsel %vm38_vm0, %v6039_v33, -inf }
0x2e12   :  { %v9619_v58 = vpop.f32.mrf.mxu0  ;;  %6153 = vmax.xlane.f32.xlu0 %v6152_v46 }
0x2e13   :  { %v6422_v52 = vmul.f32 0.35355338, %v9619_v58 }
0x2e14   :  { %v6412_v43 = vpop.f32.mrf.mxu0  ;;  %6045 = vmax.xlane.f32.xlu1 %v6044_v1 }
0x2e15   :  { %v6421_v45 = vmul.f32 0.35355338, %v6412_v43  ;;  %v6424_v32 = vadd.f32 %v10861_v60, %v6422_v52  ;;  %v10885_v43 = vld [vmem:[#allocation2 + $0x70] ss:$0 sm:$0xff] }
0x2e16   :  { %6042 = vmax.xlane.f32.xlu0 %v6041_v49 }
0x2e17   :  { %v6428_v48 = vsel %vm38_vm0, %v6424_v32, -inf  ;;  %v6423_v42 = vadd.f32 %v10865_v38, %v6421_v45  ;;  %v6063_v45 = vmul.f32 %v10885_v43, %v10820_v4 }
0x2e18   :  { %6429 = vmax.xlane.f32.xlu1 %v6428_v48 }
0x2e19   :  { %v6425_v53 = vsel %vm38_vm0, %v6423_v42, -inf }
0x2e1a   :  { %6426 = vmax.xlane.f32.xlu0 %v6425_v53 }
0x2e99   :  { %v6157_v51 = vpop.xlane.xlu1 %6156 }
0x2e9a   :  { %v6159_v6 = vsub.f32 %v6151_v7, %v6157_v51 }
0x2e9b   :  { %v6154_v0 = vpop.xlane.xlu0 %6153 }
0x2e9c   :  { %v6162_v30 = vmul.f32 1.442695, %v6159_v6  ;;  %v6158_v11 = vsub.f32 %v6150_v59, %v6154_v0 }
0x2e9d   :  { %v6046_v61 = vpop.xlane.xlu1 %6045 }
0x2e9e   :  { %9952 = vpow2.f32 %v6162_v30  ;;  %v6160_v63 = vmul.f32 1.442695, %v6158_v11  ;;  %v6048_v3 = vsub.f32 %v6040_v47, %v6046_v61 }
0x2e9f   :  { %v6043_v2 = vpop.xlane.xlu0 %6042 }
0x2ea0   :  { %9954 = vpow2.f32 %v6160_v63  ;;  %v6051_v44 = vmul.f32 1.442695, %v6048_v3  ;;  %v6047_v13 = vsub.f32 %v6039_v33, %v6043_v2 }
0x2ea1   :  { %v6430_v15 = vpop.xlane.xlu1 %6429 }
0x2ea2   :  { %9956 = vpow2.f32 %v6051_v44  ;;  %v6049_v16 = vmul.f32 1.442695, %v6047_v13  ;;  %v6432_v17 = vsub.f32 %v6424_v32, %v6430_v15  ;;  %v10890_v32 = vld [vmem:[#allocation2 + $0x72] ss:$0 sm:$0xff] }
0x2ea3   :  { %v6427_v40 = vpop.xlane.xlu0 %6426  ;;  %v6448_v48 = vmul.f32 %v10890_v32, %v10802_v41  ;;  %v6447_v6 = vmul.f32 %v10890_v32, %v10820_v4  ;;  %v6532_v41 = vmul.f32 %v10850_v55, %v10790_v14  ;;  %v6533_v4 = vmul.f32 %v10850_v55, %v10814_v19 }
0x2ea4   :  { %9958 = vpow2.f32 %v6049_v16  ;;  %v6435_v12 = vmul.f32 1.442695, %v6432_v17  ;;  %v6431_v5 = vsub.f32 %v6423_v42, %v6427_v40 }
0x2ea6   :  { %9960 = vpow2.f32 %v6435_v12  ;;  %v6433_v22 = vmul.f32 1.442695, %v6431_v5 }
0x2ea8   :  { %9962 = vpow2.f32 %v6433_v22 }
0x2eab   :  { %v9953_v23 = vpop.eup %9952 }
0x2eac   :  { %v6167_v50 = vsel %vm38_vm0, %v9953_v23, 0.0 }
0x2ead   :  { %v9955_v56 = vpop.eup %9954  ;;  %6168 = vadd.xlane.f32.xlu1 %v6167_v50 }
0x2eae   :  { %v6164_v24 = vsel %vm38_vm0, %v9955_v56, 0.0 }
0x2eaf   :  { %v9957_v26 = vpop.eup %9956  ;;  %6165 = vadd.xlane.f32.xlu0 %v6164_v24 }
0x2eb0   :  { %v6056_v9 = vsel %vm38_vm0, %v9957_v26, 0.0 }
0x2eb1   :  { %v9959_v29 = vpop.eup %9958  ;;  %6057 = vadd.xlane.f32.xlu1 %v6056_v9 }
0x2eb2   :  { %v6053_v27 = vsel %vm38_vm0, %v9959_v29, 0.0 }
0x2eb3   :  { %v9961_v28 = vpop.eup %9960  ;;  %6054 = vadd.xlane.f32.xlu0 %v6053_v27  ;;  %v6729_v27 = vld [vmem:[#allocation2 + $0x438] sm:$0xff] }
0x2eb4   :  { %v6440_v31 = vsel %vm38_vm0, %v9961_v28, 0.0  ;;  %9641 = vmatprep.subr.mxu0 %v6729_v27 }
0x2eb5   :  { %v9963_v34 = vpop.eup %9962  ;;  %6441 = vadd.xlane.f32.xlu1 %v6440_v31 }
0x2eb6   :  { %v6437_v35 = vsel %vm38_vm0, %v9963_v34, 0.0 }
0x2eb7   :  { %6438 = vadd.xlane.f32.xlu0 %v6437_v35 }
0x2f36   :  { %v6169_v36 = vpop.xlane.xlu1 %6168 }
0x2f37   :  { %9964 = vrcp.f32 %v6169_v36 }
0x2f38   :  { %v6166_v8 = vpop.xlane.xlu0 %6165 }
0x2f39   :  { %9966 = vrcp.f32 %v6166_v8 }
0x2f3a   :  { %v6058_v62 = vpop.xlane.xlu1 %6057 }
0x2f3b   :  { %9968 = vrcp.f32 %v6058_v62  ;;  %v6728_v62 = vld [vmem:[#allocation2 + $0x430] sm:$0xff] }
0x2f3c   :  { %v6055_v7 = vpop.xlane.xlu0 %6054 }
0x2f3d   :  { %9970 = vrcp.f32 %v6055_v7  ;;  %v6727_v7 = vld [vmem:[#allocation2 + $0x428] sm:$0xff] }
0x2f3e   :  { %v6442_v25 = vpop.xlane.xlu1 %6441 }
0x2f3f   :  { %9972 = vrcp.f32 %v6442_v25  ;;  %v6726_v25 = vld [vmem:[#allocation2 + $0x420] sm:$0xff] }
0x2f40   :  { %v6439_v59 = vpop.xlane.xlu0 %6438 }
0x2f41   :  { %9974 = vrcp.f32 %v6439_v59  ;;  %v6951_v59 = vld [vmem:[#allocation2 + $0x478] sm:$0xff] }
0x2f44   :  { %v9965_v47 = vpop.eup %9964 }
0x2f45   :  { %v6173_v58 = vmul.f32 %v9965_v47, %v9953_v23 }
0x2f46   :  { %v9967_v46 = vpop.eup %9966 }
0x2f47   :  { %v6172_v33 = vmul.f32 %v9967_v46, %v9955_v56 }
0x2f48   :  { %v9969_v52 = vpop.eup %9968 }
0x2f49   :  { %9603 = vmatprep.mubr.msk.f32.mxu1 %vm38_vm0, %v6172_v33  ;;  %v6062_v42 = vmul.f32 %v9969_v52, %v9957_v26  ;;  %v6950_v52 = vld [vmem:[#allocation2 + $0x470] sm:$0xff] }
0x2f4a   :  { %v9971_v1 = vpop.eup %9970  ;;  %9604 = vmatmul.mubr.msk.f32.vlgmr.msra.gmra.mxu1 %vm38_vm0, %v6173_v58 }
0x2f4b   :  { %9607 = vmatpush3.msra.mxu1 %v10845_v37  ;;  %v6061_v49 = vmul.f32 %v9971_v1, %v9959_v29  ;;  %v6949_v1 = vld [vmem:[#allocation2 + $0x468] sm:$0xff] }
0x2f4c   :  { %9608 = vmatprep.subr.mxu1 %v6063_v45  ;;  %v9973_v53 = vpop.eup %9972 }
0x2f4d   :  { %9609 = vmatpush3.msra.mxu1 %v6063_v45  ;;  %9610 = vmatprep.mubr.msk.f32.mxu1 %vm38_vm0, %v6061_v49  ;;  %v6446_v0 = vmul.f32 %v9973_v53, %v9961_v28  ;;  %v6948_v45 = vld [vmem:[#allocation2 + $0x460] sm:$0xff]  ;;  %v8572_v49 = vld [vmem:[#allocation2 + $0x549] ss:$0 sm:$0xff] }
0x2f4e   :  { %v9975_v51 = vpop.eup %9974  ;;  %9620 = vmatprep.subr.mxu1 %v6448_v48  ;;  %9611 = vmatmul.mubr.msk.f32.vlgmr.msra.gmra.mxu1 %vm38_vm0, %v6062_v42 }
0x2f4f   :  { %9621 = vmatpush3.msra.mxu1 %v6448_v48  ;;  %v6445_v37 = vmul.f32 %v9975_v51, %v9963_v34 }
0x2f50   :  { %9622 = vmatprep.subr.mxu1 %v6447_v6 }
0x2f51   :  { %9623 = vmatpush3.msra.mxu1 %v6447_v6  ;;  %9624 = vmatprep.mubr.msk.f32.mxu1 %vm38_vm0, %v6445_v37 }
0x2f52   :  { %9627 = vmatprep.subr.msk.mxu1 %vm229_vm3, %v10800_v18  ;;  %9625 = vmatmul.mubr.msk.f32.vlgmr.msra.gmra.mxu1 %vm38_vm0, %v6446_v0 }
0x2f53   :  { %9628 = vmatpush3.xpose.msk.msra.mxu1 %vm229_vm3, %v10800_v18  ;;  %9631 = vmatprep.mubr.msk.f32.mxu1 %vm229_vm3, %v6532_v41  ;;  %v8580_v41 = vld [vmem:[#allocation2 + $0x54b] ss:$0 sm:$0xff] }
0x2f54   :  { %9629 = vmatprep.subr.msk.mxu1 %vm229_vm3, %v10804_v39 }
0x2f57   :  { %9630 = vmatpush3.xpose.msk.msra.mxu1 %vm229_vm3, %v10804_v39 }
0x2f5a   :  { %9632 = vmatmul.mubr.msk.f32.vlgmr.msra.gmra.mxu1 %vm229_vm3, %v6533_v4 }
0x300a   :  { %v9605_v14 = vpop.f32.mrf.mxu1 }
0x300c   :  { %v6248_v30 = vpop.f32.mrf.mxu1 }
0x300e   :  { %v9612_v11 = vpop.f32.mrf.mxu1 }
0x300f   :  { %v6335_v61 = vadd.f32 %v9612_v11, %v9605_v14 }
0x3010   :  { %v6329_v63 = vpop.f32.mrf.mxu1 }
0x3011   :  { %v6330_v3 = vadd.f32 %v6329_v63, %v6248_v30 }
0x3012   :  { %v9626_v18 = vpop.f32.mrf.mxu1 }
0x3013   :  { %v6531_v2 = vadd.f32 %v9626_v18, %v6335_v61 }
0x3014   :  { %v6521_v44 = vpop.f32.mrf.mxu1 }
0x3015   :  { %v6530_v13 = vadd.f32 %v6521_v44, %v6330_v3 }
0x301a   :  { %v9633_v15 = vpop.f32.mrf.mxu1 }
0x301b   :  { %v6616_v16 = vmul.f32 0.35355338, %v9633_v15 }
0x301c   :  { %v6606_v17 = vpop.f32.mrf.mxu1 }
0x301d   :  { %v6618_v39 = vadd.f32 %v10861_v60, %v6616_v16  ;;  %v6615_v40 = vmul.f32 0.35355338, %v6606_v17  ;;  %v6861_v17 = vld [vmem:[#allocation2 + $0x458] sm:$0xff] }
0x301e   :  { %9652 = vmatprep.subr.mxu1 %v6861_v17 }
0x301f   :  { %v6617_v19 = vadd.f32 %v10865_v38, %v6615_v40  ;;  %v6622_v12 = vsel %vm38_vm0, %v6618_v39, -inf  ;;  %9653 = vmatpush3.msra.mxu1 %v6861_v17  ;;  %v6859_v40 = vld [vmem:[#allocation2 + $0x448] sm:$0xff] }
0x3020   :  { %6623 = vmax.xlane.f32.xlu1 %v6622_v12  ;;  %v7035_v12 = vld [vmem:[#allocation2 + $0x498] sm:$0xff] }
0x3021   :  { %v6619_v5 = vsel %vm38_vm0, %v6617_v19, -inf }
0x3022   :  { %6620 = vmax.xlane.f32.xlu0 %v6619_v5 }
0x30a9   :  { %v6624_v22 = vpop.xlane.xlu1 %6623 }
0x30aa   :  { %v6626_v23 = vsub.f32 %v6618_v39, %v6624_v22  ;;  %v6860_v39 = vld [vmem:[#allocation2 + $0x450] sm:$0xff] }
0x30ab   :  { %v6621_v50 = vpop.xlane.xlu0 %6620  ;;  %9654 = vmatprep.subr.mxu1 %v6860_v39 }
0x30ac   :  { %v6629_v56 = vmul.f32 1.442695, %v6626_v23  ;;  %v6625_v24 = vsub.f32 %v6617_v19, %v6621_v50  ;;  %9655 = vmatpush3.msra.mxu1 %v6860_v39  ;;  %v6858_v19 = vld [vmem:[#allocation2 + $0x440] sm:$0xff] }
0x30ad   :  { %9656 = vmatprep.subr.mxu1 %v6859_v40 }
0x30ae   :  { %9976 = vpow2.f32 %v6629_v56  ;;  %v6627_v26 = vmul.f32 1.442695, %v6625_v24  ;;  %9657 = vmatpush3.msra.mxu1 %v6859_v40 }
0x30af   :  { %9658 = vmatprep.subr.mxu1 %v6858_v19 }
0x30b0   :  { %9978 = vpow2.f32 %v6627_v26  ;;  %9659 = vmatpush3.msra.mxu1 %v6858_v19 }
0x30b1   :  { %9674 = vmatprep.subr.mxu1 %v7035_v12 }
0x30bb   :  { %v9977_v9 = vpop.eup %9976 }
0x30bc   :  { %v6634_v60 = vsel %vm38_vm0, %v9977_v9, 0.0 }
0x30bd   :  { %v9979_v29 = vpop.eup %9978  ;;  %6635 = vadd.xlane.f32.xlu1 %v6634_v60 }
0x30be   :  { %v6631_v38 = vsel %vm38_vm0, %v9979_v29, 0.0 }
0x30bf   :  { %6632 = vadd.xlane.f32.xlu0 %v6631_v38 }
0x3146   :  { %v6636_v28 = vpop.xlane.xlu1 %6635 }
0x3147   :  { %9980 = vrcp.f32 %v6636_v28  ;;  %v8576_v28 = vld [vmem:[#allocation2 + $0x551] ss:$0 sm:$0xff] }
0x3148   :  { %v6633_v31 = vpop.xlane.xlu0 %6632 }
0x3149   :  { %9982 = vrcp.f32 %v6633_v31 }
0x3154   :  { %v9981_v34 = vpop.eup %9980 }
0x3155   :  { %v6640_v8 = vmul.f32 %v9981_v34, %v9977_v9  ;;  %v8575_v9 = vld [vmem:[#allocation2 + $0x550] ss:$0 sm:$0xff] }
0x3156   :  { %v9983_v35 = vpop.eup %9982 }
0x3157   :  { %v6639_v36 = vmul.f32 %v9983_v35, %v9979_v29 }
0x3159   :  { %9638 = vmatprep.mubr.msk.f32.mxu0 %vm38_vm0, %v6639_v36  ;;  %v7034_v36 = vld [vmem:[#allocation2 + $0x490] sm:$0xff] }
0x315a   :  { %9639 = vmatmul.mubr.msk.f32.vlgmr.msra.gmra.mxu0 %vm38_vm0, %v6640_v8  ;;  %v7033_v8 = vld [vmem:[#allocation2 + $0x488] sm:$0xff] }
0x315b   :  { %9642 = vmatpush3.msra.mxu0 %v6729_v27 }
0x315c   :  { %9643 = vmatprep.subr.mxu0 %v6728_v62 }
0x315d   :  { %9644 = vmatpush3.msra.mxu0 %v6728_v62  ;;  %v7032_v62 = vld [vmem:[#allocation2 + $0x480] sm:$0xff] }
0x315e   :  { %9645 = vmatprep.subr.mxu0 %v6727_v7 }
0x315f   :  { %9646 = vmatpush3.msra.mxu0 %v6727_v7  ;;  %v8577_v7 = vld [vmem:[#allocation2 + $0x54a] ss:$0 sm:$0xff] }
0x3160   :  { %9647 = vmatprep.subr.mxu0 %v6726_v25 }
0x3161   :  { %9648 = vmatpush3.msra.mxu0 %v6726_v25 }
0x3162   :  { %9663 = vmatprep.subr.mxu0 %v6951_v59 }
0x321a   :  { %v9640_v47 = vpop.f32.mrf.mxu0 }
0x321b   :  { %v6725_v58 = vadd.f32 %v9640_v47, %v6531_v2 }
0x321c   :  { %v6715_v46 = vpop.f32.mrf.mxu0 }
0x321d   :  { %v6724_v33 = vadd.f32 %v6715_v46, %v6530_v13 }
0x321f   :  { %9649 = vmatprep.mubr.msk.f32.mxu0 %vm229_vm3, %v6724_v33 }
0x3220   :  { %9650 = vmatmul.mubr.msk.f32.vlgmr.msra.gmra.mxu0 %vm229_vm3, %v6725_v58 }
0x3221   :  { %9664 = vmatpush3.msra.mxu0 %v6951_v59  ;;  %9671 = vmatprep.mubr.msk.f32.mxu0 %vm229_vm3, %v10604_v20 }
0x3222   :  { %9665 = vmatprep.subr.mxu0 %v6950_v52 }
0x3223   :  { %9666 = vmatpush3.msra.mxu0 %v6950_v52 }
0x3224   :  { %9667 = vmatprep.subr.mxu0 %v6949_v1 }
0x3225   :  { %9668 = vmatpush3.msra.mxu0 %v6949_v1 }
0x3226   :  { %9669 = vmatprep.subr.mxu0 %v6948_v45 }
0x3227   :  { %9670 = vmatpush3.msra.mxu0 %v6948_v45 }
0x3228   :  { %9672 = vmatmul.mubr.msk.f32.vlgmr.msra.gmra.mxu0 %vm229_vm3, %v10606_v21 }
0x32e0   :  { %v9651_v48 = vpop.f32.mrf.mxu0 }
0x32e1   :  { %v6813_v42 = vadd.f32 %v9651_v48, %v8572_v49 }
0x32e2   :  { %v6807_v53 = vpop.f32.mrf.mxu0 }
0x32e3   :  { %v6817_v51 = vadd.f32 %v6813_v42, %v10776_v54  ;;  %v6808_v6 = vadd.f32 %v8572_v49, %v6807_v53 }
0x32e5   :  { %v6816_v37 = vadd.f32 %v6808_v6, %v10774_v57  ;;  %v6823_v0 = vsel %vm229_vm3, %v6817_v51, 0.0 }
0x32e6   :  { %6824 = vadd.xlane.f32.xlu1 %v6823_v0 }
0x32e7   :  { %v6820_v4 = vsel %vm229_vm3, %v6816_v37, 0.0 }
0x32e8   :  { %v9673_v14 = vpop.f32.mrf.mxu0  ;;  %6821 = vadd.xlane.f32.xlu0 %v6820_v4  ;;  %v11001_v4 = vld [vmem:[#allocation2 + $0x68] sm:$0xff] }
0x32e9   :  { %v10932_v30 = vadd.f32 %v9673_v14, %v8580_v41 }
0x32ea   :  { %v7023_v11 = vpop.f32.mrf.mxu0 }
0x32eb   :  { %v10934_v61 = vadd.f32 %v8580_v41, %v7023_v11  ;;  %9685 = vmatprep.subr.msk.mxu0 %vm229_vm3, %v10932_v30  ;;  %v11004_v11 = vld [vmem:[#allocation2 + $0x60] sm:$0xff] }
0x32ec   :  { %9686 = vmatpush3.xpose.msk.msra.mxu0 %vm229_vm3, %v10932_v30 }
0x32ed   :  { %9687 = vmatprep.subr.msk.mxu0 %vm229_vm3, %v10934_v61 }
0x32f0   :  { %9688 = vmatpush3.xpose.msk.msra.mxu0 %vm229_vm3, %v10934_v61 }
0x336f   :  { %v6825_v57 = vpop.xlane.xlu1 %6824 }
0x3370   :  { %v6827_v54 = vmul.f32 0.03125, %v6825_v57 }
0x3371   :  { %v6822_v63 = vpop.xlane.xlu0 %6821 }
0x3372   :  { %v6829_v3 = vsub.f32 %v6817_v51, %v6827_v54  ;;  %v6826_v18 = vmul.f32 0.03125, %v6822_v63 }
0x3374   :  { %v6828_v2 = vsub.f32 %v6816_v37, %v6826_v18  ;;  %v6831_v44 = vmul.f32 %v6829_v3, %v6829_v3 }
0x3376   :  { %v6835_v13 = vsel %vm229_vm3, %v6831_v44, 0.0  ;;  %v6830_v15 = vmul.f32 %v6828_v2, %v6828_v2 }
0x3377   :  { %6836 = vadd.xlane.f32.xlu1 %v6835_v13 }
0x3378   :  { %v6832_v16 = vsel %vm229_vm3, %v6830_v15, 0.0 }
0x3379   :  { %6833 = vadd.xlane.f32.xlu0 %v6832_v16 }
0x3400   :  { %v6837_v5 = vpop.xlane.xlu1 %6836 }
0x3401   :  { %v6839_v22 = vmul.f32 0.03125, %v6837_v5 }
0x3402   :  { %v6834_v23 = vpop.xlane.xlu0 %6833 }
0x3403   :  { %v6841_v50 = vadd.f32 1e-05, %v6839_v22  ;;  %v6838_v56 = vmul.f32 0.03125, %v6834_v23 }
0x3405   :  { %9984 = vrsqrt.f32 %v6841_v50  ;;  %v6840_v24 = vadd.f32 1e-05, %v6838_v56 }
0x3407   :  { %9986 = vrsqrt.f32 %v6840_v24 }
0x3412   :  { %v9985_v26 = vpop.eup %9984 }
0x3413   :  { %v6845_v60 = vmul.f32 %v9985_v26, %v6829_v3 }
0x3414   :  { %v9987_v29 = vpop.eup %9986 }
0x3415   :  { %v6844_v38 = vmul.f32 %v9987_v29, %v6828_v2  ;;  %v6851_v27 = vmul.f32 %v8575_v9, %v6845_v60 }
0x3417   :  { %v6850_v31 = vmul.f32 %v8575_v9, %v6844_v38  ;;  %v10948_v35 = vadd.f32 %v8576_v28, %v6851_v27 }
0x3419   :  { %v10946_v34 = vadd.f32 %v8576_v28, %v6850_v31 }
0x341b   :  { %9660 = vmatprep.mubr.msk.f32.mxu1 %vm229_vm3, %v10946_v34 }
0x341c   :  { %9661 = vmatmul.mubr.msk.f32.vlgmr.msra.gmra.mxu1 %vm229_vm3, %v10948_v35 }
0x341d   :  { %9675 = vmatpush3.msra.mxu1 %v7035_v12  ;;  %9682 = vmatprep.mubr.msk.f32.mxu1 %vm229_vm3, %v10604_v20 }
0x341e   :  { %9676 = vmatprep.subr.mxu1 %v7034_v36 }
0x341f   :  { %9677 = vmatpush3.msra.mxu1 %v7034_v36 }
0x3420   :  { %9678 = vmatprep.subr.mxu1 %v7033_v8 }
0x3421   :  { %9679 = vmatpush3.msra.mxu1 %v7033_v8 }
0x3422   :  { %9680 = vmatprep.subr.mxu1 %v7032_v62 }
0x3423   :  { %9681 = vmatpush3.msra.mxu1 %v7032_v62 }
0x3424   :  { %9683 = vmatmul.mubr.msk.f32.vlgmr.msra.gmra.mxu1 %vm229_vm3, %v10606_v21  ;;  %9692 = vmatprep.subr.msk.mxu1 %vm229_vm3, %v10932_v30  ;;  %v8583_v21 = vld [vmem:[#allocation2 + $0x54c] ss:$0 sm:$0xff] }
0x3425   :  { %9693 = vmatpush3.xpose.msk.msra.mxu1 %vm229_vm3, %v10932_v30 }
0x3426   :  { %9694 = vmatprep.subr.msk.mxu1 %vm229_vm3, %v10934_v61 }
0x3429   :  { %9695 = vmatpush3.xpose.msk.msra.mxu1 %vm229_vm3, %v10934_v61 }
0x34dc   :  { %v9662_v20 = vpop.f32.mrf.mxu1 }
0x34dd   :  { %v10966_v59 = vadd.f32 %v9662_v20, %v8577_v7 }
0x34de   :  { %v6939_v25 = vpop.f32.mrf.mxu1 }
0x34df   :  { %v10968_v47 = vadd.f32 %v8577_v7, %v6939_v25  ;;  %v7117_v58 = vmul.f32 %v10885_v43, %v10966_v59  ;;  %v7234_v52 = vmul.f32 %v10794_v10, %v10966_v59  ;;  %v7507_v36 = vmul.f32 %v10890_v32, %v10966_v59 }
0x34e1   :  { %v7116_v46 = vmul.f32 %v10885_v43, %v10968_v47  ;;  %v7233_v33 = vmul.f32 %v10794_v10, %v10968_v47  ;;  %v7506_v28 = vmul.f32 %v10890_v32, %v10968_v47 }
0x34e3   :  { %9689 = vmatprep.mubr.msk.f32.mxu0 %vm229_vm3, %v7116_v46  ;;  %9696 = vmatprep.mubr.msk.f32.mxu1 %vm229_vm3, %v7233_v33 }
0x34e4   :  { %v9684_v1 = vpop.f32.mrf.mxu1  ;;  %9690 = vmatmul.mubr.msk.f32.vlgmr.msra.gmra.mxu0 %vm229_vm3, %v7117_v58  ;;  %9697 = vmatmul.mubr.msk.f32.vlgmr.msra.gmra.mxu1 %vm229_vm3, %v7234_v52 }
0x34e5   :  { %v10980_v45 = vadd.f32 %v9684_v1, %v8583_v21 }
0x34e6   :  { %v7107_v49 = vpop.f32.mrf.mxu1 }
0x34e7   :  { %v10984_v48 = vadd.f32 %v8583_v21, %v7107_v49  ;;  %v7343_v42 = vmul.f32 %v10794_v10, %v10980_v45  ;;  %v7232_v53 = vmul.f32 %v10885_v43, %v10980_v45  ;;  %v10996_v37 = vmul.f32 %v10890_v32, %v10980_v45 }
0x34e8   :  { %v7810_v31 = vmul.f32 %v10850_v55, %v10980_v45 }
0x34e9   :  { %9699 = vmatprep.subr.mxu0 %v7343_v42  ;;  %9706 = vmatprep.subr.mxu1 %v7232_v53  ;;  %v7342_v51 = vmul.f32 %v10794_v10, %v10984_v48  ;;  %v7231_v6 = vmul.f32 %v10885_v43, %v10984_v48  ;;  %v7809_v8 = vmul.f32 %v10850_v55, %v10984_v48 }
0x34ea   :  { %9700 = vmatpush3.msra.mxu0 %v7343_v42  ;;  %9707 = vmatpush3.msra.mxu1 %v7232_v53 }
0x34eb   :  { %9701 = vmatprep.subr.mxu0 %v7342_v51  ;;  %9708 = vmatprep.subr.mxu1 %v7231_v6 }
0x34ec   :  { %9702 = vmatpush3.msra.mxu0 %v7342_v51  ;;  %9709 = vmatpush3.msra.mxu1 %v7231_v6 }
0x34ed   :  { %9713 = vmatprep.subr.msk.mxu0 %vm229_vm3, %v10932_v30  ;;  %9720 = vmatprep.subr.mxu1 %v10996_v37 }
0x35a4   :  { %v9698_v0 = vpop.f32.mrf.mxu1  ;;  %v9691_v16 = vpop.f32.mrf.mxu0 }
0x35a5   :  { %v7317_v10 = vmul.f32 0.35355338, %v9698_v0  ;;  %v7206_v39 = vmul.f32 0.35355338, %v9691_v16 }
0x35a6   :  { %v7307_v41 = vpop.f32.mrf.mxu1  ;;  %v7196_v17 = vpop.f32.mrf.mxu0 }
0x35a7   :  { %v7319_v43 = vadd.f32 %v11001_v4, %v7317_v10  ;;  %v7316_v14 = vmul.f32 0.35355338, %v7307_v41  ;;  %v7205_v40 = vmul.f32 0.35355338, %v7196_v17  ;;  %v7208_v12 = vadd.f32 %v11001_v4, %v7206_v39 }
0x35a9   :  { %v7318_v57 = vadd.f32 %v11004_v11, %v7316_v14  ;;  %v7323_v54 = vsel %vm38_vm0, %v7319_v43, -inf  ;;  %v7207_v23 = vadd.f32 %v11004_v11, %v7205_v40  ;;  %v7212_v56 = vsel %vm38_vm0, %v7208_v12, -inf }
0x35aa   :  { %7324 = vmax.xlane.f32.xlu1 %v7323_v54 }
0x35ab   :  { %v7320_v63 = vsel %vm38_vm0, %v7318_v57, -inf  ;;  %v7209_v24 = vsel %vm38_vm0, %v7207_v23, -inf }
0x35ac   :  { %7321 = vmax.xlane.f32.xlu0 %v7320_v63 }
0x3633   :  { %v7325_v3 = vpop.xlane.xlu1 %7324 }
0x3634   :  { %v7327_v18 = vsub.f32 %v7319_v43, %v7325_v3 }
0x3635   :  { %v7322_v2 = vpop.xlane.xlu0 %7321 }
0x3636   :  { %v7330_v44 = vmul.f32 1.442695, %v7327_v18  ;;  %v7326_v13 = vsub.f32 %v7318_v57, %v7322_v2 }
0x3638   :  { %9988 = vpow2.f32 %v7330_v44  ;;  %v7328_v15 = vmul.f32 1.442695, %v7326_v13 }
0x363a   :  { %9990 = vpow2.f32 %v7328_v15 }
0x3645   :  { %v9989_v19 = vpop.eup %9988 }
0x3646   :  { %v7335_v5 = vsel %vm38_vm0, %v9989_v19, 0.0 }
0x3647   :  { %v9991_v22 = vpop.eup %9990  ;;  %7336 = vadd.xlane.f32.xlu1 %v7335_v5  ;;  %v7615_v5 = vmul.f32 %v10890_v32, %v10984_v48  ;;  %v7700_v32 = vmul.f32 %v10850_v55, %v10968_v47  ;;  %v7701_v48 = vmul.f32 %v10850_v55, %v10966_v59 }
0x3648   :  { %v7332_v50 = vsel %vm38_vm0, %v9991_v22, 0.0 }
0x3649   :  { %7333 = vadd.xlane.f32.xlu0 %v7332_v50 }
0x364b   :  { %7213 = vmax.xlane.f32.xlu1 %v7212_v56 }
0x364d   :  { %7210 = vmax.xlane.f32.xlu0 %v7209_v24 }
0x36d0   :  { %v7337_v26 = vpop.xlane.xlu1 %7336 }
0x36d1   :  { %9992 = vrcp.f32 %v7337_v26 }
0x36d2   :  { %v7334_v9 = vpop.xlane.xlu0 %7333 }
0x36d3   :  { %9994 = vrcp.f32 %v7334_v9 }
0x36d4   :  { %v7214_v62 = vpop.xlane.xlu1 %7213 }
0x36d5   :  { %v7216_v7 = vsub.f32 %v7208_v12, %v7214_v62 }
0x36d6   :  { %v7211_v20 = vpop.xlane.xlu0 %7210 }
0x36d7   :  { %v7215_v25 = vsub.f32 %v7207_v23, %v7211_v20  ;;  %v7219_v21 = vmul.f32 1.442695, %v7216_v7 }
0x36d9   :  { %v7217_v46 = vmul.f32 1.442695, %v7215_v25  ;;  %9996 = vpow2.f32 %v7219_v21 }
0x36db   :  { %9998 = vpow2.f32 %v7217_v46 }
0x36de   :  { %v9993_v60 = vpop.eup %9992 }
0x36df   :  { %v7341_v27 = vmul.f32 %v9993_v60, %v9989_v19 }
0x36e0   :  { %v9995_v29 = vpop.eup %9994 }
0x36e1   :  { %v7340_v38 = vmul.f32 %v9995_v29, %v9991_v22 }
0x36e3   :  { %9703 = vmatprep.mubr.msk.f32.mxu0 %vm38_vm0, %v7340_v38 }
0x36e4   :  { %9704 = vmatmul.mubr.msk.f32.vlgmr.msra.gmra.mxu0 %vm38_vm0, %v7341_v27 }
0x36e5   :  { %9714 = vmatpush3.xpose.msk.msra.mxu0 %vm229_vm3, %v10932_v30  ;;  %9717 = vmatprep.mubr.msk.f32.mxu0 %vm229_vm3, %v7506_v28 }
0x36e6   :  { %9715 = vmatprep.subr.msk.mxu0 %vm229_vm3, %v10934_v61  ;;  %v9997_v6 = vpop.eup %9996 }
0x36e7   :  { %v7224_v41 = vsel %vm38_vm0, %v9997_v6, 0.0 }
0x36e8   :  { %v9999_v10 = vpop.eup %9998 }
0x36e9   :  { %9716 = vmatpush3.xpose.msk.msra.mxu0 %vm229_vm3, %v10934_v61  ;;  %v7221_v43 = vsel %vm38_vm0, %v9999_v10, 0.0 }
0x36ea   :  { %9734 = vmatprep.subr.mxu0 %v7810_v31 }
0x36ec   :  { %9718 = vmatmul.mubr.msk.f32.vlgmr.msra.gmra.mxu0 %vm229_vm3, %v7507_v36 }
0x36ed   :  { %9735 = vmatpush3.msra.mxu0 %v7810_v31 }
0x36ee   :  { %9736 = vmatprep.subr.mxu0 %v7809_v8 }
0x36ef   :  { %9737 = vmatpush3.msra.mxu0 %v7809_v8 }
0x37a4   :  { %v11033_v33 = vpop.f32.mrf.mxu0 }
0x37a6   :  { %v11035_v58 = vpop.f32.mrf.mxu0 }
0x37ac   :  { %v9719_v52 = vpop.f32.mrf.mxu0 }
0x37ad   :  { %v7590_v1 = vmul.f32 0.35355338, %v9719_v52  ;;  %v7897_v52 = vld [vmem:[#allocation2 + $0x4b8] sm:$0xff] }
0x37ae   :  { %v7580_v45 = vpop.f32.mrf.mxu0  ;;  %9741 = vmatprep.subr.mxu0 %v7897_v52 }
0x37af   :  { %v7592_v49 = vadd.f32 %v11001_v4, %v7590_v1  ;;  %v7589_v42 = vmul.f32 0.35355338, %v7580_v45 }
0x37b1   :  { %v7591_v53 = vadd.f32 %v11004_v11, %v7589_v42  ;;  %v7596_v51 = vsel %vm38_vm0, %v7592_v49, -inf }
0x37b2   :  { %7597 = vmax.xlane.f32.xlu1 %v7596_v51 }
0x37b3   :  { %v7593_v0 = vsel %vm38_vm0, %v7591_v53, -inf }
0x37b4   :  { %7594 = vmax.xlane.f32.xlu0 %v7593_v0  ;;  %v7895_v0 = vld [vmem:[#allocation2 + $0x4a8] sm:$0xff] }
0x37b6   :  { %7225 = vadd.xlane.f32.xlu1 %v7224_v41 }
0x37b8   :  { %7222 = vadd.xlane.f32.xlu0 %v7221_v43 }
0x383b   :  { %v7598_v14 = vpop.xlane.xlu1 %7597 }
0x383c   :  { %v7600_v57 = vsub.f32 %v7592_v49, %v7598_v14 }
0x383d   :  { %v7595_v54 = vpop.xlane.xlu0 %7594 }
0x383e   :  { %v7603_v63 = vmul.f32 1.442695, %v7600_v57  ;;  %v7599_v3 = vsub.f32 %v7591_v53, %v7595_v54 }
0x383f   :  { %v7226_v18 = vpop.xlane.xlu1 %7225 }
0x3840   :  { %10000 = vpow2.f32 %v7603_v63  ;;  %v7601_v2 = vmul.f32 1.442695, %v7599_v3  ;;  %v8610_v3 = vld [vmem:[#allocation2 + $0x54d] ss:$0 sm:$0xff] }
0x3841   :  { %10002 = vrcp.f32 %v7226_v18  ;;  %v7223_v44 = vpop.xlane.xlu0 %7222 }
0x3842   :  { %10004 = vpow2.f32 %v7601_v2 }
0x3843   :  { %10006 = vrcp.f32 %v7223_v44 }
0x384d   :  { %v10001_v13 = vpop.eup %10000 }
0x384e   :  { %v10003_v15 = vpop.eup %10002  ;;  %v7608_v16 = vsel %vm38_vm0, %v10001_v13, 0.0 }
0x384f   :  { %v10005_v17 = vpop.eup %10004  ;;  %7609 = vadd.xlane.f32.xlu1 %v7608_v16  ;;  %v7230_v12 = vmul.f32 %v10003_v15, %v9997_v6  ;;  %v7896_v6 = vld [vmem:[#allocation2 + $0x4b0] sm:$0xff] }
0x3850   :  { %v10007_v39 = vpop.eup %10006  ;;  %v7605_v40 = vsel %vm38_vm0, %v10005_v17, 0.0 }
0x3851   :  { %7606 = vadd.xlane.f32.xlu0 %v7605_v40  ;;  %v7229_v19 = vmul.f32 %v10007_v39, %v9999_v10  ;;  %v7894_v10 = vld [vmem:[#allocation2 + $0x4a0] sm:$0xff] }
0x3853   :  { %9710 = vmatprep.mubr.msk.f32.mxu1 %vm38_vm0, %v7229_v19 }
0x3854   :  { %9711 = vmatmul.mubr.msk.f32.vlgmr.msra.gmra.mxu1 %vm38_vm0, %v7230_v12 }
0x3855   :  { %9721 = vmatpush3.msra.mxu1 %v10996_v37 }
0x3856   :  { %9722 = vmatprep.subr.mxu1 %v7615_v5 }
0x3857   :  { %9723 = vmatpush3.msra.mxu1 %v7615_v5 }
0x3858   :  { %9727 = vmatprep.subr.msk.mxu1 %vm229_vm3, %v10932_v30 }
0x38d8   :  { %v7610_v22 = vpop.xlane.xlu1 %7609 }
0x38d9   :  { %10008 = vrcp.f32 %v7610_v22 }
0x38da   :  { %v7607_v23 = vpop.xlane.xlu0 %7606 }
0x38db   :  { %10010 = vrcp.f32 %v7607_v23 }
0x38e6   :  { %v10009_v50 = vpop.eup %10008 }
0x38e7   :  { %v7614_v26 = vmul.f32 %v10009_v50, %v10001_v13 }
0x38e8   :  { %v10011_v56 = vpop.eup %10010 }
0x38e9   :  { %v7613_v24 = vmul.f32 %v10011_v56, %v10005_v17 }
0x38eb   :  { %9724 = vmatprep.mubr.msk.f32.mxu1 %vm38_vm0, %v7613_v24  ;;  %v8028_v24 = vld [vmem:[#allocation2 + $0x4d0] sm:$0xff] }
0x38ec   :  { %9725 = vmatmul.mubr.msk.f32.vlgmr.msra.gmra.mxu1 %vm38_vm0, %v7614_v26  ;;  %v8027_v26 = vld [vmem:[#allocation2 + $0x4c8] sm:$0xff] }
0x38ed   :  { %9728 = vmatpush3.xpose.msk.msra.mxu1 %vm229_vm3, %v10932_v30  ;;  %9731 = vmatprep.mubr.msk.f32.mxu1 %vm229_vm3, %v7700_v32  ;;  %v8026_v32 = vld [vmem:[#allocation2 + $0x4c0] sm:$0xff] }
0x38ee   :  { %9729 = vmatprep.subr.msk.mxu1 %vm229_vm3, %v10934_v61 }
0x38f1   :  { %9730 = vmatpush3.xpose.msk.msra.mxu1 %vm229_vm3, %v10934_v61 }
0x38f4   :  { %9732 = vmatmul.mubr.msk.f32.vlgmr.msra.gmra.mxu1 %vm229_vm3, %v7701_v48  ;;  %v8125_v48 = vld [vmem:[#allocation2 + $0x518] sm:$0xff] }
0x3914   :  { %v9712_v37 = vpop.f32.mrf.mxu1 }
0x3915   :  { %v7503_v9 = vadd.f32 %v9712_v37, %v11033_v33  ;;  %v8124_v37 = vld [vmem:[#allocation2 + $0x510] sm:$0xff] }
0x3916   :  { %v7497_v47 = vpop.f32.mrf.mxu1 }
0x3917   :  { %v7498_v41 = vadd.f32 %v7497_v47, %v11035_v58  ;;  %v8123_v47 = vld [vmem:[#allocation2 + $0x508] sm:$0xff] }
0x39ac   :  { %v9726_v60 = vpop.f32.mrf.mxu1 }
0x39ad   :  { %v7699_v29 = vadd.f32 %v9726_v60, %v7503_v9  ;;  %v8122_v9 = vld [vmem:[#allocation2 + $0x500] sm:$0xff] }
0x39ae   :  { %v7689_v30 = vpop.f32.mrf.mxu1 }
0x39af   :  { %v7698_v14 = vadd.f32 %v7689_v30, %v7498_v41 }
0x39b4   :  { %v9733_v38 = vpop.f32.mrf.mxu1 }
0x39b5   :  { %v7784_v27 = vmul.f32 0.35355338, %v9733_v38 }
0x39b6   :  { %v7774_v28 = vpop.f32.mrf.mxu1 }
0x39b7   :  { %v7786_v31 = vadd.f32 %v11001_v4, %v7784_v27  ;;  %v7783_v36 = vmul.f32 0.35355338, %v7774_v28 }
0x39b9   :  { %v7785_v61 = vadd.f32 %v11004_v11, %v7783_v36  ;;  %v7790_v8 = vsel %vm38_vm0, %v7786_v31, -inf  ;;  %v8613_v36 = vld [vmem:[#allocation2 + $0x552] ss:$0 sm:$0xff] }
0x39ba   :  { %7791 = vmax.xlane.f32.xlu1 %v7790_v8 }
0x39bb   :  { %v7787_v55 = vsel %vm38_vm0, %v7785_v61, -inf }
0x39bc   :  { %7788 = vmax.xlane.f32.xlu0 %v7787_v55 }
0x3a43   :  { %v7792_v59 = vpop.xlane.xlu1 %7791 }
0x3a44   :  { %v7794_v62 = vsub.f32 %v7786_v31, %v7792_v59 }
0x3a45   :  { %v7789_v20 = vpop.xlane.xlu0 %7788 }
0x3a46   :  { %v7797_v7 = vmul.f32 1.442695, %v7794_v62  ;;  %v7793_v25 = vsub.f32 %v7785_v61, %v7789_v20  ;;  %v8614_v62 = vld [vmem:[#allocation2 + $0x553] ss:$0 sm:$0xff] }
0x3a48   :  { %10012 = vpow2.f32 %v7797_v7  ;;  %v7795_v21 = vmul.f32 1.442695, %v7793_v25 }
0x3a4a   :  { %10014 = vpow2.f32 %v7795_v21  ;;  %v8121_v21 = vld [vmem:[#allocation2 + $0x4f8] sm:$0xff] }
0x3a55   :  { %v10013_v46 = vpop.eup %10012 }
0x3a56   :  { %v7802_v4 = vsel %vm38_vm0, %v10013_v46, 0.0 }
0x3a57   :  { %v10015_v33 = vpop.eup %10014  ;;  %7803 = vadd.xlane.f32.xlu1 %v7802_v4  ;;  %v8119_v4 = vld [vmem:[#allocation2 + $0x4e8] sm:$0xff] }
0x3a58   :  { %v7799_v11 = vsel %vm38_vm0, %v10015_v33, 0.0 }
0x3a59   :  { %7800 = vadd.xlane.f32.xlu0 %v7799_v11  ;;  %v8615_v11 = vld [vmem:[#allocation2 + $0x54e] ss:$0 sm:$0xff] }
0x3ae0   :  { %v7804_v1 = vpop.xlane.xlu1 %7803 }
0x3ae1   :  { %10016 = vrcp.f32 %v7804_v1 }
0x3ae2   :  { %v7801_v45 = vpop.xlane.xlu0 %7800 }
0x3ae3   :  { %10018 = vrcp.f32 %v7801_v45 }
0x3aee   :  { %v10017_v49 = vpop.eup %10016 }
0x3aef   :  { %v7808_v51 = vmul.f32 %v10017_v49, %v10013_v46  ;;  %v8120_v46 = vld [vmem:[#allocation2 + $0x4f0] sm:$0xff] }
0x3af0   :  { %v10019_v42 = vpop.eup %10018 }
0x3af1   :  { %v7807_v53 = vmul.f32 %v10019_v42, %v10015_v33  ;;  %v8118_v33 = vld [vmem:[#allocation2 + $0x4e0] sm:$0xff] }
0x3af3   :  { %9738 = vmatprep.mubr.msk.f32.mxu0 %vm38_vm0, %v7807_v53 }
0x3af4   :  { %9739 = vmatmul.mubr.msk.f32.vlgmr.msra.gmra.mxu0 %vm38_vm0, %v7808_v51  ;;  %v8618_v51 = vld [vmem:[#allocation2 + $0x54f] ss:$0 sm:$0xff] }
0x3af5   :  { %9742 = vmatpush3.msra.mxu0 %v7897_v52 }
0x3af6   :  { %9743 = vmatprep.subr.mxu0 %v7896_v6 }
0x3af7   :  { %9744 = vmatpush3.msra.mxu0 %v7896_v6 }
0x3af8   :  { %9745 = vmatprep.subr.mxu0 %v7895_v0 }
0x3af9   :  { %9746 = vmatpush3.msra.mxu0 %v7895_v0 }
0x3afa   :  { %9747 = vmatprep.subr.mxu0 %v7894_v10 }
0x3afb   :  { %9748 = vmatpush3.msra.mxu0 %v7894_v10 }
0x3afc   :  { %9763 = vmatprep.subr.mxu0 %v8125_v48 }
0x3bb4   :  { %v9740_v43 = vpop.f32.mrf.mxu0 }
0x3bb5   :  { %v7893_v63 = vadd.f32 %v9740_v43, %v7699_v29 }
0x3bb6   :  { %v7883_v57 = vpop.f32.mrf.mxu0 }
0x3bb7   :  { %v7892_v54 = vadd.f32 %v7883_v57, %v7698_v14 }
0x3bb9   :  { %9749 = vmatprep.mubr.msk.f32.mxu0 %vm229_vm3, %v7892_v54 }
0x3bba   :  { %9750 = vmatmul.mubr.msk.f32.vlgmr.msra.gmra.mxu0 %vm229_vm3, %v7893_v63 }
0x3bbb   :  { %9764 = vmatpush3.msra.mxu0 %v8125_v48 }
0x3bbc   :  { %9765 = vmatprep.subr.mxu0 %v8124_v37 }
0x3bbd   :  { %9766 = vmatpush3.msra.mxu0 %v8124_v37 }
0x3bbe   :  { %9767 = vmatprep.subr.mxu0 %v8123_v47 }
0x3bbf   :  { %9768 = vmatpush3.msra.mxu0 %v8123_v47  ;;  %v8622_v47 = vld [vmem:[#allocation2 + $0x555] ss:$0 sm:$0xff] }
0x3bc0   :  { %9769 = vmatprep.subr.mxu0 %v8122_v9 }
0x3bc1   :  { %9770 = vmatpush3.msra.mxu0 %v8122_v9 }
0x3bc2   :  { %9771 = vmatprep.subr.mxu0 %v8121_v21 }
0x3bc3   :  { %9772 = vmatpush3.msra.mxu0 %v8121_v21 }
0x3bc4   :  { %9773 = vmatprep.subr.mxu0 %v8120_v46 }
0x3bc5   :  { %9774 = vmatpush3.msra.mxu0 %v8120_v46 }
0x3bc6   :  { %9775 = vmatprep.subr.mxu0 %v8119_v4 }
0x3bc7   :  { %9776 = vmatpush3.msra.mxu0 %v8119_v4 }
0x3bc8   :  { %9777 = vmatprep.subr.mxu0 %v8118_v33 }
0x3bc9   :  { %9778 = vmatpush3.msra.mxu0 %v8118_v33 }
0x3c7a   :  { %v9751_v18 = vpop.f32.mrf.mxu0 }
0x3c7b   :  { %v7981_v2 = vadd.f32 %v9751_v18, %v8610_v3 }
0x3c7c   :  { %v7975_v44 = vpop.f32.mrf.mxu0 }
0x3c7d   :  { %v7985_v13 = vadd.f32 %v7981_v2, %v10948_v35  ;;  %v7976_v15 = vadd.f32 %v8610_v3, %v7975_v44 }
0x3c7f   :  { %v7984_v16 = vadd.f32 %v7976_v15, %v10946_v34  ;;  %v7991_v58 = vsel %vm229_vm3, %v7985_v13, 0.0  ;;  %v8029_v34 = vld [vmem:[#allocation2 + $0x4d8] sm:$0xff] }
0x3c80   :  { %7992 = vadd.xlane.f32.xlu1 %v7991_v58  ;;  %9752 = vmatprep.subr.mxu1 %v8029_v34 }
0x3c81   :  { %v7988_v17 = vsel %vm229_vm3, %v7984_v16, 0.0  ;;  %9753 = vmatpush3.msra.mxu1 %v8029_v34 }
0x3c82   :  { %7989 = vadd.xlane.f32.xlu0 %v7988_v17  ;;  %9754 = vmatprep.subr.mxu1 %v8028_v24 }
0x3c83   :  { %9755 = vmatpush3.msra.mxu1 %v8028_v24  ;;  %v8621_v24 = vld [vmem:[#allocation2 + $0x554] ss:$0 sm:$0xff] }
0x3c84   :  { %9756 = vmatprep.subr.mxu1 %v8027_v26 }
0x3c85   :  { %9757 = vmatpush3.msra.mxu1 %v8027_v26 }
0x3c86   :  { %9758 = vmatprep.subr.mxu1 %v8026_v32 }
0x3c87   :  { %9759 = vmatpush3.msra.mxu1 %v8026_v32 }
0x3d09   :  { %v7993_v39 = vpop.xlane.xlu1 %7992 }
0x3d0a   :  { %v7995_v40 = vmul.f32 0.03125, %v7993_v39  ;;  %v8257_v39 = vld [vmem:[#allocation2 + $0x98] sm:$0xff] }
0x3d0b   :  { %v7990_v19 = vpop.xlane.xlu0 %7989  ;;  %9782 = vmatprep.subr.mxu1 %v8257_v39 }
0x3d0c   :  { %v7997_v12 = vsub.f32 %v7985_v13, %v7995_v40  ;;  %v7994_v5 = vmul.f32 0.03125, %v7990_v19  ;;  %v8256_v40 = vld [vmem:[#allocation2 + $0x90] sm:$0xff]  ;;  %v8255_v19 = vld [vmem:[#allocation2 + $0x88] sm:$0xff] }
0x3d0e   :  { %v7996_v22 = vsub.f32 %v7984_v16, %v7994_v5  ;;  %v7999_v23 = vmul.f32 %v7997_v12, %v7997_v12 }
0x3d10   :  { %v8003_v50 = vsel %vm229_vm3, %v7999_v23, 0.0  ;;  %v7998_v56 = vmul.f32 %v7996_v22, %v7996_v22 }
0x3d11   :  { %8004 = vadd.xlane.f32.xlu1 %v8003_v50 }
0x3d12   :  { %v8000_v35 = vsel %vm229_vm3, %v7998_v56, 0.0 }
0x3d13   :  { %8001 = vadd.xlane.f32.xlu0 %v8000_v35 }
0x3d9a   :  { %v8005_v60 = vpop.xlane.xlu1 %8004 }
0x3d9b   :  { %v8007_v29 = vmul.f32 0.03125, %v8005_v60 }
0x3d9c   :  { %v8002_v30 = vpop.xlane.xlu0 %8001 }
0x3d9d   :  { %v8009_v38 = vadd.f32 1e-05, %v8007_v29  ;;  %v8006_v27 = vmul.f32 0.03125, %v8002_v30  ;;  %v8623_v30 = vld [vmem:[#allocation2 + $0x521] ss:$0 sm:$0xff] }
0x3d9f   :  { %10020 = vrsqrt.f32 %v8009_v38  ;;  %v8008_v28 = vadd.f32 1e-05, %v8006_v27 }
0x3da1   :  { %10022 = vrsqrt.f32 %v8008_v28 }
0x3dac   :  { %v10021_v31 = vpop.eup %10020 }
0x3dad   :  { %v8013_v61 = vmul.f32 %v10021_v31, %v7997_v12  ;;  %v8254_v12 = vld [vmem:[#allocation2 + $0x80] sm:$0xff] }
0x3dae   :  { %v10023_v8 = vpop.eup %10022 }
0x3daf   :  { %v8012_v55 = vmul.f32 %v10023_v8, %v7996_v22  ;;  %v8019_v59 = vmul.f32 %v8613_v36, %v8013_v61 }
0x3db1   :  { %v8018_v20 = vmul.f32 %v8613_v36, %v8012_v55  ;;  %v8025_v25 = vadd.f32 %v8614_v62, %v8019_v59 }
0x3db3   :  { %v8024_v7 = vadd.f32 %v8614_v62, %v8018_v20 }
0x3db5   :  { %9760 = vmatprep.mubr.msk.f32.mxu1 %vm229_vm3, %v8024_v7 }
0x3db6   :  { %9761 = vmatmul.mubr.msk.f32.vlgmr.msra.gmra.mxu1 %vm229_vm3, %v8025_v25 }
0x3db7   :  { %9783 = vmatpush3.msra.mxu1 %v8257_v39 }
0x3db8   :  { %9784 = vmatprep.subr.mxu1 %v8256_v40 }
0x3db9   :  { %9785 = vmatpush3.msra.mxu1 %v8256_v40 }
0x3dba   :  { %9786 = vmatprep.subr.mxu1 %v8255_v19 }
0x3dbb   :  { %9787 = vmatpush3.msra.mxu1 %v8255_v19 }
0x3dbc   :  { %9788 = vmatprep.subr.mxu1 %v8254_v12 }
0x3dbd   :  { %9789 = vmatpush3.msra.mxu1 %v8254_v12 }
0x3e76   :  { %v9762_v52 = vpop.f32.mrf.mxu1 }
0x3e77   :  { %v8113_v1 = vadd.f32 %v9762_v52, %v8615_v11 }
0x3e78   :  { %v8107_v45 = vpop.f32.mrf.mxu1 }
0x3e79   :  { %v8108_v49 = vadd.f32 %v8615_v11, %v8107_v45  ;;  %v8117_v53 = vmax.f32 %v8113_v1, 0.0 }
0x3e7b   :  { %v8116_v42 = vmax.f32 %v8108_v49, 0.0 }
0x3e7d   :  { %9779 = vmatprep.mubr.msk.f32.mxu0 %vm1511_vm4, %v8116_v42 }
0x3e7e   :  { %9780 = vmatmul.mubr.msk.f32.vlgmr.msra.gmra.mxu0 %vm1511_vm4, %v8117_v53 }
0x3f3e   :  { %v9781_v6 = vpop.f32.mrf.mxu0 }
0x3f3f   :  { %v8209_v0 = vadd.f32 %v9781_v6, %v8618_v51 }
0x3f40   :  { %v8203_v10 = vpop.f32.mrf.mxu0 }
0x3f41   :  { %v8213_v41 = vadd.f32 %v8209_v0, %v8025_v25  ;;  %v8204_v43 = vadd.f32 %v8618_v51, %v8203_v10 }
0x3f43   :  { %v8212_v14 = vadd.f32 %v8204_v43, %v8024_v7  ;;  %v8219_v57 = vsel %vm229_vm3, %v8213_v41, 0.0 }
0x3f44   :  { %8220 = vadd.xlane.f32.xlu1 %v8219_v57 }
0x3f45   :  { %v8216_v54 = vsel %vm229_vm3, %v8212_v14, 0.0 }
0x3f46   :  { %8217 = vadd.xlane.f32.xlu0 %v8216_v54 }
0x3fcd   :  { %v8221_v63 = vpop.xlane.xlu1 %8220 }
0x3fce   :  { %v8223_v3 = vmul.f32 0.03125, %v8221_v63 }
0x3fcf   :  { %v8218_v18 = vpop.xlane.xlu0 %8217 }
0x3fd0   :  { %v8225_v2 = vsub.f32 %v8213_v41, %v8223_v3  ;;  %v8222_v44 = vmul.f32 0.03125, %v8218_v18 }
0x3fd2   :  { %v8224_v13 = vsub.f32 %v8212_v14, %v8222_v44  ;;  %v8227_v15 = vmul.f32 %v8225_v2, %v8225_v2 }
0x3fd4   :  { %v8231_v16 = vsel %vm229_vm3, %v8227_v15, 0.0  ;;  %v8226_v58 = vmul.f32 %v8224_v13, %v8224_v13 }
0x3fd5   :  { %8232 = vadd.xlane.f32.xlu1 %v8231_v16 }
0x3fd6   :  { %v8228_v17 = vsel %vm229_vm3, %v8226_v58, 0.0 }
0x3fd7   :  { %8229 = vadd.xlane.f32.xlu0 %v8228_v17 }
0x405e   :  { %v8233_v5 = vpop.xlane.xlu1 %8232 }
0x405f   :  { %v8235_v22 = vmul.f32 0.03125, %v8233_v5 }
0x4060   :  { %v8230_v23 = vpop.xlane.xlu0 %8229 }
0x4061   :  { %v8237_v50 = vadd.f32 1e-05, %v8235_v22  ;;  %v8234_v56 = vmul.f32 0.03125, %v8230_v23 }
0x4063   :  { %10024 = vrsqrt.f32 %v8237_v50  ;;  %v8236_v35 = vadd.f32 1e-05, %v8234_v56 }
0x4065   :  { %10026 = vrsqrt.f32 %v8236_v35 }
0x4070   :  { %v10025_v34 = vpop.eup %10024 }
0x4071   :  { %v8241_v26 = vmul.f32 %v10025_v34, %v8225_v2 }
0x4072   :  { %v10027_v32 = vpop.eup %10026 }
0x4073   :  { %v8240_v48 = vmul.f32 %v10027_v32, %v8224_v13  ;;  %v8247_v37 = vmul.f32 %v8621_v24, %v8241_v26 }
0x4075   :  { %v8246_v9 = vmul.f32 %v8621_v24, %v8240_v48  ;;  %v8253_v29 = vadd.f32 %v8622_v47, %v8247_v37 }
0x4077   :  { %v8252_v60 = vadd.f32 %v8622_v47, %v8246_v9 }
0x4079   :  { %9790 = vmatprep.mubr.msk.f32.mxu1 %vm229_vm3, %v8252_v60 }
0x407a   :  { %9791 = vmatmul.mubr.msk.f32.vlgmr.msra.gmra.mxu1 %vm229_vm3, %v8253_v29 }
0x413a   :  { %v9792_v38 = vpop.f32.mrf.mxu1 }
0x413b   :  { %v8341_v27 = vadd.f32 %v9792_v38, %v8623_v30 }
0x413c   :  { %v8335_v28 = vpop.f32.mrf.mxu1 }
0x413d   :  { %8345 = vst [vmem:[%s11103_s3 + $0x8] sm:$0xff] %v8341_v27  ;;  %v8336_v31 = vadd.f32 %v8623_v30, %v8335_v28 }
0x413f   :  { %8344 = vst [vmem:[%s11103_s3] sm:$0xff] %v8336_v31 }
0x4140   :  { %8350 = vsyncpa [#allocation3], 1 }

</bundles_post_ra>
